<compile_context>
chip_gen: v7x
topology: tpu7x:2x2x1
jax: 0.10.0
libtpu: 0.0.40
codegen_flags: <defaults>
</compile_context>

<pallas_src>
import functools

import jax
import jax.numpy as jnp
import numpy as np
from jax.experimental import pallas as pl
from jax.experimental.pallas import tpu as pltpu


LANE = 128     # TPU lane width; feature / hidden dims are padded to this.
SUBLANE = 8    # f32 sublane count; batch is padded to this.


# ---------------------------------------------------------------------------
# Fused encoder + decoder kernel (single invocation, no grid).
# ---------------------------------------------------------------------------
def seq2seq_kernel(xe_ref, xd_ref,
                   e_wih_ref, e_whh_ref, e_bi_ref, e_bhn_ref,
                   d_wih_ref, d_whh_ref, d_bi_ref, d_bhn_ref,
                   wp_ref, bp_ref,
                   out_ref, hs_ref, *, Te, Td, Bp, Hp):
    f32 = jnp.float32
    bf16 = jnp.bfloat16

    xe = xe_ref[...]                                                   # (Te*Bp, Ip) f32
    xd = xd_ref[...]                                                   # (Td*Bp, Ip) f32

    # ---- hoisted (non-recurrent) input-side matmuls: one MXU op per sequence.
    # e_bi / d_bi already contain b_ih + [b_hr | b_hz | 0] (folded once at prep time).
    gi_e = jnp.dot(xe.astype(bf16), e_wih_ref[...],
                   preferred_element_type=f32) + e_bi_ref[...]         # (Te*Bp, 3Hp)
    gi_d = jnp.dot(xd.astype(bf16), d_wih_ref[...],
                   preferred_element_type=f32) + d_bi_ref[...]         # (Td*Bp, 3Hp)

    e_whh = e_whh_ref[...]                                             # (Hp, 3Hp) bf16
    d_whh = d_whh_ref[...]
    # hoist the bias broadcasts out of the unrolled loops (JAX does not CSE them)
    e_bhn = jnp.broadcast_to(e_bhn_ref[...], (Bp, Hp))
    d_bhn = jnp.broadcast_to(d_bhn_ref[...], (Bp, Hp))

    def gru_step(gi_t, h, whh, bhn):
        # PyTorch GRU semantics, gate order [r, z, n]; only h @ W_hh^T stays on the
        # serial path (single-pass bf16 MXU).  All slices are 128-lane aligned.
        gh = jnp.dot(h.astype(bf16), whh, preferred_element_type=f32)  # (Bp, 3Hp)
        rz = jax.nn.sigmoid(gi_t[:, :2 * Hp] + gh[:, :2 * Hp])         # fused r|z sigmoid
        r = rz[:, :Hp]
        z = rz[:, Hp:]
        n = jnp.tanh(gi_t[:, 2 * Hp:] + r * (gh[:, 2 * Hp:] + bhn))
        return (1.0 - z) * n + z * h

    # ---- encoder recurrence (fully unrolled; h carried in vregs; h0 = 0)
    h = jnp.zeros((Bp, Hp), f32)
    for t in range(Te):
        h = gru_step(gi_e[t * Bp:(t + 1) * Bp, :], h, e_whh, e_bhn)

    # ---- decoder recurrence (pure teacher-forced inputs, per module defaults)
    for t in range(Td):
        h = gru_step(gi_d[t * Bp:(t + 1) * Bp, :], h, d_whh, d_bhn)
        hs_ref[t * Bp:(t + 1) * Bp, :] = h                             # full-tile store

    # ---- hoisted projection + residual add, single lane-dense store
    proj = jnp.dot(hs_ref[...].astype(bf16), wp_ref[...],
                   preferred_element_type=f32) + bp_ref[...]
    out_ref[...] = (xd + proj).astype(out_ref.dtype)


# ---------------------------------------------------------------------------
# One-time parameter preprocessing (OUT of the hot path): pad, fold biases, bf16-cast.
# Padded hidden lanes provably stay exactly 0 through the GRU update (gi_pad = gh_pad =
# b_pad = 0 -> n_pad = 0, h'_pad = 0.5 * h_pad with h_pad starting at 0), and padded
# weight rows/cols are 0, so results match the unpadded math in the real lanes.
# ---------------------------------------------------------------------------
def _pad_gate_cols(w, H, Hp):
    """(rows, 3H) -> (rows, 3Hp): place each gate block at a 128-lane boundary."""
    out = jnp.zeros((w.shape[0], 3 * Hp), w.dtype)
    for g in range(3):
        out = out.at[:, g * Hp:g * Hp + H].set(w[:, g * H:(g + 1) * H])
    return out


def _pad_rows(w, rows_pad):
    return jnp.pad(w, ((0, rows_pad - w.shape[0]), (0, 0)))


def _pad_cols(w, cols_pad):
    return jnp.pad(w, ((0, 0), (0, cols_pad - w.shape[1])))


def prepare_params(params):
    I, threeH = params["enc_wih_t"].shape
    H = threeH // 3
    Ip = LANE * pl.cdiv(I, LANE)   # 63 -> 128
    Hp = LANE * pl.cdiv(H, LANE)   # 32 -> 128
    bf16 = jnp.bfloat16

    def gru(prefix):
        wih = params[f"{prefix}_wih_t"]
        whh = params[f"{prefix}_whh_t"]
        bih = params[f"{prefix}_bih"]
        bhh = params[f"{prefix}_bhh"]
        # fold b_hr, b_hz into the hoisted input-side bias; b_hn must stay inside r*(...)
        bi = bih.at[:, 0:2 * H].add(bhh[:, 0:2 * H])
        bhn = bhh[:, 2 * H:3 * H]
        return {
            f"{prefix}_wih": _pad_rows(_pad_gate_cols(wih, H, Hp), Ip).astype(bf16),
            f"{prefix}_whh": _pad_rows(_pad_gate_cols(whh, H, Hp), Hp).astype(bf16),
            f"{prefix}_bi":  _pad_gate_cols(bi, H, Hp).astype(jnp.float32),
            f"{prefix}_bhn": _pad_cols(bhn, Hp).astype(jnp.float32),
        }

    prepared = {}
    prepared.update(gru("enc"))
    prepared.update(gru("dec"))
    prepared["proj_w"] = _pad_rows(_pad_cols(params["proj_w_t"], Ip), Hp).astype(bf16)
    prepared["proj_b"] = _pad_cols(params["proj_b"], Ip).astype(jnp.float32)
    return prepared


# ---------------------------------------------------------------------------
# Jitted forward: only input transpose/pad + pallas_call + strip are on the hot path.
# ---------------------------------------------------------------------------
@jax.jit
def seq2seq_forward(encoder_inputs, decoder_inputs, prepared):
    """encoder_inputs: (B, Te, I), decoder_inputs: (B, Td, I) — batch first, exactly
    like the PyTorch module. Returns (B, Td, I)."""
    B, Te, I = encoder_inputs.shape
    _, Td, _ = decoder_inputs.shape
    Hp, Ip = prepared["proj_w"].shape
    Bp = SUBLANE * pl.cdiv(B, SUBLANE)   # pad batch to a full sublane tile

    def to_slab(x, T):
        x = jnp.transpose(x, (1, 0, 2)).astype(jnp.float32)       # (T, B, I)
        x = jnp.pad(x, ((0, 0), (0, Bp - B), (0, Ip - I)))        # (T, Bp, Ip)
        return x.reshape(T * Bp, Ip)

    xe = to_slab(encoder_inputs, Te)
    xd = to_slab(decoder_inputs, Td)

    kernel = functools.partial(seq2seq_kernel, Te=Te, Td=Td, Bp=Bp, Hp=Hp)
    vmem = lambda: pl.BlockSpec(memory_space=pltpu.MemorySpace.VMEM)
    out2d = pl.pallas_call(
        kernel,
        out_shape=jax.ShapeDtypeStruct((Td * Bp, Ip), jnp.float32),
        in_specs=[vmem() for _ in range(12)],
        out_specs=vmem(),
        scratch_shapes=[pltpu.VMEM((Td * Bp, Hp), jnp.float32)],
        input_output_aliases={1: 0},   # output is a pure read-modify-write of xd
    )(xe, xd,
      prepared["enc_wih"], prepared["enc_whh"], prepared["enc_bi"], prepared["enc_bhn"],
      prepared["dec_wih"], prepared["dec_whh"], prepared["dec_bi"], prepared["dec_bhn"],
      prepared["proj_w"], prepared["proj_b"])

    out = out2d.reshape(Td, Bp, Ip)[:, :B, :I]                        # strip padding
    return jnp.transpose(out, (1, 0, 2))                              # (B, Td, I)


# ---------------------------------------------------------------------------
# Pure-JAX f32 reference (unpadded math, faithful to the PyTorch module).
# ---------------------------------------------------------------------------
def _gru_cell_ref(x, h, wih_t, whh_t, bih, bhh):
    H = h.shape[-1]
    gi = jnp.dot(x, wih_t) + bih
    gh = jnp.dot(h, whh_t) + bhh
    r = jax.nn.sigmoid(gi[:, 0 * H:1 * H] + gh[:, 0 * H:1 * H])
    z = jax.nn.sigmoid(gi[:, 1 * H:2 * H] + gh[:, 1 * H:2 * H])
    n = jnp.tanh(gi[:, 2 * H:3 * H] + r * gh[:, 2 * H:3 * H])
    return (1.0 - z) * n + z * h


def seq2seq_reference(encoder_inputs, decoder_inputs, params):
    B, _, I = encoder_inputs.shape
    H = params["enc_whh_t"].shape[0]
    xe = jnp.transpose(encoder_inputs, (1, 0, 2)).astype(jnp.float32)
    xd = jnp.transpose(decoder_inputs, (1, 0, 2)).astype(jnp.float32)
    h = jnp.zeros((B, H), jnp.float32)
    for t in range(xe.shape[0]):
        h = _gru_cell_ref(xe[t], h, params["enc_wih_t"], params["enc_whh_t"],
                          params["enc_bih"], params["enc_bhh"])
    outs = []
    for t in range(xd.shape[0]):
        x = xd[t]
        h = _gru_cell_ref(x, h, params["dec_wih_t"], params["dec_whh_t"],
                          params["dec_bih"], params["dec_bhh"])
        outs.append(x + jnp.dot(h, params["proj_w_t"]) + params["proj_b"])
    return jnp.transpose(jnp.stack(outs, 0), (1, 0, 2))


# ---------------------------------------------------------------------------
# Deterministic parameter init (same distributions as torch.nn.GRU / Linear).
# ---------------------------------------------------------------------------
def init_params(key, input_size, rnn_size):
    ks = jax.random.split(key, 10)
    k_gru = 1.0 / np.sqrt(rnn_size)
    k_lin = 1.0 / np.sqrt(rnn_size)
    u = lambda k, shape, bound: jax.random.uniform(
        k, shape, jnp.float32, minval=-bound, maxval=bound)
    return {
        # encoder GRU (weights stored transposed for in-kernel `x @ W^T`)
        "enc_wih_t": u(ks[0], (input_size, 3 * rnn_size), k_gru),
        "enc_whh_t": u(ks[1], (rnn_size, 3 * rnn_size), k_gru),
        "enc_bih":   u(ks[2], (1, 3 * rnn_size), k_gru),
        "enc_bhh":   u(ks[3], (1, 3 * rnn_size), k_gru),
        # decoder GRU
        "dec_wih_t": u(ks[4], (input_size, 3 * rnn_size), k_gru),
        "dec_whh_t": u(ks[5], (rnn_size, 3 * rnn_size), k_gru),
        "dec_bih":   u(ks[6], (1, 3 * rnn_size), k_gru),
        "dec_bhh":   u(ks[7], (1, 3 * rnn_size), k_gru),
        # projector Linear(rnn_size -> input_size)
        "proj_w_t":  u(ks[8], (rnn_size, input_size), k_lin),
        "proj_b":    u(ks[9], (1, input_size), k_lin),
    }


if __name__ == "__main__":
    num_joints = 21
    input_size = num_joints * 3      # 63
    rnn_size = 32
    batch = 2
    src_len = 8
    tgt_len_minus_1 = 7

    key = jax.random.PRNGKey(0)
    k_p, k_e, k_d = jax.random.split(key, 3)
    params = init_params(k_p, input_size, rnn_size)
    prepared = prepare_params(params)        # one-time: pad + fold + bf16 cast

    encoder_inputs = jax.random.normal(k_e, (batch, src_len, input_size), jnp.float32)
    decoder_inputs = jax.random.normal(k_d, (batch, tgt_len_minus_1, input_size), jnp.float32)

    out = seq2seq_forward(encoder_inputs, decoder_inputs, prepared)
    out = jax.block_until_ready(out)

    ref = jax.block_until_ready(seq2seq_reference(encoder_inputs, decoder_inputs, params))
    assert out.shape == (batch, tgt_len_minus_1, input_size), out.shape
    # tolerance loosened because the kernel uses bf16 MXU operands (f32 accumulate),
    # while the reference is full f32 (expected agreement ~1e-2, per perf review).
    np.testing.assert_allclose(np.asarray(out), np.asarray(ref), rtol=5e-2, atol=5e-2)

    print("KERNEL_OK")
</pallas_src>

<mosaic_0001>
module attributes {stable_mosaic.version = 11 : i64} {
  func.func @seq2seq_kernel(%arg0: memref<64x128xf32, #tpu.memory_space<vmem>>, %arg1: memref<56x128xf32, #tpu.memory_space<vmem>>, %arg2: memref<128x384xbf16, #tpu.memory_space<vmem>>, %arg3: memref<128x384xbf16, #tpu.memory_space<vmem>>, %arg4: memref<1x384xf32, #tpu.memory_space<vmem>>, %arg5: memref<1x128xf32, #tpu.memory_space<vmem>>, %arg6: memref<128x384xbf16, #tpu.memory_space<vmem>>, %arg7: memref<128x384xbf16, #tpu.memory_space<vmem>>, %arg8: memref<1x384xf32, #tpu.memory_space<vmem>>, %arg9: memref<1x128xf32, #tpu.memory_space<vmem>>, %arg10: memref<128x128xbf16, #tpu.memory_space<vmem>>, %arg11: memref<1x128xf32, #tpu.memory_space<vmem>>, %arg12: memref<56x128xf32, #tpu.memory_space<vmem>>, %arg13: memref<56x128xf32, #tpu.memory_space<vmem>>) attributes {dimension_semantics = [], scalar_prefetch = 0 : i64, scratch_operands = 1 : i64, tpu.core_type = #tpu.core_type<tc>} {
    %c0 = arith.constant 0 : index
    %c0_0 = arith.constant 0 : index
    %0 = vector.load %arg0[%c0, %c0_0] : memref<64x128xf32, #tpu.memory_space<vmem>>, vector<64x128xf32>
    %c0_1 = arith.constant 0 : index
    %c0_2 = arith.constant 0 : index
    %1 = vector.load %arg1[%c0_1, %c0_2] : memref<56x128xf32, #tpu.memory_space<vmem>>, vector<56x128xf32>
    %2 = arith.truncf %0 : vector<64x128xf32> to vector<64x128xbf16>
    %c0_3 = arith.constant 0 : index
    %c0_4 = arith.constant 0 : index
    %3 = vector.load %arg2[%c0_3, %c0_4] : memref<128x384xbf16, #tpu.memory_space<vmem>>, vector<128x384xbf16>
    %cst = arith.constant dense<0.000000e+00> : vector<64x384xf32>
    %4 = tpu.matmul %2, %3, %cst {dimension_numbers = #tpu.dot_dimension_numbers<[1], [0], [0], [1], [0, 0, 1, 1], [], []>} : vector<64x128xbf16>, vector<128x384xbf16>, vector<64x384xf32> -> vector<64x384xf32>
    %c0_5 = arith.constant 0 : index
    %c0_6 = arith.constant 0 : index
    %5 = vector.load %arg4[%c0_5, %c0_6] : memref<1x384xf32, #tpu.memory_space<vmem>>, vector<1x384xf32>
    %6 = vector.broadcast %5 : vector<1x384xf32> to vector<64x384xf32>
    %7 = arith.addf %4, %6 : vector<64x384xf32>
    %8 = arith.truncf %1 : vector<56x128xf32> to vector<56x128xbf16>
    %c0_7 = arith.constant 0 : index
    %c0_8 = arith.constant 0 : index
    %9 = vector.load %arg6[%c0_7, %c0_8] : memref<128x384xbf16, #tpu.memory_space<vmem>>, vector<128x384xbf16>
    %cst_9 = arith.constant dense<0.000000e+00> : vector<56x384xf32>
    %10 = tpu.matmul %8, %9, %cst_9 {dimension_numbers = #tpu.dot_dimension_numbers<[1], [0], [0], [1], [0, 0, 1, 1], [], []>} : vector<56x128xbf16>, vector<128x384xbf16>, vector<56x384xf32> -> vector<56x384xf32>
    %c0_10 = arith.constant 0 : index
    %c0_11 = arith.constant 0 : index
    %11 = vector.load %arg8[%c0_10, %c0_11] : memref<1x384xf32, #tpu.memory_space<vmem>>, vector<1x384xf32>
    %12 = vector.broadcast %11 : vector<1x384xf32> to vector<56x384xf32>
    %13 = arith.addf %10, %12 : vector<56x384xf32>
    %c0_12 = arith.constant 0 : index
    %c0_13 = arith.constant 0 : index
    %14 = vector.load %arg3[%c0_12, %c0_13] : memref<128x384xbf16, #tpu.memory_space<vmem>>, vector<128x384xbf16>
    %c0_14 = arith.constant 0 : index
    %c0_15 = arith.constant 0 : index
    %15 = vector.load %arg7[%c0_14, %c0_15] : memref<128x384xbf16, #tpu.memory_space<vmem>>, vector<128x384xbf16>
    %c0_16 = arith.constant 0 : index
    %c0_17 = arith.constant 0 : index
    %16 = vector.load %arg5[%c0_16, %c0_17] : memref<1x128xf32, #tpu.memory_space<vmem>>, vector<1x128xf32>
    %17 = vector.shape_cast %16 : vector<1x128xf32> to vector<1x128xf32>
    %18 = vector.broadcast %17 : vector<1x128xf32> to vector<8x128xf32>
    %c0_18 = arith.constant 0 : index
    %c0_19 = arith.constant 0 : index
    %19 = vector.load %arg9[%c0_18, %c0_19] : memref<1x128xf32, #tpu.memory_space<vmem>>, vector<1x128xf32>
    %20 = vector.shape_cast %19 : vector<1x128xf32> to vector<1x128xf32>
    %21 = vector.broadcast %20 : vector<1x128xf32> to vector<8x128xf32>
    %cst_20 = arith.constant 0.000000e+00 : f32
    %22 = vector.broadcast %cst_20 : f32 to vector<8x128xf32>
    %23 = vector.extract_strided_slice %7 {offsets = [0, 0], sizes = [8, 384], strides = [1, 1]} : vector<64x384xf32> to vector<8x384xf32>
    %24 = arith.truncf %22 : vector<8x128xf32> to vector<8x128xbf16>
    %cst_21 = arith.constant dense<0.000000e+00> : vector<8x384xf32>
    %25 = tpu.matmul %24, %14, %cst_21 {dimension_numbers = #tpu.dot_dimension_numbers<[1], [0], [0], [1], [0, 0, 1, 1], [], []>} : vector<8x128xbf16>, vector<128x384xbf16>, vector<8x384xf32> -> vector<8x384xf32>
    %26 = vector.extract_strided_slice %23 {offsets = [0, 0], sizes = [8, 256], strides = [1, 1]} : vector<8x384xf32> to vector<8x256xf32>
    %27 = vector.extract_strided_slice %25 {offsets = [0, 0], sizes = [8, 256], strides = [1, 1]} : vector<8x384xf32> to vector<8x256xf32>
    %28 = arith.addf %26, %27 : vector<8x256xf32>
    %29 = arith.negf %28 : vector<8x256xf32>
    %30 = math.exp %29 : vector<8x256xf32>
    %cst_22 = arith.constant 1.000000e+00 : f32
    %31 = vector.broadcast %cst_22 : f32 to vector<8x256xf32>
    %32 = arith.addf %31, %30 : vector<8x256xf32>
    %33 = arith.divf %31, %32 : vector<8x256xf32>
    %34 = vector.extract_strided_slice %33 {offsets = [0, 0], sizes = [8, 128], strides = [1, 1]} : vector<8x256xf32> to vector<8x128xf32>
    %35 = vector.extract_strided_slice %33 {offsets = [0, 128], sizes = [8, 128], strides = [1, 1]} : vector<8x256xf32> to vector<8x128xf32>
    %36 = vector.extract_strided_slice %23 {offsets = [0, 256], sizes = [8, 128], strides = [1, 1]} : vector<8x384xf32> to vector<8x128xf32>
    %37 = vector.extract_strided_slice %25 {offsets = [0, 256], sizes = [8, 128], strides = [1, 1]} : vector<8x384xf32> to vector<8x128xf32>
    %38 = arith.addf %37, %18 : vector<8x128xf32>
    %39 = arith.mulf %34, %38 : vector<8x128xf32>
    %40 = arith.addf %36, %39 : vector<8x128xf32>
    %41 = math.tanh %40 : vector<8x128xf32>
    %cst_23 = arith.constant 1.000000e+00 : f32
    %42 = vector.broadcast %cst_23 : f32 to vector<8x128xf32>
    %43 = arith.subf %42, %35 : vector<8x128xf32>
    %44 = arith.mulf %43, %41 : vector<8x128xf32>
    %45 = arith.mulf %35, %22 : vector<8x128xf32>
    %46 = arith.addf %44, %45 : vector<8x128xf32>
    %47 = vector.extract_strided_slice %7 {offsets = [8, 0], sizes = [8, 384], strides = [1, 1]} : vector<64x384xf32> to vector<8x384xf32>
    %48 = arith.truncf %46 : vector<8x128xf32> to vector<8x128xbf16>
    %cst_24 = arith.constant dense<0.000000e+00> : vector<8x384xf32>
    %49 = tpu.matmul %48, %14, %cst_24 {dimension_numbers = #tpu.dot_dimension_numbers<[1], [0], [0], [1], [0, 0, 1, 1], [], []>} : vector<8x128xbf16>, vector<128x384xbf16>, vector<8x384xf32> -> vector<8x384xf32>
    %50 = vector.extract_strided_slice %47 {offsets = [0, 0], sizes = [8, 256], strides = [1, 1]} : vector<8x384xf32> to vector<8x256xf32>
    %51 = vector.extract_strided_slice %49 {offsets = [0, 0], sizes = [8, 256], strides = [1, 1]} : vector<8x384xf32> to vector<8x256xf32>
    %52 = arith.addf %50, %51 : vector<8x256xf32>
    %53 = arith.negf %52 : vector<8x256xf32>
    %54 = math.exp %53 : vector<8x256xf32>
    %cst_25 = arith.constant 1.000000e+00 : f32
    %55 = vector.broadcast %cst_25 : f32 to vector<8x256xf32>
    %56 = arith.addf %55, %54 : vector<8x256xf32>
    %57 = arith.divf %55, %56 : vector<8x256xf32>
    %58 = vector.extract_strided_slice %57 {offsets = [0, 0], sizes = [8, 128], strides = [1, 1]} : vector<8x256xf32> to vector<8x128xf32>
    %59 = vector.extract_strided_slice %57 {offsets = [0, 128], sizes = [8, 128], strides = [1, 1]} : vector<8x256xf32> to vector<8x128xf32>
    %60 = vector.extract_strided_slice %47 {offsets = [0, 256], sizes = [8, 128], strides = [1, 1]} : vector<8x384xf32> to vector<8x128xf32>
    %61 = vector.extract_strided_slice %49 {offsets = [0, 256], sizes = [8, 128], strides = [1, 1]} : vector<8x384xf32> to vector<8x128xf32>
    %62 = arith.addf %61, %18 : vector<8x128xf32>
    %63 = arith.mulf %58, %62 : vector<8x128xf32>
    %64 = arith.addf %60, %63 : vector<8x128xf32>
    %65 = math.tanh %64 : vector<8x128xf32>
    %cst_26 = arith.constant 1.000000e+00 : f32
    %66 = vector.broadcast %cst_26 : f32 to vector<8x128xf32>
    %67 = arith.subf %66, %59 : vector<8x128xf32>
    %68 = arith.mulf %67, %65 : vector<8x128xf32>
    %69 = arith.mulf %59, %46 : vector<8x128xf32>
    %70 = arith.addf %68, %69 : vector<8x128xf32>
    %71 = vector.extract_strided_slice %7 {offsets = [16, 0], sizes = [8, 384], strides = [1, 1]} : vector<64x384xf32> to vector<8x384xf32>
    %72 = arith.truncf %70 : vector<8x128xf32> to vector<8x128xbf16>
    %cst_27 = arith.constant dense<0.000000e+00> : vector<8x384xf32>
    %73 = tpu.matmul %72, %14, %cst_27 {dimension_numbers = #tpu.dot_dimension_numbers<[1], [0], [0], [1], [0, 0, 1, 1], [], []>} : vector<8x128xbf16>, vector<128x384xbf16>, vector<8x384xf32> -> vector<8x384xf32>
    %74 = vector.extract_strided_slice %71 {offsets = [0, 0], sizes = [8, 256], strides = [1, 1]} : vector<8x384xf32> to vector<8x256xf32>
    %75 = vector.extract_strided_slice %73 {offsets = [0, 0], sizes = [8, 256], strides = [1, 1]} : vector<8x384xf32> to vector<8x256xf32>
    %76 = arith.addf %74, %75 : vector<8x256xf32>
    %77 = arith.negf %76 : vector<8x256xf32>
    %78 = math.exp %77 : vector<8x256xf32>
    %cst_28 = arith.constant 1.000000e+00 : f32
    %79 = vector.broadcast %cst_28 : f32 to vector<8x256xf32>
    %80 = arith.addf %79, %78 : vector<8x256xf32>
    %81 = arith.divf %79, %80 : vector<8x256xf32>
    %82 = vector.extract_strided_slice %81 {offsets = [0, 0], sizes = [8, 128], strides = [1, 1]} : vector<8x256xf32> to vector<8x128xf32>
    %83 = vector.extract_strided_slice %81 {offsets = [0, 128], sizes = [8, 128], strides = [1, 1]} : vector<8x256xf32> to vector<8x128xf32>
    %84 = vector.extract_strided_slice %71 {offsets = [0, 256], sizes = [8, 128], strides = [1, 1]} : vector<8x384xf32> to vector<8x128xf32>
    %85 = vector.extract_strided_slice %73 {offsets = [0, 256], sizes = [8, 128], strides = [1, 1]} : vector<8x384xf32> to vector<8x128xf32>
    %86 = arith.addf %85, %18 : vector<8x128xf32>
    %87 = arith.mulf %82, %86 : vector<8x128xf32>
    %88 = arith.addf %84, %87 : vector<8x128xf32>
    %89 = math.tanh %88 : vector<8x128xf32>
    %cst_29 = arith.constant 1.000000e+00 : f32
    %90 = vector.broadcast %cst_29 : f32 to vector<8x128xf32>
    %91 = arith.subf %90, %83 : vector<8x128xf32>
    %92 = arith.mulf %91, %89 : vector<8x128xf32>
    %93 = arith.mulf %83, %70 : vector<8x128xf32>
    %94 = arith.addf %92, %93 : vector<8x128xf32>
    %95 = vector.extract_strided_slice %7 {offsets = [24, 0], sizes = [8, 384], strides = [1, 1]} : vector<64x384xf32> to vector<8x384xf32>
    %96 = arith.truncf %94 : vector<8x128xf32> to vector<8x128xbf16>
    %cst_30 = arith.constant dense<0.000000e+00> : vector<8x384xf32>
    %97 = tpu.matmul %96, %14, %cst_30 {dimension_numbers = #tpu.dot_dimension_numbers<[1], [0], [0], [1], [0, 0, 1, 1], [], []>} : vector<8x128xbf16>, vector<128x384xbf16>, vector<8x384xf32> -> vector<8x384xf32>
    %98 = vector.extract_strided_slice %95 {offsets = [0, 0], sizes = [8, 256], strides = [1, 1]} : vector<8x384xf32> to vector<8x256xf32>
    %99 = vector.extract_strided_slice %97 {offsets = [0, 0], sizes = [8, 256], strides = [1, 1]} : vector<8x384xf32> to vector<8x256xf32>
    %100 = arith.addf %98, %99 : vector<8x256xf32>
    %101 = arith.negf %100 : vector<8x256xf32>
    %102 = math.exp %101 : vector<8x256xf32>
    %cst_31 = arith.constant 1.000000e+00 : f32
    %103 = vector.broadcast %cst_31 : f32 to vector<8x256xf32>
    %104 = arith.addf %103, %102 : vector<8x256xf32>
    %105 = arith.divf %103, %104 : vector<8x256xf32>
    %106 = vector.extract_strided_slice %105 {offsets = [0, 0], sizes = [8, 128], strides = [1, 1]} : vector<8x256xf32> to vector<8x128xf32>
    %107 = vector.extract_strided_slice %105 {offsets = [0, 128], sizes = [8, 128], strides = [1, 1]} : vector<8x256xf32> to vector<8x128xf32>
    %108 = vector.extract_strided_slice %95 {offsets = [0, 256], sizes = [8, 128], strides = [1, 1]} : vector<8x384xf32> to vector<8x128xf32>
    %109 = vector.extract_strided_slice %97 {offsets = [0, 256], sizes = [8, 128], strides = [1, 1]} : vector<8x384xf32> to vector<8x128xf32>
    %110 = arith.addf %109, %18 : vector<8x128xf32>
    %111 = arith.mulf %106, %110 : vector<8x128xf32>
    %112 = arith.addf %108, %111 : vector<8x128xf32>
    %113 = math.tanh %112 : vector<8x128xf32>
    %cst_32 = arith.constant 1.000000e+00 : f32
    %114 = vector.broadcast %cst_32 : f32 to vector<8x128xf32>
    %115 = arith.subf %114, %107 : vector<8x128xf32>
    %116 = arith.mulf %115, %113 : vector<8x128xf32>
    %117 = arith.mulf %107, %94 : vector<8x128xf32>
    %118 = arith.addf %116, %117 : vector<8x128xf32>
    %119 = vector.extract_strided_slice %7 {offsets = [32, 0], sizes = [8, 384], strides = [1, 1]} : vector<64x384xf32> to vector<8x384xf32>
    %120 = arith.truncf %118 : vector<8x128xf32> to vector<8x128xbf16>
    %cst_33 = arith.constant dense<0.000000e+00> : vector<8x384xf32>
    %121 = tpu.matmul %120, %14, %cst_33 {dimension_numbers = #tpu.dot_dimension_numbers<[1], [0], [0], [1], [0, 0, 1, 1], [], []>} : vector<8x128xbf16>, vector<128x384xbf16>, vector<8x384xf32> -> vector<8x384xf32>
    %122 = vector.extract_strided_slice %119 {offsets = [0, 0], sizes = [8, 256], strides = [1, 1]} : vector<8x384xf32> to vector<8x256xf32>
    %123 = vector.extract_strided_slice %121 {offsets = [0, 0], sizes = [8, 256], strides = [1, 1]} : vector<8x384xf32> to vector<8x256xf32>
    %124 = arith.addf %122, %123 : vector<8x256xf32>
    %125 = arith.negf %124 : vector<8x256xf32>
    %126 = math.exp %125 : vector<8x256xf32>
    %cst_34 = arith.constant 1.000000e+00 : f32
    %127 = vector.broadcast %cst_34 : f32 to vector<8x256xf32>
    %128 = arith.addf %127, %126 : vector<8x256xf32>
    %129 = arith.divf %127, %128 : vector<8x256xf32>
    %130 = vector.extract_strided_slice %129 {offsets = [0, 0], sizes = [8, 128], strides = [1, 1]} : vector<8x256xf32> to vector<8x128xf32>
    %131 = vector.extract_strided_slice %129 {offsets = [0, 128], sizes = [8, 128], strides = [1, 1]} : vector<8x256xf32> to vector<8x128xf32>
    %132 = vector.extract_strided_slice %119 {offsets = [0, 256], sizes = [8, 128], strides = [1, 1]} : vector<8x384xf32> to vector<8x128xf32>
    %133 = vector.extract_strided_slice %121 {offsets = [0, 256], sizes = [8, 128], strides = [1, 1]} : vector<8x384xf32> to vector<8x128xf32>
    %134 = arith.addf %133, %18 : vector<8x128xf32>
    %135 = arith.mulf %130, %134 : vector<8x128xf32>
    %136 = arith.addf %132, %135 : vector<8x128xf32>
    %137 = math.tanh %136 : vector<8x128xf32>
    %cst_35 = arith.constant 1.000000e+00 : f32
    %138 = vector.broadcast %cst_35 : f32 to vector<8x128xf32>
    %139 = arith.subf %138, %131 : vector<8x128xf32>
    %140 = arith.mulf %139, %137 : vector<8x128xf32>
    %141 = arith.mulf %131, %118 : vector<8x128xf32>
    %142 = arith.addf %140, %141 : vector<8x128xf32>
    %143 = vector.extract_strided_slice %7 {offsets = [40, 0], sizes = [8, 384], strides = [1, 1]} : vector<64x384xf32> to vector<8x384xf32>
    %144 = arith.truncf %142 : vector<8x128xf32> to vector<8x128xbf16>
    %cst_36 = arith.constant dense<0.000000e+00> : vector<8x384xf32>
    %145 = tpu.matmul %144, %14, %cst_36 {dimension_numbers = #tpu.dot_dimension_numbers<[1], [0], [0], [1], [0, 0, 1, 1], [], []>} : vector<8x128xbf16>, vector<128x384xbf16>, vector<8x384xf32> -> vector<8x384xf32>
    %146 = vector.extract_strided_slice %143 {offsets = [0, 0], sizes = [8, 256], strides = [1, 1]} : vector<8x384xf32> to vector<8x256xf32>
    %147 = vector.extract_strided_slice %145 {offsets = [0, 0], sizes = [8, 256], strides = [1, 1]} : vector<8x384xf32> to vector<8x256xf32>
    %148 = arith.addf %146, %147 : vector<8x256xf32>
    %149 = arith.negf %148 : vector<8x256xf32>
    %150 = math.exp %149 : vector<8x256xf32>
    %cst_37 = arith.constant 1.000000e+00 : f32
    %151 = vector.broadcast %cst_37 : f32 to vector<8x256xf32>
    %152 = arith.addf %151, %150 : vector<8x256xf32>
    %153 = arith.divf %151, %152 : vector<8x256xf32>
    %154 = vector.extract_strided_slice %153 {offsets = [0, 0], sizes = [8, 128], strides = [1, 1]} : vector<8x256xf32> to vector<8x128xf32>
    %155 = vector.extract_strided_slice %153 {offsets = [0, 128], sizes = [8, 128], strides = [1, 1]} : vector<8x256xf32> to vector<8x128xf32>
    %156 = vector.extract_strided_slice %143 {offsets = [0, 256], sizes = [8, 128], strides = [1, 1]} : vector<8x384xf32> to vector<8x128xf32>
    %157 = vector.extract_strided_slice %145 {offsets = [0, 256], sizes = [8, 128], strides = [1, 1]} : vector<8x384xf32> to vector<8x128xf32>
    %158 = arith.addf %157, %18 : vector<8x128xf32>
    %159 = arith.mulf %154, %158 : vector<8x128xf32>
    %160 = arith.addf %156, %159 : vector<8x128xf32>
    %161 = math.tanh %160 : vector<8x128xf32>
    %cst_38 = arith.constant 1.000000e+00 : f32
    %162 = vector.broadcast %cst_38 : f32 to vector<8x128xf32>
    %163 = arith.subf %162, %155 : vector<8x128xf32>
    %164 = arith.mulf %163, %161 : vector<8x128xf32>
    %165 = arith.mulf %155, %142 : vector<8x128xf32>
    %166 = arith.addf %164, %165 : vector<8x128xf32>
    %167 = vector.extract_strided_slice %7 {offsets = [48, 0], sizes = [8, 384], strides = [1, 1]} : vector<64x384xf32> to vector<8x384xf32>
    %168 = arith.truncf %166 : vector<8x128xf32> to vector<8x128xbf16>
    %cst_39 = arith.constant dense<0.000000e+00> : vector<8x384xf32>
    %169 = tpu.matmul %168, %14, %cst_39 {dimension_numbers = #tpu.dot_dimension_numbers<[1], [0], [0], [1], [0, 0, 1, 1], [], []>} : vector<8x128xbf16>, vector<128x384xbf16>, vector<8x384xf32> -> vector<8x384xf32>
    %170 = vector.extract_strided_slice %167 {offsets = [0, 0], sizes = [8, 256], strides = [1, 1]} : vector<8x384xf32> to vector<8x256xf32>
    %171 = vector.extract_strided_slice %169 {offsets = [0, 0], sizes = [8, 256], strides = [1, 1]} : vector<8x384xf32> to vector<8x256xf32>
    %172 = arith.addf %170, %171 : vector<8x256xf32>
    %173 = arith.negf %172 : vector<8x256xf32>
    %174 = math.exp %173 : vector<8x256xf32>
    %cst_40 = arith.constant 1.000000e+00 : f32
    %175 = vector.broadcast %cst_40 : f32 to vector<8x256xf32>
    %176 = arith.addf %175, %174 : vector<8x256xf32>
    %177 = arith.divf %175, %176 : vector<8x256xf32>
    %178 = vector.extract_strided_slice %177 {offsets = [0, 0], sizes = [8, 128], strides = [1, 1]} : vector<8x256xf32> to vector<8x128xf32>
    %179 = vector.extract_strided_slice %177 {offsets = [0, 128], sizes = [8, 128], strides = [1, 1]} : vector<8x256xf32> to vector<8x128xf32>
    %180 = vector.extract_strided_slice %167 {offsets = [0, 256], sizes = [8, 128], strides = [1, 1]} : vector<8x384xf32> to vector<8x128xf32>
    %181 = vector.extract_strided_slice %169 {offsets = [0, 256], sizes = [8, 128], strides = [1, 1]} : vector<8x384xf32> to vector<8x128xf32>
    %182 = arith.addf %181, %18 : vector<8x128xf32>
    %183 = arith.mulf %178, %182 : vector<8x128xf32>
    %184 = arith.addf %180, %183 : vector<8x128xf32>
    %185 = math.tanh %184 : vector<8x128xf32>
    %cst_41 = arith.constant 1.000000e+00 : f32
    %186 = vector.broadcast %cst_41 : f32 to vector<8x128xf32>
    %187 = arith.subf %186, %179 : vector<8x128xf32>
    %188 = arith.mulf %187, %185 : vector<8x128xf32>
    %189 = arith.mulf %179, %166 : vector<8x128xf32>
    %190 = arith.addf %188, %189 : vector<8x128xf32>
    %191 = vector.extract_strided_slice %7 {offsets = [56, 0], sizes = [8, 384], strides = [1, 1]} : vector<64x384xf32> to vector<8x384xf32>
    %192 = arith.truncf %190 : vector<8x128xf32> to vector<8x128xbf16>
    %cst_42 = arith.constant dense<0.000000e+00> : vector<8x384xf32>
    %193 = tpu.matmul %192, %14, %cst_42 {dimension_numbers = #tpu.dot_dimension_numbers<[1], [0], [0], [1], [0, 0, 1, 1], [], []>} : vector<8x128xbf16>, vector<128x384xbf16>, vector<8x384xf32> -> vector<8x384xf32>
    %194 = vector.extract_strided_slice %191 {offsets = [0, 0], sizes = [8, 256], strides = [1, 1]} : vector<8x384xf32> to vector<8x256xf32>
    %195 = vector.extract_strided_slice %193 {offsets = [0, 0], sizes = [8, 256], strides = [1, 1]} : vector<8x384xf32> to vector<8x256xf32>
    %196 = arith.addf %194, %195 : vector<8x256xf32>
    %197 = arith.negf %196 : vector<8x256xf32>
    %198 = math.exp %197 : vector<8x256xf32>
    %cst_43 = arith.constant 1.000000e+00 : f32
    %199 = vector.broadcast %cst_43 : f32 to vector<8x256xf32>
    %200 = arith.addf %199, %198 : vector<8x256xf32>
    %201 = arith.divf %199, %200 : vector<8x256xf32>
    %202 = vector.extract_strided_slice %201 {offsets = [0, 0], sizes = [8, 128], strides = [1, 1]} : vector<8x256xf32> to vector<8x128xf32>
    %203 = vector.extract_strided_slice %201 {offsets = [0, 128], sizes = [8, 128], strides = [1, 1]} : vector<8x256xf32> to vector<8x128xf32>
    %204 = vector.extract_strided_slice %191 {offsets = [0, 256], sizes = [8, 128], strides = [1, 1]} : vector<8x384xf32> to vector<8x128xf32>
    %205 = vector.extract_strided_slice %193 {offsets = [0, 256], sizes = [8, 128], strides = [1, 1]} : vector<8x384xf32> to vector<8x128xf32>
    %206 = arith.addf %205, %18 : vector<8x128xf32>
    %207 = arith.mulf %202, %206 : vector<8x128xf32>
    %208 = arith.addf %204, %207 : vector<8x128xf32>
    %209 = math.tanh %208 : vector<8x128xf32>
    %cst_44 = arith.constant 1.000000e+00 : f32
    %210 = vector.broadcast %cst_44 : f32 to vector<8x128xf32>
    %211 = arith.subf %210, %203 : vector<8x128xf32>
    %212 = arith.mulf %211, %209 : vector<8x128xf32>
    %213 = arith.mulf %203, %190 : vector<8x128xf32>
    %214 = arith.addf %212, %213 : vector<8x128xf32>
    %215 = vector.extract_strided_slice %13 {offsets = [0, 0], sizes = [8, 384], strides = [1, 1]} : vector<56x384xf32> to vector<8x384xf32>
    %216 = arith.truncf %214 : vector<8x128xf32> to vector<8x128xbf16>
    %cst_45 = arith.constant dense<0.000000e+00> : vector<8x384xf32>
    %217 = tpu.matmul %216, %15, %cst_45 {dimension_numbers = #tpu.dot_dimension_numbers<[1], [0], [0], [1], [0, 0, 1, 1], [], []>} : vector<8x128xbf16>, vector<128x384xbf16>, vector<8x384xf32> -> vector<8x384xf32>
    %218 = vector.extract_strided_slice %215 {offsets = [0, 0], sizes = [8, 256], strides = [1, 1]} : vector<8x384xf32> to vector<8x256xf32>
    %219 = vector.extract_strided_slice %217 {offsets = [0, 0], sizes = [8, 256], strides = [1, 1]} : vector<8x384xf32> to vector<8x256xf32>
    %220 = arith.addf %218, %219 : vector<8x256xf32>
    %221 = arith.negf %220 : vector<8x256xf32>
    %222 = math.exp %221 : vector<8x256xf32>
    %cst_46 = arith.constant 1.000000e+00 : f32
    %223 = vector.broadcast %cst_46 : f32 to vector<8x256xf32>
    %224 = arith.addf %223, %222 : vector<8x256xf32>
    %225 = arith.divf %223, %224 : vector<8x256xf32>
    %226 = vector.extract_strided_slice %225 {offsets = [0, 0], sizes = [8, 128], strides = [1, 1]} : vector<8x256xf32> to vector<8x128xf32>
    %227 = vector.extract_strided_slice %225 {offsets = [0, 128], sizes = [8, 128], strides = [1, 1]} : vector<8x256xf32> to vector<8x128xf32>
    %228 = vector.extract_strided_slice %215 {offsets = [0, 256], sizes = [8, 128], strides = [1, 1]} : vector<8x384xf32> to vector<8x128xf32>
    %229 = vector.extract_strided_slice %217 {offsets = [0, 256], sizes = [8, 128], strides = [1, 1]} : vector<8x384xf32> to vector<8x128xf32>
    %230 = arith.addf %229, %21 : vector<8x128xf32>
    %231 = arith.mulf %226, %230 : vector<8x128xf32>
    %232 = arith.addf %228, %231 : vector<8x128xf32>
    %233 = math.tanh %232 : vector<8x128xf32>
    %cst_47 = arith.constant 1.000000e+00 : f32
    %234 = vector.broadcast %cst_47 : f32 to vector<8x128xf32>
    %235 = arith.subf %234, %227 : vector<8x128xf32>
    %236 = arith.mulf %235, %233 : vector<8x128xf32>
    %237 = arith.mulf %227, %214 : vector<8x128xf32>
    %238 = arith.addf %236, %237 : vector<8x128xf32>
    %c0_48 = arith.constant 0 : index
    %c0_49 = arith.constant 0 : index
    %239 = vector.load %arg13[%c0_48, %c0_49] : memref<56x128xf32, #tpu.memory_space<vmem>>, vector<8x128xf32>
    tpu.vector_store %arg13[%c0_48, %c0_49], %238 {strides = array<i32>} : memref<56x128xf32, #tpu.memory_space<vmem>>, vector<8x128xf32>,
    %240 = vector.extract_strided_slice %13 {offsets = [8, 0], sizes = [8, 384], strides = [1, 1]} : vector<56x384xf32> to vector<8x384xf32>
    %241 = arith.truncf %238 : vector<8x128xf32> to vector<8x128xbf16>
    %cst_50 = arith.constant dense<0.000000e+00> : vector<8x384xf32>
    %242 = tpu.matmul %241, %15, %cst_50 {dimension_numbers = #tpu.dot_dimension_numbers<[1], [0], [0], [1], [0, 0, 1, 1], [], []>} : vector<8x128xbf16>, vector<128x384xbf16>, vector<8x384xf32> -> vector<8x384xf32>
    %243 = vector.extract_strided_slice %240 {offsets = [0, 0], sizes = [8, 256], strides = [1, 1]} : vector<8x384xf32> to vector<8x256xf32>
    %244 = vector.extract_strided_slice %242 {offsets = [0, 0], sizes = [8, 256], strides = [1, 1]} : vector<8x384xf32> to vector<8x256xf32>
    %245 = arith.addf %243, %244 : vector<8x256xf32>
    %246 = arith.negf %245 : vector<8x256xf32>
    %247 = math.exp %246 : vector<8x256xf32>
    %cst_51 = arith.constant 1.000000e+00 : f32
    %248 = vector.broadcast %cst_51 : f32 to vector<8x256xf32>
    %249 = arith.addf %248, %247 : vector<8x256xf32>
    %250 = arith.divf %248, %249 : vector<8x256xf32>
    %251 = vector.extract_strided_slice %250 {offsets = [0, 0], sizes = [8, 128], strides = [1, 1]} : vector<8x256xf32> to vector<8x128xf32>
    %252 = vector.extract_strided_slice %250 {offsets = [0, 128], sizes = [8, 128], strides = [1, 1]} : vector<8x256xf32> to vector<8x128xf32>
    %253 = vector.extract_strided_slice %240 {offsets = [0, 256], sizes = [8, 128], strides = [1, 1]} : vector<8x384xf32> to vector<8x128xf32>
    %254 = vector.extract_strided_slice %242 {offsets = [0, 256], sizes = [8, 128], strides = [1, 1]} : vector<8x384xf32> to vector<8x128xf32>
    %255 = arith.addf %254, %21 : vector<8x128xf32>
    %256 = arith.mulf %251, %255 : vector<8x128xf32>
    %257 = arith.addf %253, %256 : vector<8x128xf32>
    %258 = math.tanh %257 : vector<8x128xf32>
    %cst_52 = arith.constant 1.000000e+00 : f32
    %259 = vector.broadcast %cst_52 : f32 to vector<8x128xf32>
    %260 = arith.subf %259, %252 : vector<8x128xf32>
    %261 = arith.mulf %260, %258 : vector<8x128xf32>
    %262 = arith.mulf %252, %238 : vector<8x128xf32>
    %263 = arith.addf %261, %262 : vector<8x128xf32>
    %c8 = arith.constant 8 : index
    %c0_53 = arith.constant 0 : index
    %264 = vector.load %arg13[%c8, %c0_53] : memref<56x128xf32, #tpu.memory_space<vmem>>, vector<8x128xf32>
    tpu.vector_store %arg13[%c8, %c0_53], %263 {strides = array<i32>} : memref<56x128xf32, #tpu.memory_space<vmem>>, vector<8x128xf32>,
    %265 = vector.extract_strided_slice %13 {offsets = [16, 0], sizes = [8, 384], strides = [1, 1]} : vector<56x384xf32> to vector<8x384xf32>
    %266 = arith.truncf %263 : vector<8x128xf32> to vector<8x128xbf16>
    %cst_54 = arith.constant dense<0.000000e+00> : vector<8x384xf32>
    %267 = tpu.matmul %266, %15, %cst_54 {dimension_numbers = #tpu.dot_dimension_numbers<[1], [0], [0], [1], [0, 0, 1, 1], [], []>} : vector<8x128xbf16>, vector<128x384xbf16>, vector<8x384xf32> -> vector<8x384xf32>
    %268 = vector.extract_strided_slice %265 {offsets = [0, 0], sizes = [8, 256], strides = [1, 1]} : vector<8x384xf32> to vector<8x256xf32>
    %269 = vector.extract_strided_slice %267 {offsets = [0, 0], sizes = [8, 256], strides = [1, 1]} : vector<8x384xf32> to vector<8x256xf32>
    %270 = arith.addf %268, %269 : vector<8x256xf32>
    %271 = arith.negf %270 : vector<8x256xf32>
    %272 = math.exp %271 : vector<8x256xf32>
    %cst_55 = arith.constant 1.000000e+00 : f32
    %273 = vector.broadcast %cst_55 : f32 to vector<8x256xf32>
    %274 = arith.addf %273, %272 : vector<8x256xf32>
    %275 = arith.divf %273, %274 : vector<8x256xf32>
    %276 = vector.extract_strided_slice %275 {offsets = [0, 0], sizes = [8, 128], strides = [1, 1]} : vector<8x256xf32> to vector<8x128xf32>
    %277 = vector.extract_strided_slice %275 {offsets = [0, 128], sizes = [8, 128], strides = [1, 1]} : vector<8x256xf32> to vector<8x128xf32>
    %278 = vector.extract_strided_slice %265 {offsets = [0, 256], sizes = [8, 128], strides = [1, 1]} : vector<8x384xf32> to vector<8x128xf32>
    %279 = vector.extract_strided_slice %267 {offsets = [0, 256], sizes = [8, 128], strides = [1, 1]} : vector<8x384xf32> to vector<8x128xf32>
    %280 = arith.addf %279, %21 : vector<8x128xf32>
    %281 = arith.mulf %276, %280 : vector<8x128xf32>
    %282 = arith.addf %278, %281 : vector<8x128xf32>
    %283 = math.tanh %282 : vector<8x128xf32>
    %cst_56 = arith.constant 1.000000e+00 : f32
    %284 = vector.broadcast %cst_56 : f32 to vector<8x128xf32>
    %285 = arith.subf %284, %277 : vector<8x128xf32>
    %286 = arith.mulf %285, %283 : vector<8x128xf32>
    %287 = arith.mulf %277, %263 : vector<8x128xf32>
    %288 = arith.addf %286, %287 : vector<8x128xf32>
    %c16 = arith.constant 16 : index
    %c0_57 = arith.constant 0 : index
    %289 = vector.load %arg13[%c16, %c0_57] : memref<56x128xf32, #tpu.memory_space<vmem>>, vector<8x128xf32>
    tpu.vector_store %arg13[%c16, %c0_57], %288 {strides = array<i32>} : memref<56x128xf32, #tpu.memory_space<vmem>>, vector<8x128xf32>,
    %290 = vector.extract_strided_slice %13 {offsets = [24, 0], sizes = [8, 384], strides = [1, 1]} : vector<56x384xf32> to vector<8x384xf32>
    %291 = arith.truncf %288 : vector<8x128xf32> to vector<8x128xbf16>
    %cst_58 = arith.constant dense<0.000000e+00> : vector<8x384xf32>
    %292 = tpu.matmul %291, %15, %cst_58 {dimension_numbers = #tpu.dot_dimension_numbers<[1], [0], [0], [1], [0, 0, 1, 1], [], []>} : vector<8x128xbf16>, vector<128x384xbf16>, vector<8x384xf32> -> vector<8x384xf32>
    %293 = vector.extract_strided_slice %290 {offsets = [0, 0], sizes = [8, 256], strides = [1, 1]} : vector<8x384xf32> to vector<8x256xf32>
    %294 = vector.extract_strided_slice %292 {offsets = [0, 0], sizes = [8, 256], strides = [1, 1]} : vector<8x384xf32> to vector<8x256xf32>
    %295 = arith.addf %293, %294 : vector<8x256xf32>
    %296 = arith.negf %295 : vector<8x256xf32>
    %297 = math.exp %296 : vector<8x256xf32>
    %cst_59 = arith.constant 1.000000e+00 : f32
    %298 = vector.broadcast %cst_59 : f32 to vector<8x256xf32>
    %299 = arith.addf %298, %297 : vector<8x256xf32>
    %300 = arith.divf %298, %299 : vector<8x256xf32>
    %301 = vector.extract_strided_slice %300 {offsets = [0, 0], sizes = [8, 128], strides = [1, 1]} : vector<8x256xf32> to vector<8x128xf32>
    %302 = vector.extract_strided_slice %300 {offsets = [0, 128], sizes = [8, 128], strides = [1, 1]} : vector<8x256xf32> to vector<8x128xf32>
    %303 = vector.extract_strided_slice %290 {offsets = [0, 256], sizes = [8, 128], strides = [1, 1]} : vector<8x384xf32> to vector<8x128xf32>
    %304 = vector.extract_strided_slice %292 {offsets = [0, 256], sizes = [8, 128], strides = [1, 1]} : vector<8x384xf32> to vector<8x128xf32>
    %305 = arith.addf %304, %21 : vector<8x128xf32>
    %306 = arith.mulf %301, %305 : vector<8x128xf32>
    %307 = arith.addf %303, %306 : vector<8x128xf32>
    %308 = math.tanh %307 : vector<8x128xf32>
    %cst_60 = arith.constant 1.000000e+00 : f32
    %309 = vector.broadcast %cst_60 : f32 to vector<8x128xf32>
    %310 = arith.subf %309, %302 : vector<8x128xf32>
    %311 = arith.mulf %310, %308 : vector<8x128xf32>
    %312 = arith.mulf %302, %288 : vector<8x128xf32>
    %313 = arith.addf %311, %312 : vector<8x128xf32>
    %c24 = arith.constant 24 : index
    %c0_61 = arith.constant 0 : index
    %314 = vector.load %arg13[%c24, %c0_61] : memref<56x128xf32, #tpu.memory_space<vmem>>, vector<8x128xf32>
    tpu.vector_store %arg13[%c24, %c0_61], %313 {strides = array<i32>} : memref<56x128xf32, #tpu.memory_space<vmem>>, vector<8x128xf32>,
    %315 = vector.extract_strided_slice %13 {offsets = [32, 0], sizes = [8, 384], strides = [1, 1]} : vector<56x384xf32> to vector<8x384xf32>
    %316 = arith.truncf %313 : vector<8x128xf32> to vector<8x128xbf16>
    %cst_62 = arith.constant dense<0.000000e+00> : vector<8x384xf32>
    %317 = tpu.matmul %316, %15, %cst_62 {dimension_numbers = #tpu.dot_dimension_numbers<[1], [0], [0], [1], [0, 0, 1, 1], [], []>} : vector<8x128xbf16>, vector<128x384xbf16>, vector<8x384xf32> -> vector<8x384xf32>
    %318 = vector.extract_strided_slice %315 {offsets = [0, 0], sizes = [8, 256], strides = [1, 1]} : vector<8x384xf32> to vector<8x256xf32>
    %319 = vector.extract_strided_slice %317 {offsets = [0, 0], sizes = [8, 256], strides = [1, 1]} : vector<8x384xf32> to vector<8x256xf32>
    %320 = arith.addf %318, %319 : vector<8x256xf32>
    %321 = arith.negf %320 : vector<8x256xf32>
    %322 = math.exp %321 : vector<8x256xf32>
    %cst_63 = arith.constant 1.000000e+00 : f32
    %323 = vector.broadcast %cst_63 : f32 to vector<8x256xf32>
    %324 = arith.addf %323, %322 : vector<8x256xf32>
    %325 = arith.divf %323, %324 : vector<8x256xf32>
    %326 = vector.extract_strided_slice %325 {offsets = [0, 0], sizes = [8, 128], strides = [1, 1]} : vector<8x256xf32> to vector<8x128xf32>
    %327 = vector.extract_strided_slice %325 {offsets = [0, 128], sizes = [8, 128], strides = [1, 1]} : vector<8x256xf32> to vector<8x128xf32>
    %328 = vector.extract_strided_slice %315 {offsets = [0, 256], sizes = [8, 128], strides = [1, 1]} : vector<8x384xf32> to vector<8x128xf32>
    %329 = vector.extract_strided_slice %317 {offsets = [0, 256], sizes = [8, 128], strides = [1, 1]} : vector<8x384xf32> to vector<8x128xf32>
    %330 = arith.addf %329, %21 : vector<8x128xf32>
    %331 = arith.mulf %326, %330 : vector<8x128xf32>
    %332 = arith.addf %328, %331 : vector<8x128xf32>
    %333 = math.tanh %332 : vector<8x128xf32>
    %cst_64 = arith.constant 1.000000e+00 : f32
    %334 = vector.broadcast %cst_64 : f32 to vector<8x128xf32>
    %335 = arith.subf %334, %327 : vector<8x128xf32>
    %336 = arith.mulf %335, %333 : vector<8x128xf32>
    %337 = arith.mulf %327, %313 : vector<8x128xf32>
    %338 = arith.addf %336, %337 : vector<8x128xf32>
    %c32 = arith.constant 32 : index
    %c0_65 = arith.constant 0 : index
    %339 = vector.load %arg13[%c32, %c0_65] : memref<56x128xf32, #tpu.memory_space<vmem>>, vector<8x128xf32>
    tpu.vector_store %arg13[%c32, %c0_65], %338 {strides = array<i32>} : memref<56x128xf32, #tpu.memory_space<vmem>>, vector<8x128xf32>,
    %340 = vector.extract_strided_slice %13 {offsets = [40, 0], sizes = [8, 384], strides = [1, 1]} : vector<56x384xf32> to vector<8x384xf32>
    %341 = arith.truncf %338 : vector<8x128xf32> to vector<8x128xbf16>
    %cst_66 = arith.constant dense<0.000000e+00> : vector<8x384xf32>
    %342 = tpu.matmul %341, %15, %cst_66 {dimension_numbers = #tpu.dot_dimension_numbers<[1], [0], [0], [1], [0, 0, 1, 1], [], []>} : vector<8x128xbf16>, vector<128x384xbf16>, vector<8x384xf32> -> vector<8x384xf32>
    %343 = vector.extract_strided_slice %340 {offsets = [0, 0], sizes = [8, 256], strides = [1, 1]} : vector<8x384xf32> to vector<8x256xf32>
    %344 = vector.extract_strided_slice %342 {offsets = [0, 0], sizes = [8, 256], strides = [1, 1]} : vector<8x384xf32> to vector<8x256xf32>
    %345 = arith.addf %343, %344 : vector<8x256xf32>
    %346 = arith.negf %345 : vector<8x256xf32>
    %347 = math.exp %346 : vector<8x256xf32>
    %cst_67 = arith.constant 1.000000e+00 : f32
    %348 = vector.broadcast %cst_67 : f32 to vector<8x256xf32>
    %349 = arith.addf %348, %347 : vector<8x256xf32>
    %350 = arith.divf %348, %349 : vector<8x256xf32>
    %351 = vector.extract_strided_slice %350 {offsets = [0, 0], sizes = [8, 128], strides = [1, 1]} : vector<8x256xf32> to vector<8x128xf32>
    %352 = vector.extract_strided_slice %350 {offsets = [0, 128], sizes = [8, 128], strides = [1, 1]} : vector<8x256xf32> to vector<8x128xf32>
    %353 = vector.extract_strided_slice %340 {offsets = [0, 256], sizes = [8, 128], strides = [1, 1]} : vector<8x384xf32> to vector<8x128xf32>
    %354 = vector.extract_strided_slice %342 {offsets = [0, 256], sizes = [8, 128], strides = [1, 1]} : vector<8x384xf32> to vector<8x128xf32>
    %355 = arith.addf %354, %21 : vector<8x128xf32>
    %356 = arith.mulf %351, %355 : vector<8x128xf32>
    %357 = arith.addf %353, %356 : vector<8x128xf32>
    %358 = math.tanh %357 : vector<8x128xf32>
    %cst_68 = arith.constant 1.000000e+00 : f32
    %359 = vector.broadcast %cst_68 : f32 to vector<8x128xf32>
    %360 = arith.subf %359, %352 : vector<8x128xf32>
    %361 = arith.mulf %360, %358 : vector<8x128xf32>
    %362 = arith.mulf %352, %338 : vector<8x128xf32>
    %363 = arith.addf %361, %362 : vector<8x128xf32>
    %c40 = arith.constant 40 : index
    %c0_69 = arith.constant 0 : index
    %364 = vector.load %arg13[%c40, %c0_69] : memref<56x128xf32, #tpu.memory_space<vmem>>, vector<8x128xf32>
    tpu.vector_store %arg13[%c40, %c0_69], %363 {strides = array<i32>} : memref<56x128xf32, #tpu.memory_space<vmem>>, vector<8x128xf32>,
    %365 = vector.extract_strided_slice %13 {offsets = [48, 0], sizes = [8, 384], strides = [1, 1]} : vector<56x384xf32> to vector<8x384xf32>
    %366 = arith.truncf %363 : vector<8x128xf32> to vector<8x128xbf16>
    %cst_70 = arith.constant dense<0.000000e+00> : vector<8x384xf32>
    %367 = tpu.matmul %366, %15, %cst_70 {dimension_numbers = #tpu.dot_dimension_numbers<[1], [0], [0], [1], [0, 0, 1, 1], [], []>} : vector<8x128xbf16>, vector<128x384xbf16>, vector<8x384xf32> -> vector<8x384xf32>
    %368 = vector.extract_strided_slice %365 {offsets = [0, 0], sizes = [8, 256], strides = [1, 1]} : vector<8x384xf32> to vector<8x256xf32>
    %369 = vector.extract_strided_slice %367 {offsets = [0, 0], sizes = [8, 256], strides = [1, 1]} : vector<8x384xf32> to vector<8x256xf32>
    %370 = arith.addf %368, %369 : vector<8x256xf32>
    %371 = arith.negf %370 : vector<8x256xf32>
    %372 = math.exp %371 : vector<8x256xf32>
    %cst_71 = arith.constant 1.000000e+00 : f32
    %373 = vector.broadcast %cst_71 : f32 to vector<8x256xf32>
    %374 = arith.addf %373, %372 : vector<8x256xf32>
    %375 = arith.divf %373, %374 : vector<8x256xf32>
    %376 = vector.extract_strided_slice %375 {offsets = [0, 0], sizes = [8, 128], strides = [1, 1]} : vector<8x256xf32> to vector<8x128xf32>
    %377 = vector.extract_strided_slice %375 {offsets = [0, 128], sizes = [8, 128], strides = [1, 1]} : vector<8x256xf32> to vector<8x128xf32>
    %378 = vector.extract_strided_slice %365 {offsets = [0, 256], sizes = [8, 128], strides = [1, 1]} : vector<8x384xf32> to vector<8x128xf32>
    %379 = vector.extract_strided_slice %367 {offsets = [0, 256], sizes = [8, 128], strides = [1, 1]} : vector<8x384xf32> to vector<8x128xf32>
    %380 = arith.addf %379, %21 : vector<8x128xf32>
    %381 = arith.mulf %376, %380 : vector<8x128xf32>
    %382 = arith.addf %378, %381 : vector<8x128xf32>
    %383 = math.tanh %382 : vector<8x128xf32>
    %cst_72 = arith.constant 1.000000e+00 : f32
    %384 = vector.broadcast %cst_72 : f32 to vector<8x128xf32>
    %385 = arith.subf %384, %377 : vector<8x128xf32>
    %386 = arith.mulf %385, %383 : vector<8x128xf32>
    %387 = arith.mulf %377, %363 : vector<8x128xf32>
    %388 = arith.addf %386, %387 : vector<8x128xf32>
    %c48 = arith.constant 48 : index
    %c0_73 = arith.constant 0 : index
    %389 = vector.load %arg13[%c48, %c0_73] : memref<56x128xf32, #tpu.memory_space<vmem>>, vector<8x128xf32>
    tpu.vector_store %arg13[%c48, %c0_73], %388 {strides = array<i32>} : memref<56x128xf32, #tpu.memory_space<vmem>>, vector<8x128xf32>,
    %c0_74 = arith.constant 0 : index
    %c0_75 = arith.constant 0 : index
    %390 = vector.load %arg13[%c0_74, %c0_75] : memref<56x128xf32, #tpu.memory_space<vmem>>, vector<56x128xf32>
    %391 = arith.truncf %390 : vector<56x128xf32> to vector<56x128xbf16>
    %c0_76 = arith.constant 0 : index
    %c0_77 = arith.constant 0 : index
    %392 = vector.load %arg10[%c0_76, %c0_77] : memref<128x128xbf16, #tpu.memory_space<vmem>>, vector<128x128xbf16>
    %cst_78 = arith.constant dense<0.000000e+00> : vector<56x128xf32>
    %393 = tpu.matmul %391, %392, %cst_78 {dimension_numbers = #tpu.dot_dimension_numbers<[1], [0], [0], [1], [0, 0, 1, 1], [], []>} : vector<56x128xbf16>, vector<128x128xbf16>, vector<56x128xf32> -> vector<56x128xf32>
    %c0_79 = arith.constant 0 : index
    %c0_80 = arith.constant 0 : index
    %394 = vector.load %arg11[%c0_79, %c0_80] : memref<1x128xf32, #tpu.memory_space<vmem>>, vector<1x128xf32>
    %395 = vector.broadcast %394 : vector<1x128xf32> to vector<56x128xf32>
    %396 = arith.addf %393, %395 : vector<56x128xf32>
    %397 = arith.addf %1, %396 : vector<56x128xf32>
    %c0_81 = arith.constant 0 : index
    %c0_82 = arith.constant 0 : index
    %398 = vector.load %arg12[%c0_81, %c0_82] : memref<56x128xf32, #tpu.memory_space<vmem>>, vector<56x128xf32>
    tpu.vector_store %arg12[%c0_81, %c0_82], %397 {strides = array<i32>} : memref<56x128xf32, #tpu.memory_space<vmem>>, vector<56x128xf32>,
    return
  }
}

</mosaic_0001>

<bundles_post_ra>
// kernel: seq2seq_forward.1
= control target key start
LH: loop header
LB: loop body
LE: loop exit
PB: predicated region body
PF: predicated region fallthrough
CT: control target
= control target key end

     0   :  { %17 = vsyncpa [#allocation4], 0  ;;  %s5172_s0 = inlined_call_operand.vmem [shape: f32[64,128], index: 0, kind: input, shape index: {}]   ;;  %s5173_s1 = inlined_call_operand.vmem [shape: f32[56,128], index: 1, kind: input, shape index: {}, may-alias: {1,12}]   ;;  %s5174_s2 = inlined_call_operand.vmem [shape: bf16[128,384], index: 2, kind: input, shape index: {}]   ;;  %s5175_s3 = inlined_call_operand.hbm [shape: bf16[128,384], index: 3, kind: input, shape index: {}]   ;;  %s5176_s4 = inlined_call_operand.vmem [shape: f32[1,384], index: 4, kind: input, shape index: {}]   ;;  %s5177_s5 = inlined_call_operand.vmem [shape: f32[1,128], index: 5, kind: input, shape index: {}]   ;;  %s5178_s6 = inlined_call_operand.hbm [shape: bf16[128,384], index: 6, kind: input, shape index: {}]   ;;  %s5179_s7 = inlined_call_operand.hbm [shape: bf16[128,384], index: 7, kind: input, shape index: {}]   ;;  %s5180_s8 = inlined_call_operand.vmem [shape: f32[1,384], index: 8, kind: input, shape index: {}]   ;;  %s5181_s9 = inlined_call_operand.vmem [shape: f32[1,128], index: 9, kind: input, shape index: {}]   ;;  %s5182_s10 = inlined_call_operand.hbm [shape: bf16[128,128], index: 10, kind: input, shape index: {}]   ;;  %s5183_s11 = inlined_call_operand.vmem [shape: f32[1,128], index: 11, kind: input, shape index: {}]   ;;  %s5184_s12 = inlined_call_operand.vmem [shape: f32[56,128], index: 12, kind: output, shape index: {}, may-alias: {1,12}]  }
   0x1   :  { %18 = vsyncpa [#allocation6], 0 }
   0x2   :  { %19 = vsyncpa [#allocation9], 0  ;;  %s3921_s21 = smov [#allocation5]   ;;  %s3922_s23 = smov [#allocation3]  }
   0x3   :  { %s47_s22 = sshll.u32 %s3921_s21, 4  ;;  %s31_s24 = sshll.u32 %s3922_s23, 4  ;;  %s48_s22 = int_to_ptr.vmem [resolvable:$true] %s47_s22  ;;  %s3997_s24 = int_to_ptr.vmem [resolvable:$true] %s31_s24 }
   0x4   :  { %s3827_s27 = scalar_lea.hbm %s5178_s6, 3072 }
   0x5   :  { %p3828_p0 = scmp.ne.s32.totalorder %s5178_s6, %s3827_s27  ;;  %p3831_p1 = scmp.lt.u32.totalorder %s3827_s27, %s5178_s6 }
   0x7   :  { %p3833_p2 = pnand %p3831_p1, %p3828_p0 }
   0x9   :  { %3836 = shalt.err (!%p3833_p2)
}
   0xa   :  { %s3837_s14 = scalar_lea.vmem %s48_s22, 3072  ;;  %p3842_p4 = scmp.lt.s32.totalorder %s48_s22, %s48_s22 }
   0xb   :  { %p3838_p3 = scmp.ne.s32.totalorder %s48_s22, %s3837_s14  ;;  %p3843_p5 = scmp.lt.s32.totalorder %s3837_s14, %s3837_s14 }
   0xd   :  { %p3844_p6 = por %p3843_p5, %p3842_p4 }
   0xf   :  { %p3845_p7 = pnand %p3844_p6, %p3838_p3 }
  0x11   :  { %3848 = shalt.err (!%p3845_p7)
}
  0x12   :  { %s3923_s15 = smov 192   ;;  %s3924_s16 = smov 12  }
  0x13   :  { %53 = dma.hbm_to_vmem [thread:$0]  %s5178_s6, 3072, %s48_s22, [#allocation6], %s3923_s15, %s3923_s15, %s3924_s16  }
  0x14   :  { %s3849_s21 = scalar_lea.hbm %s5175_s3, 3072 }
  0x15   :  { %p3850_p8 = scmp.ne.s32.totalorder %s5175_s3, %s3849_s21  ;;  %p3853_p9 = scmp.lt.u32.totalorder %s3849_s21, %s5175_s3 }
  0x17   :  { %p3855_p10 = pnand %p3853_p9, %p3850_p8 }
  0x19   :  { %3858 = shalt.err (!%p3855_p10)
}
  0x1a   :  { %s3859_s28 = scalar_lea.vmem %s3997_s24, 3072  ;;  %p3864_p12 = scmp.lt.s32.totalorder %s3997_s24, %s3997_s24 }
  0x1b   :  { %p3860_p11 = scmp.ne.s32.totalorder %s3997_s24, %s3859_s28  ;;  %p3865_p13 = scmp.lt.s32.totalorder %s3859_s28, %s3859_s28 }
  0x1d   :  { %p3866_p0 = por %p3865_p13, %p3864_p12 }
  0x1f   :  { %p3867_p1 = pnand %p3866_p0, %p3860_p11 }
  0x21   :  { %3870 = shalt.err (!%p3867_p1)
}
  0x22   :  { %37 = dma.hbm_to_vmem [thread:$0]  %s5175_s3, 3072, %s3997_s24, [#allocation4], %s3923_s15, %s3923_s15, %s3924_s16  }
  0x23   :  { %s3925_s29 = smov [#allocation7]   ;;  %s3926_s13 = smov [#allocation8]  }
  0x24   :  { %s59_s30 = sshll.u32 %s3925_s29, 4  ;;  %s75_s14 = sshll.u32 %s3926_s13, 4  ;;  %s60_s30 = int_to_ptr.vmem [resolvable:$true] %s59_s30  ;;  %s4034_s14 = int_to_ptr.vmem [resolvable:$true] %s75_s14 }
  0x25   :  { %s3871_s19 = scalar_lea.hbm %s5179_s7, 3072 }
  0x26   :  { %p3872_p2 = scmp.ne.s32.totalorder %s5179_s7, %s3871_s19  ;;  %p3875_p3 = scmp.lt.u32.totalorder %s3871_s19, %s5179_s7 }
  0x28   :  { %p3877_p4 = pnand %p3875_p3, %p3872_p2 }
  0x2a   :  { %3880 = shalt.err (!%p3877_p4)
}
  0x2b   :  { %s3881_s3 = scalar_lea.vmem %s60_s30, 3072  ;;  %p3886_p6 = scmp.lt.s32.totalorder %s60_s30, %s60_s30 }
  0x2c   :  { %p3882_p5 = scmp.ne.s32.totalorder %s60_s30, %s3881_s3  ;;  %p3887_p7 = scmp.lt.s32.totalorder %s3881_s3, %s3881_s3 }
  0x2e   :  { %p3888_p8 = por %p3887_p7, %p3886_p6 }
  0x30   :  { %p3889_p9 = pnand %p3888_p8, %p3882_p5 }
  0x32   :  { %3892 = shalt.err (!%p3889_p9)
}
  0x33   :  { %65 = dma.hbm_to_vmem [thread:$0]  %s5179_s7, 3072, %s60_s30, [#allocation6], %s3923_s15, %s3923_s15, %s3924_s16  }
  0x34   :  { %s3893_s6 = scalar_lea.hbm %s5182_s10, 1024 }
  0x35   :  { %p3894_p10 = scmp.ne.s32.totalorder %s5182_s10, %s3893_s6  ;;  %p3897_p11 = scmp.lt.u32.totalorder %s3893_s6, %s5182_s10 }
  0x37   :  { %p3899_p12 = pnand %p3897_p11, %p3894_p10 }
  0x39   :  { %3902 = shalt.err (!%p3899_p12)
}
  0x3a   :  { %s3903_s18 = scalar_lea.vmem %s4034_s14, 1024  ;;  %p3908_p0 = scmp.lt.s32.totalorder %s4034_s14, %s4034_s14 }
  0x3b   :  { %p3904_p13 = scmp.ne.s32.totalorder %s4034_s14, %s3903_s18  ;;  %p3909_p1 = scmp.lt.s32.totalorder %s3903_s18, %s3903_s18 }
  0x3d   :  { %p3910_p2 = por %p3909_p1, %p3908_p0 }
  0x3f   :  { %p3911_p3 = pnand %p3910_p2, %p3904_p13 }
  0x41   :  { %3914 = shalt.err (!%p3911_p3)
}
  0x42   :  { %s3927_s7 = smov 64   ;;  %s3928_s15 = smov 4  }
  0x43   :  { %81 = dma.hbm_to_vmem [thread:$0]  %s5182_s10, 1024, %s4034_s14, [#allocation9], %s3927_s7, %s3927_s7, %s3928_s15  }
  0x44   :  { %3915 = dma.done.wait [#allocation4], 3072  }
  0x45   :  { %3916 = vsyncadd [#allocation4], 4294964224 }
  0x46   :  { %3917 = dma.done.wait [#allocation6], 6144  }
  0x47   :  { %3918 = vsyncadd [#allocation6], 4294961152 }
  0x48   :  { %3919 = dma.done.wait [#allocation9], 1024  }
  0x49   :  { %3920 = vsyncadd [#allocation9], 4294966272  ;;  %v5187_v0 = vmov 0   ;;  %v3511_v1 = vld [vmem:[%s5174_s2 + $0x4] ss:$12 sps:$4 sm:$0xff]   ;;  %v98_v34 = vld [vmem:[%s5172_s0 + $0x8] sm:$0xff] }
  0x4a   :  { %325 = vmatprep.mubr.bf16.mxu1 %v5187_v0  ;;  %644 = vmatprep.mubr.bf16.mxu0 %v5187_v0  ;;  %v3513_v2 = vld [vmem:[#allocation5 + $0x4] ss:$12 sps:$4 sm:$0xff]   ;;  %v3515_v3 = vld [vmem:[%s5174_s2] ss:$12 sps:$4 sm:$0xff]   ;;  %v3517_v5 = vld [vmem:[%s5174_s2 + $0x1c] ss:$12 sps:$4 sm:$0xff]  }
  0x4b   :  { %293 = vmatprep.subr.bf16.mxu1 %v3511_v1  ;;  %v3516_v4 = vld [vmem:[#allocation5] ss:$12 sps:$4 sm:$0xff]   ;;  %612 = vmatprep.subr.bf16.mxu0 %v3513_v2  ;;  %v3519_v6 = vld [vmem:[#allocation5 + $0x1c] ss:$12 sps:$4 sm:$0xff]   ;;  %v3521_v7 = vld [vmem:[%s5174_s2 + $0x18] ss:$12 sps:$4 sm:$0xff]  }
  0x4c   :  { %294 = vmatpush1.bf16.msra.mxu1 %v3515_v3  ;;  %613 = vmatpush1.bf16.msra.mxu0 %v3516_v4  ;;  %v3522_v8 = vld [vmem:[#allocation5 + $0x18] ss:$12 sps:$4 sm:$0xff]   ;;  %v3523_v9 = vld [vmem:[%s5174_s2 + $0x34] ss:$12 sps:$4 sm:$0xff]   ;;  %v3527_v11 = vld [vmem:[%s5174_s2 + $0x30] ss:$12 sps:$4 sm:$0xff]  }
  0x4d   :  { %295 = vmatprep.subr.bf16.mxu1 %v3517_v5  ;;  %614 = vmatprep.subr.bf16.mxu0 %v3519_v6  ;;  %v3525_v10 = vld [vmem:[#allocation5 + $0x34] ss:$12 sps:$4 sm:$0xff]   ;;  %v3528_v12 = vld [vmem:[#allocation5 + $0x30] ss:$12 sps:$4 sm:$0xff]   ;;  %v3529_v13 = vld [vmem:[%s5174_s2 + $0x4c] ss:$12 sps:$4 sm:$0xff]  }
  0x4e   :  { %v3531_v14 = vld [vmem:[#allocation5 + $0x4c] ss:$12 sps:$4 sm:$0xff]   ;;  %v3533_v15 = vld [vmem:[%s5174_s2 + $0x48] ss:$12 sps:$4 sm:$0xff]   ;;  %v3535_v17 = vld [vmem:[%s5174_s2 + $0x64] ss:$12 sps:$4 sm:$0xff]  }
  0x4f   :  { %v3534_v16 = vld [vmem:[#allocation5 + $0x48] ss:$12 sps:$4 sm:$0xff]   ;;  %v3537_v18 = vld [vmem:[#allocation5 + $0x64] ss:$12 sps:$4 sm:$0xff]   ;;  %v3539_v19 = vld [vmem:[%s5174_s2 + $0x60] ss:$12 sps:$4 sm:$0xff]  }
  0x50   :  { %296 = vmatpush1.bf16.msra.mxu1 %v3521_v7  ;;  %615 = vmatpush1.bf16.msra.mxu0 %v3522_v8  ;;  %v3540_v20 = vld [vmem:[#allocation5 + $0x60] ss:$12 sps:$4 sm:$0xff]   ;;  %v3541_v21 = vld [vmem:[%s5174_s2 + $0x7c] ss:$12 sps:$4 sm:$0xff]   ;;  %v3545_v23 = vld [vmem:[%s5174_s2 + $0x78] ss:$12 sps:$4 sm:$0xff]  }
  0x51   :  { %297 = vmatprep.subr.bf16.mxu1 %v3523_v9  ;;  %616 = vmatprep.subr.bf16.mxu0 %v3525_v10  ;;  %v3543_v22 = vld [vmem:[#allocation5 + $0x7c] ss:$12 sps:$4 sm:$0xff]   ;;  %v3546_v24 = vld [vmem:[#allocation5 + $0x78] ss:$12 sps:$4 sm:$0xff]   ;;  %v3547_v25 = vld [vmem:[%s5174_s2 + $0x94] ss:$12 sps:$4 sm:$0xff]  }
  0x52   :  { %v3549_v26 = vld [vmem:[#allocation5 + $0x94] ss:$12 sps:$4 sm:$0xff]   ;;  %v3551_v27 = vld [vmem:[%s5174_s2 + $0x90] ss:$12 sps:$4 sm:$0xff]   ;;  %v3553_v29 = vld [vmem:[%s5174_s2 + $0xac] ss:$12 sps:$4 sm:$0xff]  }
  0x53   :  { %v3552_v28 = vld [vmem:[#allocation5 + $0x90] ss:$12 sps:$4 sm:$0xff]   ;;  %v3555_v30 = vld [vmem:[#allocation5 + $0xac] ss:$12 sps:$4 sm:$0xff]   ;;  %v3557_v31 = vld [vmem:[%s5174_s2 + $0xa8] ss:$12 sps:$4 sm:$0xff]  }
  0x54   :  { %298 = vmatpush1.bf16.msra.mxu1 %v3527_v11  ;;  %617 = vmatpush1.bf16.msra.mxu0 %v3528_v12  ;;  %v3558_v32 = vld [vmem:[#allocation5 + $0xa8] ss:$12 sps:$4 sm:$0xff]   ;;  %v97_v33 = vld [vmem:[%s5172_s0] sm:$0xff]  ;;  %v100_v46 = vld [vmem:[%s5172_s0 + $0x18] sm:$0xff]  ;;  %vm3931_vm0 = vmmov 0  }
  0x55   :  { %299 = vmatprep.subr.bf16.mxu1 %v3529_v13  ;;  %618 = vmatprep.subr.bf16.mxu0 %v3531_v14  ;;  %v105_v35 = vld [vmem:[%s5173_s1] sm:$0xff]  ;;  %v106_v36 = vld [vmem:[%s5173_s1 + $0x8] sm:$0xff]  ;;  %v4135_v39 = vpack.c.bf16 %v98_v34, %v97_v33  ;;  %v99_v45 = vld [vmem:[%s5172_s0 + $0x10] sm:$0xff]  ;;  %v150_v34 = vlaneseq }
  0x56   :  { %v3559_v37 = vld [vmem:[%s5174_s2 + $0x8] ss:$12 sps:$4 sm:$0xff]   ;;  %v4133_v38 = vld [vmem:[#allocation3 + $0x4] ss:$12 sps:$4 sm:$0xff]   ;;  %v4137_v40 = vpack.c.bf16 %v106_v36, %v105_v35  ;;  %v4139_v41 = vld [vmem:[#allocation3] ss:$12 sps:$4 sm:$0xff]   ;;  %v4172_v51 = vpack.c.bf16 %v100_v46, %v99_v45 }
  0x57   :  { %v3563_v42 = vld [vmem:[%s5174_s2 + $0x20] ss:$12 sps:$4 sm:$0xff]   ;;  %v4145_v43 = vld [vmem:[#allocation3 + $0x1c] ss:$12 sps:$4 sm:$0xff]   ;;  %v4147_v44 = vld [vmem:[#allocation3 + $0x18] ss:$12 sps:$4 sm:$0xff]  }
  0x58   :  { %300 = vmatpush1.bf16.msra.mxu1 %v3533_v15  ;;  %619 = vmatpush1.bf16.msra.mxu0 %v3534_v16  ;;  %v3567_v47 = vld [vmem:[%s5174_s2 + $0x38] ss:$12 sps:$4 sm:$0xff]   ;;  %v107_v48 = vld [vmem:[%s5173_s1 + $0x10] sm:$0xff]  ;;  %v102_v58 = vld [vmem:[%s5172_s0 + $0x28] sm:$0xff]  ;;  %v4339_v35 = vshrl.u32 %v150_v34, 7 }
  0x59   :  { %301 = vmatprep.subr.bf16.mxu1 %v3535_v17  ;;  %620 = vmatprep.subr.bf16.mxu0 %v3537_v18  ;;  %v108_v49 = vld [vmem:[%s5173_s1 + $0x18] sm:$0xff]  ;;  %v4168_v50 = vld [vmem:[#allocation3 + $0x34] ss:$12 sps:$4 sm:$0xff]   ;;  %v110_v61 = vld [vmem:[%s5173_s1 + $0x28] sm:$0xff] }
  0x5a   :  { %v4174_v52 = vpack.c.bf16 %v108_v49, %v107_v48  ;;  %v4176_v53 = vld [vmem:[#allocation3 + $0x30] ss:$12 sps:$4 sm:$0xff]   ;;  %v4183_v55 = vld [vmem:[#allocation3 + $0x4c] ss:$12 sps:$4 sm:$0xff]   ;;  %v4185_v56 = vld [vmem:[#allocation3 + $0x48] ss:$12 sps:$4 sm:$0xff]  }
  0x5b   :  { %v3571_v54 = vld [vmem:[%s5174_s2 + $0x50] ss:$12 sps:$4 sm:$0xff]   ;;  %v101_v57 = vld [vmem:[%s5172_s0 + $0x20] sm:$0xff]  ;;  %v3575_v59 = vld [vmem:[%s5174_s2 + $0x68] ss:$12 sps:$4 sm:$0xff]   ;;  %5193 = vst [vmem:[#allocation13_spill] sm:$0xff] %v4339_v35 }
  0x5c   :  { %302 = vmatpush1.bf16.msra.mxu1 %v3539_v19  ;;  %621 = vmatpush1.bf16.msra.mxu0 %v3540_v20  ;;  %v109_v60 = vld [vmem:[%s5173_s1 + $0x20] sm:$0xff]  ;;  %v114_v63 = vpack.c.bf16 %v102_v58, %v101_v57  ;;  %v4219_v4 = vld [vmem:[#allocation3 + $0x7c] ss:$12 sps:$4 sm:$0xff]   ;;  %v103_v6 = vld [vmem:[%s5172_s0 + $0x30] sm:$0xff]  ;;  %v5186_v36 = vsub.s32 0, %v4339_v35 }
  0x5d   :  { %303 = vmatprep.subr.bf16.mxu1 %v3541_v21  ;;  %622 = vmatprep.subr.bf16.mxu0 %v3543_v22  ;;  %v4206_v62 = vld [vmem:[#allocation3 + $0x64] ss:$12 sps:$4 sm:$0xff]   ;;  %v4210_v1 = vpack.c.bf16 %v110_v61, %v109_v60  ;;  %v4212_v2 = vld [vmem:[#allocation3 + $0x60] ss:$12 sps:$4 sm:$0xff]   ;;  %v104_v7 = vld [vmem:[%s5172_s0 + $0x38] sm:$0xff] }
  0x5e   :  { %v3579_v3 = vld [vmem:[%s5174_s2 + $0x80] ss:$12 sps:$4 sm:$0xff]   ;;  %v4221_v5 = vld [vmem:[#allocation3 + $0x78] ss:$12 sps:$4 sm:$0xff]   ;;  %v111_v9 = vld [vmem:[%s5173_s1 + $0x30] sm:$0xff]  ;;  %v115_v11 = vpack.c.bf16 %v104_v7, %v103_v6 }
  0x5f   :  { %v3583_v8 = vld [vmem:[%s5174_s2 + $0x98] ss:$12 sps:$4 sm:$0xff]   ;;  %v4238_v10 = vld [vmem:[#allocation3 + $0x94] ss:$12 sps:$4 sm:$0xff]   ;;  %v4242_v12 = vpack.c.bf16 %v111_v9, %v111_v9  ;;  %v4244_v13 = vld [vmem:[#allocation3 + $0x90] ss:$12 sps:$4 sm:$0xff]  }
  0x60   :  { %304 = vmatpush1.bf16.msra.mxu1 %v3545_v23  ;;  %623 = vmatpush1.bf16.msra.mxu0 %v3546_v24  ;;  %v3587_v14 = vld [vmem:[%s5174_s2 + $0xb0] ss:$12 sps:$4 sm:$0xff]   ;;  %v4251_v15 = vld [vmem:[#allocation3 + $0xac] ss:$12 sps:$4 sm:$0xff]   ;;  %v4255_v16 = vld [vmem:[#allocation3 + $0xa8] ss:$12 sps:$4 sm:$0xff]  }
  0x61   :  { %305 = vmatprep.subr.bf16.mxu1 %v3547_v25  ;;  %624 = vmatprep.subr.bf16.mxu0 %v3549_v26  ;;  %v3591_v17 = vld [vmem:[#allocation5 + $0x8] ss:$12 sps:$4 sm:$0xff]   ;;  %v3592_v18 = vld [vmem:[#allocation5 + $0x20] ss:$12 sps:$4 sm:$0xff]   ;;  %v3593_v19 = vld [vmem:[#allocation5 + $0x38] ss:$12 sps:$4 sm:$0xff]  }
  0x62   :  { %v3594_v20 = vld [vmem:[#allocation5 + $0x50] ss:$12 sps:$4 sm:$0xff]   ;;  %v3595_v21 = vld [vmem:[#allocation5 + $0x68] ss:$12 sps:$4 sm:$0xff]   ;;  %v3596_v22 = vld [vmem:[#allocation5 + $0x80] ss:$12 sps:$4 sm:$0xff]  }
  0x63   :  { %v3597_v23 = vld [vmem:[#allocation5 + $0x98] ss:$12 sps:$4 sm:$0xff]   ;;  %v3598_v24 = vld [vmem:[#allocation5 + $0xb0] ss:$12 sps:$4 sm:$0xff]   ;;  %v4280_v25 = vld [vmem:[#allocation3 + $0x8] ss:$12 sps:$4 sm:$0xff]  }
  0x64   :  { %306 = vmatpush1.bf16.msra.mxu1 %v3551_v27  ;;  %625 = vmatpush1.bf16.msra.mxu0 %v3552_v28  ;;  %v5189_v26 = vmov 0.0   ;;  %v4287_v27 = vld [vmem:[#allocation3 + $0x20] ss:$12 sps:$4 sm:$0xff]   ;;  %v4292_v28 = vld [vmem:[#allocation3 + $0x38] ss:$12 sps:$4 sm:$0xff]  }
  0x65   :  { %307 = vmatprep.subr.bf16.mxu1 %v3553_v29  ;;  %626 = vmatprep.subr.bf16.mxu0 %v3555_v30  ;;  %v4297_v29 = vld [vmem:[#allocation3 + $0x50] ss:$12 sps:$4 sm:$0xff]   ;;  %v4303_v30 = vld [vmem:[#allocation3 + $0x68] ss:$12 sps:$4 sm:$0xff]  }
  0x66   :  { %v4315_v33 = vld [vmem:[#allocation3 + $0xb0] ss:$12 sps:$4 sm:$0xff]  }
  0x68   :  { %308 = vmatpush1.bf16.msra.mxu1 %v3557_v31  ;;  %627 = vmatpush1.bf16.msra.mxu0 %v3558_v32  ;;  %v4307_v31 = vld [vmem:[#allocation3 + $0x80] ss:$12 sps:$4 sm:$0xff]   ;;  %v4311_v32 = vld [vmem:[#allocation3 + $0x98] ss:$12 sps:$4 sm:$0xff]  }
  0x69   :  { %3122 = vmatprep.subr.bf16.mxu1 %v3559_v37  ;;  %953 = vmatprep.subr.bf16.mxu0 %v4133_v38 }
  0x6b   :  { %326 = vmatmul.mubr.bf16.vlgmr.msra.gmra.mrb[0].mxu1 %v4135_v39  ;;  %645 = vmatmul.mubr.bf16.vlgmr.msra.gmra.mrb[0].mxu0 %v4137_v40 }
  0x6c   :  { %3123 = vmatpush3.bf16.msra.mxu1 %v3559_v37  ;;  %954 = vmatpush1.bf16.msra.mxu0 %v4139_v41  ;;  %v148_v37 = vld [vmem:[%s5176_s4] sm:$0x7] }
  0x6d   :  { %3124 = vmatprep.subr.bf16.mxu1 %v3563_v42  ;;  %955 = vmatprep.subr.bf16.mxu0 %v4145_v43 }
  0x6e   :  { %335 = vmatprep.mubr.bf16.mxu1 %v5187_v0  ;;  %654 = vmatprep.mubr.bf16.mxu0 %v5187_v0 }
  0x70   :  { %3125 = vmatpush3.bf16.msra.mxu1 %v3563_v42  ;;  %956 = vmatpush1.bf16.msra.mxu0 %v4147_v44 }
  0x71   :  { %3126 = vmatprep.subr.bf16.mxu1 %v3567_v47  ;;  %957 = vmatprep.subr.bf16.mxu0 %v4168_v50 }
  0x73   :  { %336 = vmatmul.mubr.bf16.gmra.mrb[4].mxu1 %v4172_v51  ;;  %655 = vmatmul.mubr.bf16.gmra.mrb[4].mxu0 %v4174_v52 }
  0x74   :  { %3127 = vmatpush3.bf16.msra.mxu1 %v3567_v47  ;;  %958 = vmatpush1.bf16.msra.mxu0 %v4176_v53 }
  0x75   :  { %3128 = vmatprep.subr.bf16.mxu1 %v3571_v54  ;;  %959 = vmatprep.subr.bf16.mxu0 %v4183_v55 }
  0x76   :  { %345 = vmatprep.mubr.bf16.mxu1 %v5187_v0  ;;  %664 = vmatprep.mubr.bf16.mxu0 %v5187_v0 }
  0x78   :  { %3129 = vmatpush3.bf16.msra.mxu1 %v3571_v54  ;;  %960 = vmatpush1.bf16.msra.mxu0 %v4185_v56 }
  0x79   :  { %3130 = vmatprep.subr.bf16.mxu1 %v3575_v59  ;;  %961 = vmatprep.subr.bf16.mxu0 %v4206_v62 }
  0x7b   :  { %346 = vmatmul.mubr.bf16.gmra.mrb[8].mxu1 %v114_v63  ;;  %665 = vmatmul.mubr.bf16.gmra.mrb[8].mxu0 %v4210_v1 }
  0x7c   :  { %3131 = vmatpush3.bf16.msra.mxu1 %v3575_v59  ;;  %962 = vmatpush1.bf16.msra.mxu0 %v4212_v2 }
  0x7d   :  { %3132 = vmatprep.subr.bf16.mxu1 %v3579_v3  ;;  %963 = vmatprep.subr.bf16.mxu0 %v4219_v4 }
  0x7e   :  { %355 = vmatprep.mubr.bf16.mxu1 %v5187_v0  ;;  %674 = vmatprep.mubr.bf16.mxu0 %v5187_v0 }
  0x80   :  { %3133 = vmatpush3.bf16.msra.mxu1 %v3579_v3  ;;  %964 = vmatpush1.bf16.msra.mxu0 %v4221_v5 }
  0x81   :  { %3134 = vmatprep.subr.bf16.mxu1 %v3583_v8  ;;  %965 = vmatprep.subr.bf16.mxu0 %v4238_v10 }
  0x83   :  { %356 = vmatmul.mubr.bf16.gmra.mrb[12].mxu1 %v115_v11  ;;  %675 = vmatmul.mubr.bf16.gmra.mrb[12].mxu0 %v4242_v12 }
  0x84   :  { %3135 = vmatpush3.bf16.msra.mxu1 %v3583_v8  ;;  %966 = vmatpush1.bf16.msra.mxu0 %v4244_v13 }
  0x85   :  { %3136 = vmatprep.subr.bf16.mxu1 %v3587_v14  ;;  %967 = vmatprep.subr.bf16.mxu0 %v4251_v15 }
  0x86   :  { %3138 = vmatprep.mubr.bf16.mxu1 %v4135_v39  ;;  %985 = vmatprep.mubr.bf16.mxu0 %v5187_v0  ;;  %v5185_v39 = vsub.s32 1, %v4339_v35 }
  0x88   :  { %3137 = vmatpush3.bf16.msra.mxu1 %v3587_v14  ;;  %968 = vmatpush1.bf16.msra.mxu0 %v4255_v16  ;;  %v157_v48 = vrot.slane %v148_v37, %v5185_v39 }
  0x89   :  { %3146 = vmatprep.subr.bf16.mxu1 %v3591_v17  ;;  %1057 = vmatprep.subr.bf16.mxu0 %v4133_v38 }
  0x8b   :  { %3139 = vmatmul.mubr.bf16.vlgmr.msra.gmra.mrb[16].mxu1 %v4172_v51  ;;  %986 = vmatmul.mubr.bf16.vlgmr.msra.gmra.mrb[16].mxu0 %v5187_v0 }
  0x8c   :  { %3147 = vmatpush3.bf16.msra.mxu1 %v3591_v17  ;;  %3142 = vmatprep.mubr.bf16.mxu1 %v114_v63 }
  0x8d   :  { %3148 = vmatprep.subr.bf16.mxu1 %v3592_v18  ;;  %1058 = vmatpush1.bf16.msra.mxu0 %v4139_v41 }
  0x8e   :  { %1059 = vmatprep.subr.bf16.mxu0 %v4145_v43  ;;  %1089 = vmatprep.mubr.bf16.mxu0 %v5187_v0 }
  0x90   :  { %3149 = vmatpush3.bf16.msra.mxu1 %v3592_v18 }
  0x91   :  { %3150 = vmatprep.subr.bf16.mxu1 %v3593_v19  ;;  %1060 = vmatpush1.bf16.msra.mxu0 %v4147_v44 }
  0x92   :  { %1061 = vmatprep.subr.bf16.mxu0 %v4168_v50 }
  0x93   :  { %3143 = vmatmul.mubr.bf16.gmra.mrb[20].mxu1 %v115_v11 }
  0x94   :  { %3151 = vmatpush3.bf16.msra.mxu1 %v3593_v19  ;;  %3162 = vmatprep.mubr.bf16.mxu1 %v4137_v40  ;;  %v153_v40 = vrot.slane %v148_v37, %v5186_v36 }
  0x95   :  { %3152 = vmatprep.subr.bf16.mxu1 %v3594_v20  ;;  %1062 = vmatpush1.bf16.msra.mxu0 %v4176_v53 }
  0x96   :  { %1063 = vmatprep.subr.bf16.mxu0 %v4183_v55 }
  0x98   :  { %3153 = vmatpush3.bf16.msra.mxu1 %v3594_v20 }
  0x99   :  { %3154 = vmatprep.subr.bf16.mxu1 %v3595_v21  ;;  %1064 = vmatpush1.bf16.msra.mxu0 %v4185_v56 }
  0x9a   :  { %1065 = vmatprep.subr.bf16.mxu0 %v4206_v62 }
  0x9c   :  { %3155 = vmatpush3.bf16.msra.mxu1 %v3595_v21 }
  0x9d   :  { %3156 = vmatprep.subr.bf16.mxu1 %v3596_v22  ;;  %1066 = vmatpush1.bf16.msra.mxu0 %v4212_v2 }
  0x9e   :  { %1067 = vmatprep.subr.bf16.mxu0 %v4219_v4 }
  0xa0   :  { %3157 = vmatpush3.bf16.msra.mxu1 %v3596_v22 }
  0xa1   :  { %3158 = vmatprep.subr.bf16.mxu1 %v3597_v23  ;;  %1068 = vmatpush1.bf16.msra.mxu0 %v4221_v5 }
  0xa2   :  { %1069 = vmatprep.subr.bf16.mxu0 %v4238_v10 }
  0xa4   :  { %3159 = vmatpush3.bf16.msra.mxu1 %v3597_v23 }
  0xa5   :  { %3160 = vmatprep.subr.bf16.mxu1 %v3598_v24  ;;  %1070 = vmatpush1.bf16.msra.mxu0 %v4244_v13 }
  0xa6   :  { %1071 = vmatprep.subr.bf16.mxu0 %v4251_v15 }
  0xa8   :  { %3161 = vmatpush3.bf16.msra.mxu1 %v3598_v24 }
  0xa9   :  { %3170 = vmatprep.subr.bf16.mxu1 %v5189_v26  ;;  %1072 = vmatpush1.bf16.msra.mxu0 %v4255_v16 }
  0xaa   :  { %1161 = vmatprep.subr.bf16.mxu0 %v4133_v38 }
  0xab   :  { %3163 = vmatmul.mubr.bf16.vlgmr.msra.gmra.mrb[24].mxu1 %v4174_v52 }
  0xac   :  { %3171 = vmatpush3.bf16.msra.mxu1 %v4280_v25  ;;  %3166 = vmatprep.mubr.bf16.mxu1 %v4210_v1 }
  0xad   :  { %3172 = vmatprep.subr.bf16.mxu1 %v5189_v26 }
  0xb0   :  { %3173 = vmatpush3.bf16.msra.mxu1 %v4287_v27 }
  0xb1   :  { %3174 = vmatprep.subr.bf16.mxu1 %v5189_v26 }
  0xb3   :  { %3167 = vmatmul.mubr.bf16.gmra.mrb[28].mxu1 %v4242_v12 }
  0xb4   :  { %3175 = vmatpush3.bf16.msra.mxu1 %v4292_v28  ;;  %3186 = vmatprep.mubr.msk.bf16.mxu1 %vm3931_vm0, %v5189_v26 }
  0xb5   :  { %3176 = vmatprep.subr.bf16.mxu1 %v5189_v26 }
  0xb8   :  { %3177 = vmatpush3.bf16.msra.mxu1 %v4297_v29 }
  0xb9   :  { %3178 = vmatprep.subr.bf16.mxu1 %v5189_v26 }
  0xbc   :  { %3179 = vmatpush3.bf16.msra.mxu1 %v4303_v30 }
  0xbd   :  { %3180 = vmatprep.subr.bf16.mxu1 %v5189_v26 }
  0xc0   :  { %3181 = vmatpush3.bf16.msra.mxu1 %v4307_v31 }
  0xc1   :  { %3182 = vmatprep.subr.bf16.mxu1 %v5189_v26 }
  0xc4   :  { %3183 = vmatpush3.bf16.msra.mxu1 %v4311_v32 }
  0xc5   :  { %3184 = vmatprep.subr.bf16.mxu1 %v5189_v26 }
  0xc8   :  { %3185 = vmatpush3.bf16.msra.mxu1 %v4315_v33 }
  0xc9   :  { %3190 = vmatprep.subr.bf16.mxu1 %v5189_v26 }
  0xcb   :  { %3187 = vmatmul.mubr.bf16.vlgmr.msra.gmra.mrb[32].mxu1 %v5187_v0 }
  0xcc   :  { %3191 = vmatpush3.bf16.msra.mxu1 %v4280_v25  ;;  %3206 = vmatprep.mubr.msk.bf16.mxu1 %vm3931_vm0, %v5189_v26 }
  0xcd   :  { %3192 = vmatprep.subr.bf16.mxu1 %v5189_v26 }
  0xd0   :  { %3193 = vmatpush3.bf16.msra.mxu1 %v4287_v27 }
  0xd1   :  { %3194 = vmatprep.subr.bf16.mxu1 %v5189_v26 }
  0xd4   :  { %3195 = vmatpush3.bf16.msra.mxu1 %v4292_v28 }
  0xd5   :  { %3196 = vmatprep.subr.bf16.mxu1 %v5189_v26 }
  0xd8   :  { %3197 = vmatpush3.bf16.msra.mxu1 %v4297_v29 }
  0xd9   :  { %3198 = vmatprep.subr.bf16.mxu1 %v5189_v26 }
  0xdc   :  { %3199 = vmatpush3.bf16.msra.mxu1 %v4303_v30 }
  0xdd   :  { %3200 = vmatprep.subr.bf16.mxu1 %v5189_v26 }
  0xe0   :  { %3201 = vmatpush3.bf16.msra.mxu1 %v4307_v31 }
  0xe1   :  { %3202 = vmatprep.subr.bf16.mxu1 %v5189_v26 }
  0xe4   :  { %3203 = vmatpush3.bf16.msra.mxu1 %v4311_v32 }
  0xe5   :  { %3204 = vmatprep.subr.bf16.mxu1 %v5189_v26 }
  0xe8   :  { %3205 = vmatpush3.bf16.msra.mxu1 %v4315_v33 }
  0xe9   :  { %3210 = vmatprep.subr.bf16.mxu1 %v5189_v26 }
 0x13e   :  { %v327_v42 = vpop.f32.mrb[0].mxu1  ;;  %v4348_v45 = vpop.f32.mrb[0].mxu0 }
 0x13f   :  { %5194 = vst [vmem:[#allocation14_spill] sm:$0xff] %v4348_v45  ;;  %v329_v46 = vpop.f32.mrb[1].mxu1  ;;  %v4350_v47 = vpop.f32.mrb[1].mxu0  ;;  %v328_v26 = vadd.f32 %v327_v42, %v153_v40 }
 0x140   :  { %5195 = vst [vmem:[#allocation15_spill] sm:$0xff] %v4350_v47  ;;  %v331_v49 = vpop.f32.mrb[2].mxu1  ;;  %v4354_v51 = vpop.f32.mrb[2].mxu0 }
 0x141   :  { %5196 = vst [vmem:[#allocation16_spill] sm:$0xff] %v4354_v51  ;;  %v4356_v52 = vadd.f32 %v331_v49, %v153_v40  ;;  %v333_v54 = vpop.f32.mrb[3].mxu1  ;;  %v4358_v57 = vpop.f32.mrb[3].mxu0 }
 0x142   :  { %5197 = vst [vmem:[#allocation17_spill] sm:$0xff] %v4358_v57  ;;  %v4360_v58 = vadd.f32 %v333_v54, %v157_v48 }
 0x146   :  { %v337_v59 = vpop.f32.mrb[4].mxu1  ;;  %v4362_v60 = vpop.f32.mrb[4].mxu0 }
 0x147   :  { %5198 = vst [vmem:[#allocation18_spill] sm:$0xff] %v4362_v60  ;;  %v4364_v61 = vadd.f32 %v337_v59, %v153_v40  ;;  %v339_v63 = vpop.f32.mrb[5].mxu1  ;;  %v4366_v1 = vpop.f32.mrb[5].mxu0 }
 0x148   :  { %5199 = vst [vmem:[#allocation19_spill] sm:$0xff] %v4366_v1  ;;  %v4368_v3 = vadd.f32 %v339_v63, %v157_v48  ;;  %v341_v6 = vpop.f32.mrb[6].mxu1  ;;  %v4370_v7 = vpop.f32.mrb[6].mxu0 }
 0x149   :  { %5200 = vst [vmem:[#allocation20_spill] sm:$0xff] %v4370_v7  ;;  %v4372_v8 = vadd.f32 %v341_v6, %v153_v40  ;;  %v343_v9 = vpop.f32.mrb[7].mxu1  ;;  %v4374_v11 = vpop.f32.mrb[7].mxu0 }
 0x14a   :  { %5201 = vst [vmem:[#allocation21_spill] sm:$0xff] %v4374_v11  ;;  %v4376_v12 = vadd.f32 %v343_v9, %v157_v48  ;;  %v160_v9 = vsub.s32 2, %v4339_v35 }
 0x14e   :  { %v347_v14 = vpop.f32.mrb[8].mxu1  ;;  %v4378_v17 = vpop.f32.mrb[8].mxu0 }
 0x14f   :  { %5202 = vst [vmem:[#allocation22_spill] sm:$0xff] %v4378_v17  ;;  %v4380_v18 = vadd.f32 %v347_v14, %v153_v40  ;;  %v349_v19 = vpop.f32.mrb[9].mxu1  ;;  %v4382_v20 = vpop.f32.mrb[9].mxu0 }
 0x150   :  { %5203 = vst [vmem:[#allocation23_spill] sm:$0xff] %v4382_v20  ;;  %v4384_v21 = vadd.f32 %v349_v19, %v157_v48  ;;  %v351_v22 = vpop.f32.mrb[10].mxu1  ;;  %v4386_v23 = vpop.f32.mrb[10].mxu0 }
 0x151   :  { %5204 = vst [vmem:[#allocation24_spill] sm:$0xff] %v4386_v23  ;;  %v4388_v24 = vadd.f32 %v351_v22, %v153_v40  ;;  %v353_v34 = vpop.f32.mrb[11].mxu1  ;;  %v4390_v49 = vpop.f32.mrb[11].mxu0  ;;  %v161_v22 = vrot.slane %v148_v37, %v160_v9  ;;  %v330_v23 = vadd.f32 %v329_v46, %v157_v48 }
 0x152   :  { %5205 = vst [vmem:[#allocation25_spill] sm:$0xff] %v4390_v49  ;;  %v4392_v54 = vadd.f32 %v353_v34, %v157_v48 }
 0x156   :  { %v357_v59 = vpop.f32.mrb[12].mxu1 }
 0x157   :  { %v4394_v63 = vadd.f32 %v357_v59, %v153_v40  ;;  %v359_v6 = vpop.f32.mrb[13].mxu1 }
 0x158   :  { %v4397_v14 = vadd.f32 %v359_v6, %v157_v48  ;;  %v361_v19 = vpop.f32.mrb[14].mxu1 }
 0x159   :  { %v4399_v39 = vadd.f32 %v361_v19, %v153_v40  ;;  %v363_v36 = vpop.f32.mrb[15].mxu1 }
 0x15a   :  { %v4401_v0 = vadd.f32 %v363_v36, %v157_v48 }
 0x15c   :  { %5206 = vst [vmem:[#allocation26_spill] sm:$0xff] %v4401_v0 }
 0x15e   :  { %v3140_v49 = vpop.f32.mrb[16].mxu1  ;;  %v987_v34 = vpop.f32.mrb[16].mxu0 }
 0x15f   :  { %v4403_v20 = vadd.f32 %v3140_v49, %v161_v22  ;;  %v1034_v59 = vadd.f32 %v987_v34, %v328_v26  ;;  %v400_v17 = vpop.f32.mrb[17].mxu1  ;;  %v989_v11 = vpop.f32.mrb[17].mxu0 }
 0x160   :  { %v1035_v7 = vadd.f32 %v989_v11, %v330_v23  ;;  %v3141_v1 = vpop.f32.mrb[18].mxu1  ;;  %v991_v6 = vpop.f32.mrb[18].mxu0 }
 0x161   :  { %v4405_v60 = vadd.f32 %v3141_v1, %v161_v22  ;;  %v403_v19 = vpop.f32.mrb[19].mxu1  ;;  %v992_v57 = vpop.f32.mrb[19].mxu0  ;;  %v467_v1 = vld [vmem:[%s5180_s8] sm:$0x7] }
 0x162   :  { %v4407_v51 = vadd.f32 %v403_v19, %v161_v22  ;;  %v480_v11 = vrot.slane %v467_v1, %v160_v9 }
 0x166   :  { %v3144_v36 = vpop.f32.mrb[20].mxu1 }
 0x167   :  { %v4409_v37 = vadd.f32 %v3144_v36, %v161_v22  ;;  %v416_v40 = vpop.f32.mrb[21].mxu1  ;;  %v2888_v36 = vmul.f32 -1.442695, %v1034_v59 }
 0x168   :  { %v4411_v42 = vadd.f32 %v416_v40, %v161_v22  ;;  %v3145_v46 = vpop.f32.mrb[22].mxu1 }
 0x169   :  { %v4413_v48 = vadd.f32 %v3145_v46, %v161_v22  ;;  %v419_v26 = vpop.f32.mrb[23].mxu1  ;;  %3647 = vpow2.f32 %v2888_v36  ;;  %v4437_v36 = vld [vmem:[%s5177_s5] ss:$0 sm:$0xff] }
 0x16a   :  { %v4415_v49 = vadd.f32 %v419_v26, %v161_v22 }
 0x16b   :  { %5207 = vst [vmem:[#allocation27_spill] sm:$0xff] %v4413_v48 }
 0x17e   :  { %v3164_v57 = vpop.f32.mrb[24].mxu1 }
 0x17f   :  { %v4420_v23 = vadd.f32 %v3164_v57, %v480_v11  ;;  %v717_v34 = vpop.f32.mrb[25].mxu1 }
 0x180   :  { %v4422_v6 = vadd.f32 %v717_v34, %v480_v11  ;;  %v3165_v19 = vpop.f32.mrb[26].mxu1  ;;  %v2889_v34 = vmul.f32 -1.442695, %v1035_v7 }
 0x181   :  { %5208 = vst [vmem:[#allocation28_spill] sm:$0xff] %v4420_v23  ;;  %v4424_v40 = vadd.f32 %v3165_v19, %v480_v11  ;;  %v720_v46 = vpop.f32.mrb[27].mxu1  ;;  %v3648_v23 = vpop.eup %3647 }
 0x182   :  { %5209 = vst [vmem:[#allocation29_spill] sm:$0xff] %v4422_v6  ;;  %v4426_v47 = vadd.f32 %v720_v46, %v480_v11  ;;  %3649 = vpow2.f32 %v2889_v34  ;;  %v1042_v59 = vadd.f32 1.0, %v3648_v23 }
 0x183   :  { %5210 = vst [vmem:[#allocation30_spill] sm:$0xff] %v4424_v40 }
 0x184   :  { %5211 = vst [vmem:[#allocation31_spill] sm:$0xff] %v4426_v47  ;;  %3651 = vrcp.f32 %v1042_v59 }
 0x186   :  { %v3168_v26 = vpop.f32.mrb[28].mxu1 }
 0x187   :  { %v4428_v45 = vadd.f32 %v3168_v26, %v480_v11  ;;  %v733_v35 = vpop.f32.mrb[29].mxu1 }
 0x188   :  { %v4430_v48 = vadd.f32 %v733_v35, %v480_v11  ;;  %v3169_v9 = vpop.f32.mrb[30].mxu1 }
 0x189   :  { %5212 = vst [vmem:[#allocation32_spill] sm:$0xff] %v4428_v45  ;;  %v736_v1 = vpop.f32.mrb[31].mxu1 }
 0x18a   :  { %5213 = vst [vmem:[#allocation33_spill] sm:$0xff] %v4430_v48  ;;  %v4432_v57 = vadd.f32 %v736_v1, %v480_v11  ;;  %v401_v11 = vadd.f32 %v400_v17, %v161_v22  ;;  %v5216_v17 = vmov 0  }
 0x18c   :  { %5214 = vst [vmem:[#allocation34_spill] sm:$0xff] %v4432_v57  ;;  %v3650_v19 = vpop.eup %3649 }
 0x18d   :  { %v1043_v46 = vadd.f32 1.0, %v3650_v19 }
 0x18e   :  { %v3652_v9 = vpop.eup %3651 }
 0x18f   :  { %3653 = vrcp.f32 %v1043_v46 }
 0x199   :  { %v3654_v23 = vpop.eup %3653 }
 0x19a   :  { %v1052_v59 = vsub.f32 1.0, %v3654_v23  ;;  %v1054_v47 = vmul.f32 0.0, %v3654_v23 }
 0x19e   :  { %v1028_v26 = vpop.f32.mrb[32].mxu1 }
 0x19f   :  { %v1048_v35 = vadd.f32 %v4437_v36, %v1028_v26  ;;  %v3188_v45 = vpop.f32.mrb[33].mxu1 }
 0x1a0   :  { %v1031_v48 = vpop.f32.mrb[34].mxu1  ;;  %v5215_v45 = vmov 0.0  }
 0x1a1   :  { %v1049_v7 = vmul.f32 %v3652_v9, %v1048_v35  ;;  %v3189_v1 = vpop.f32.mrb[35].mxu1 }
 0x1a3   :  { %v1050_v34 = vadd.f32 %v1049_v7, %v401_v11 }
 0x1a5   :  { %3655 = vtanh.f32 %v1050_v34 }
 0x1af   :  { %v3656_v57 = vpop.eup %3655 }
 0x1b0   :  { %v1053_v40 = vmul.f32 %v3656_v57, %v1052_v59 }
 0x1b2   :  { %v4440_v6 = vadd.f32 %v1054_v47, %v1053_v40 }
 0x1b4   :  { %v1056_v19 = vpack.c.bf16 %v4440_v6, %v4440_v6 }
 0x1b6   :  { %1090 = vmatmul.mubr.bf16.vlgmr.msra.gmra.mrb[20].mxu0 %v1056_v19  ;;  %3207 = vmatmul.mubr.bf16.vlgmr.msra.gmra.mrb[36].mxu1 %v1056_v19 }
 0x1b7   :  { %1162 = vmatpush1.bf16.msra.mxu0 %v4139_v41  ;;  %3211 = vmatpush3.bf16.msra.mxu1 %v4280_v25 }
 0x1b8   :  { %1163 = vmatprep.subr.bf16.mxu0 %v4145_v43  ;;  %3212 = vmatprep.subr.bf16.mxu1 %v5215_v45 }
 0x1b9   :  { %1193 = vmatprep.mubr.bf16.mxu0 %v5216_v17  ;;  %3226 = vmatprep.mubr.msk.bf16.mxu1 %vm3931_vm0, %v5215_v45 }
 0x1bb   :  { %1164 = vmatpush1.bf16.msra.mxu0 %v4147_v44  ;;  %3213 = vmatpush3.bf16.msra.mxu1 %v4287_v27 }
 0x1bc   :  { %1165 = vmatprep.subr.bf16.mxu0 %v4168_v50  ;;  %3214 = vmatprep.subr.bf16.mxu1 %v5215_v45 }
 0x1bf   :  { %1166 = vmatpush1.bf16.msra.mxu0 %v4176_v53  ;;  %3215 = vmatpush3.bf16.msra.mxu1 %v4292_v28 }
 0x1c0   :  { %1167 = vmatprep.subr.bf16.mxu0 %v4183_v55  ;;  %3216 = vmatprep.subr.bf16.mxu1 %v5215_v45 }
 0x1c3   :  { %1168 = vmatpush1.bf16.msra.mxu0 %v4185_v56  ;;  %3217 = vmatpush3.bf16.msra.mxu1 %v4297_v29 }
 0x1c4   :  { %1169 = vmatprep.subr.bf16.mxu0 %v4206_v62  ;;  %3218 = vmatprep.subr.bf16.mxu1 %v5215_v45 }
 0x1c7   :  { %1170 = vmatpush1.bf16.msra.mxu0 %v4212_v2  ;;  %3219 = vmatpush3.bf16.msra.mxu1 %v4303_v30 }
 0x1c8   :  { %1171 = vmatprep.subr.bf16.mxu0 %v4219_v4  ;;  %3220 = vmatprep.subr.bf16.mxu1 %v5215_v45 }
 0x1cb   :  { %1172 = vmatpush1.bf16.msra.mxu0 %v4221_v5  ;;  %3221 = vmatpush3.bf16.msra.mxu1 %v4307_v31 }
 0x1cc   :  { %1173 = vmatprep.subr.bf16.mxu0 %v4238_v10  ;;  %3222 = vmatprep.subr.bf16.mxu1 %v5215_v45 }
 0x1cf   :  { %1174 = vmatpush1.bf16.msra.mxu0 %v4244_v13  ;;  %3223 = vmatpush3.bf16.msra.mxu1 %v4311_v32 }
 0x1d0   :  { %1175 = vmatprep.subr.bf16.mxu0 %v4251_v15  ;;  %3224 = vmatprep.subr.bf16.mxu1 %v5215_v45 }
 0x1d3   :  { %1176 = vmatpush1.bf16.msra.mxu0 %v4255_v16  ;;  %3225 = vmatpush3.bf16.msra.mxu1 %v4315_v33 }
 0x1d4   :  { %1265 = vmatprep.subr.bf16.mxu0 %v4133_v38  ;;  %3230 = vmatprep.subr.bf16.mxu1 %v5215_v45 }
 0x289   :  { %v1091_v47 = vpop.f32.mrb[20].mxu0  ;;  %v1132_v22 = vpop.f32.mrb[36].mxu1 }
 0x28a   :  { %v1138_v48 = vadd.f32 %v1091_v47, %v4356_v52  ;;  %v1093_v40 = vpop.f32.mrb[21].mxu0  ;;  %v3208_v57 = vpop.f32.mrb[37].mxu1  ;;  %v1152_v0 = vadd.f32 %v4437_v36, %v1132_v22 }
 0x28b   :  { %v1139_v46 = vadd.f32 %v1093_v40, %v4360_v58  ;;  %v1095_v26 = vpop.f32.mrb[22].mxu0  ;;  %v1135_v35 = vpop.f32.mrb[38].mxu1 }
 0x28c   :  { %v2890_v9 = vmul.f32 -1.442695, %v1138_v48  ;;  %v1096_v11 = vpop.f32.mrb[23].mxu0  ;;  %v3209_v7 = vpop.f32.mrb[39].mxu1 }
 0x28d   :  { %v2891_v1 = vmul.f32 -1.442695, %v1139_v46 }
 0x28e   :  { %3657 = vpow2.f32 %v2890_v9 }
 0x28f   :  { %3659 = vpow2.f32 %v2891_v1 }
 0x298   :  { %v3658_v34 = vpop.eup %3657 }
 0x299   :  { %v1146_v23 = vadd.f32 1.0, %v3658_v34  ;;  %v3660_v59 = vpop.eup %3659 }
 0x29a   :  { %v1147_v19 = vadd.f32 1.0, %v3660_v59 }
 0x29b   :  { %3661 = vrcp.f32 %v1146_v23 }
 0x29c   :  { %3663 = vrcp.f32 %v1147_v19 }
 0x2a5   :  { %v3662_v52 = vpop.eup %3661 }
 0x2a6   :  { %v1153_v47 = vmul.f32 %v3662_v52, %v1152_v0  ;;  %v3664_v40 = vpop.eup %3663 }
 0x2a7   :  { %v1156_v48 = vsub.f32 1.0, %v3664_v40  ;;  %v1158_v46 = vmul.f32 %v3664_v40, %v4440_v6 }
 0x2a8   :  { %v1154_v58 = vadd.f32 %v1153_v47, %v4407_v51 }
 0x2aa   :  { %3665 = vtanh.f32 %v1154_v58 }
 0x2b4   :  { %v3666_v57 = vpop.eup %3665 }
 0x2b5   :  { %v1157_v26 = vmul.f32 %v3666_v57, %v1156_v48 }
 0x2b7   :  { %v4484_v35 = vadd.f32 %v1158_v46, %v1157_v26 }
 0x2b9   :  { %v1160_v9 = vpack.c.bf16 %v4484_v35, %v4484_v35 }
 0x2bb   :  { %1194 = vmatmul.mubr.bf16.vlgmr.msra.gmra.mrb[24].mxu0 %v1160_v9  ;;  %3227 = vmatmul.mubr.bf16.vlgmr.msra.gmra.mrb[40].mxu1 %v1160_v9  ;;  %v4532_v9 = vld [vmem:[#allocation3] ss:$12 sps:$4 sm:$0xff]  }
 0x2bc   :  { %1266 = vmatpush1.bf16.msra.mxu0 %v4139_v41  ;;  %3231 = vmatpush3.bf16.msra.mxu1 %v4280_v25 }
 0x2bd   :  { %1267 = vmatprep.subr.bf16.mxu0 %v4145_v43  ;;  %3232 = vmatprep.subr.bf16.mxu1 %v5215_v45 }
 0x2be   :  { %1297 = vmatprep.mubr.bf16.mxu0 %v5216_v17  ;;  %3246 = vmatprep.mubr.msk.bf16.mxu1 %vm3931_vm0, %v5215_v45 }
 0x2c0   :  { %1268 = vmatpush1.bf16.msra.mxu0 %v4147_v44  ;;  %3233 = vmatpush3.bf16.msra.mxu1 %v4287_v27 }
 0x2c1   :  { %1269 = vmatprep.subr.bf16.mxu0 %v4168_v50  ;;  %3234 = vmatprep.subr.bf16.mxu1 %v5215_v45 }
 0x2c4   :  { %1270 = vmatpush1.bf16.msra.mxu0 %v4176_v53  ;;  %3235 = vmatpush3.bf16.msra.mxu1 %v4292_v28 }
 0x2c5   :  { %1271 = vmatprep.subr.bf16.mxu0 %v4183_v55  ;;  %3236 = vmatprep.subr.bf16.mxu1 %v5215_v45 }
 0x2c8   :  { %1272 = vmatpush1.bf16.msra.mxu0 %v4185_v56  ;;  %3237 = vmatpush3.bf16.msra.mxu1 %v4297_v29 }
 0x2c9   :  { %1273 = vmatprep.subr.bf16.mxu0 %v4206_v62  ;;  %3238 = vmatprep.subr.bf16.mxu1 %v5215_v45 }
 0x2cc   :  { %1274 = vmatpush1.bf16.msra.mxu0 %v4212_v2  ;;  %3239 = vmatpush3.bf16.msra.mxu1 %v4303_v30 }
 0x2cd   :  { %1275 = vmatprep.subr.bf16.mxu0 %v4219_v4  ;;  %3240 = vmatprep.subr.bf16.mxu1 %v5215_v45 }
 0x2d0   :  { %1276 = vmatpush1.bf16.msra.mxu0 %v4221_v5  ;;  %3241 = vmatpush3.bf16.msra.mxu1 %v4307_v31 }
 0x2d1   :  { %1277 = vmatprep.subr.bf16.mxu0 %v4238_v10  ;;  %3242 = vmatprep.subr.bf16.mxu1 %v5215_v45 }
 0x2d4   :  { %1278 = vmatpush1.bf16.msra.mxu0 %v4244_v13  ;;  %3243 = vmatpush3.bf16.msra.mxu1 %v4311_v32 }
 0x2d5   :  { %1279 = vmatprep.subr.bf16.mxu0 %v4251_v15  ;;  %3244 = vmatprep.subr.bf16.mxu1 %v5215_v45 }
 0x2d8   :  { %1280 = vmatpush1.bf16.msra.mxu0 %v4255_v16  ;;  %3245 = vmatpush3.bf16.msra.mxu1 %v4315_v33 }
 0x2d9   :  { %1369 = vmatprep.subr.bf16.mxu0 %v4133_v38  ;;  %3250 = vmatprep.subr.bf16.mxu1 %v5215_v45 }
 0x38e   :  { %v1195_v0 = vpop.f32.mrb[24].mxu0  ;;  %v1236_v41 = vpop.f32.mrb[40].mxu1 }
 0x38f   :  { %v1242_v43 = vadd.f32 %v1195_v0, %v4364_v61  ;;  %v1197_v44 = vpop.f32.mrb[25].mxu0  ;;  %v3228_v50 = vpop.f32.mrb[41].mxu1  ;;  %v1256_v19 = vadd.f32 %v4437_v36, %v1236_v41  ;;  %v4547_v0 = vld [vmem:[#allocation3 + $0x34] ss:$12 sps:$4 sm:$0xff]   ;;  %v4551_v41 = vld [vmem:[#allocation3 + $0x30] ss:$12 sps:$4 sm:$0xff]  }
 0x390   :  { %v1243_v53 = vadd.f32 %v1197_v44, %v4368_v3  ;;  %v1199_v51 = vpop.f32.mrb[26].mxu0  ;;  %v1239_v6 = vpop.f32.mrb[42].mxu1 }
 0x391   :  { %v2892_v22 = vmul.f32 -1.442695, %v1242_v43  ;;  %v1200_v11 = vpop.f32.mrb[27].mxu0  ;;  %v3229_v7 = vpop.f32.mrb[43].mxu1 }
 0x392   :  { %v2893_v1 = vmul.f32 -1.442695, %v1243_v53 }
 0x393   :  { %3667 = vpow2.f32 %v2892_v22 }
 0x394   :  { %3669 = vpow2.f32 %v2893_v1 }
 0x39d   :  { %v3668_v34 = vpop.eup %3667 }
 0x39e   :  { %v1250_v38 = vadd.f32 1.0, %v3668_v34  ;;  %v3670_v23 = vpop.eup %3669 }
 0x39f   :  { %v1251_v59 = vadd.f32 1.0, %v3670_v23 }
 0x3a0   :  { %3671 = vrcp.f32 %v1250_v38 }
 0x3a1   :  { %3673 = vrcp.f32 %v1251_v59 }
 0x3aa   :  { %v3672_v61 = vpop.eup %3671 }
 0x3ab   :  { %v1257_v52 = vmul.f32 %v3672_v61, %v1256_v19  ;;  %v3674_v47 = vpop.eup %3673 }
 0x3ac   :  { %v1260_v58 = vsub.f32 1.0, %v3674_v47  ;;  %v1262_v57 = vmul.f32 %v3674_v47, %v4484_v35  ;;  %v4543_v35 = vld [vmem:[#allocation3 + $0x18] ss:$12 sps:$4 sm:$0xff]  }
 0x3ad   :  { %v1258_v3 = vadd.f32 %v1257_v52, %v4403_v20  ;;  %v4536_v20 = vld [vmem:[#allocation3 + $0x1c] ss:$12 sps:$4 sm:$0xff]   ;;  %v4609_v47 = vld [vmem:[#allocation3 + $0x64] ss:$12 sps:$4 sm:$0xff]  }
 0x3af   :  { %3675 = vtanh.f32 %v1258_v3  ;;  %v4605_v3 = vld [vmem:[#allocation3 + $0x48] ss:$12 sps:$4 sm:$0xff]  }
 0x3b9   :  { %v3676_v40 = vpop.eup %3675 }
 0x3ba   :  { %v1261_v48 = vmul.f32 %v3676_v40, %v1260_v58  ;;  %v4613_v58 = vld [vmem:[#allocation3 + $0x60] ss:$12 sps:$4 sm:$0xff]   ;;  %v4617_v40 = vld [vmem:[#allocation3 + $0x7c] ss:$12 sps:$4 sm:$0xff]  }
 0x3bc   :  { %v4528_v26 = vadd.f32 %v1262_v57, %v1261_v48  ;;  %v4621_v48 = vld [vmem:[#allocation3 + $0x78] ss:$12 sps:$4 sm:$0xff]   ;;  %v4625_v57 = vld [vmem:[#allocation3 + $0x94] ss:$12 sps:$4 sm:$0xff]  }
 0x3be   :  { %v1264_v46 = vpack.c.bf16 %v4528_v26, %v4528_v26 }
 0x3c0   :  { %1298 = vmatmul.mubr.bf16.vlgmr.msra.gmra.mrb[28].mxu0 %v1264_v46  ;;  %3247 = vmatmul.mubr.bf16.vlgmr.msra.gmra.mrb[44].mxu1 %v1264_v46  ;;  %v4633_v46 = vld [vmem:[#allocation3 + $0xac] ss:$12 sps:$4 sm:$0xff]  }
 0x3c1   :  { %1370 = vmatpush1.bf16.msra.mxu0 %v4532_v9  ;;  %3251 = vmatpush3.bf16.msra.mxu1 %v4280_v25 }
 0x3c2   :  { %1371 = vmatprep.subr.bf16.mxu0 %v4536_v20  ;;  %3252 = vmatprep.subr.bf16.mxu1 %v5215_v45 }
 0x3c3   :  { %1401 = vmatprep.mubr.bf16.mxu0 %v5216_v17  ;;  %3266 = vmatprep.mubr.msk.bf16.mxu1 %vm3931_vm0, %v5215_v45 }
 0x3c5   :  { %1372 = vmatpush1.bf16.msra.mxu0 %v4543_v35  ;;  %3253 = vmatpush3.bf16.msra.mxu1 %v4287_v27 }
 0x3c6   :  { %1373 = vmatprep.subr.bf16.mxu0 %v4547_v0  ;;  %3254 = vmatprep.subr.bf16.mxu1 %v5215_v45 }
 0x3c9   :  { %1374 = vmatpush1.bf16.msra.mxu0 %v4551_v41  ;;  %3255 = vmatpush3.bf16.msra.mxu1 %v4292_v28 }
 0x3ca   :  { %1375 = vmatprep.subr.bf16.mxu0 %v4183_v55  ;;  %3256 = vmatprep.subr.bf16.mxu1 %v5215_v45  ;;  %v4575_v55 = vld [vmem:[#allocation3 + $0x4] ss:$12 sps:$4 sm:$0xff]  }
 0x3cd   :  { %1376 = vmatpush1.bf16.msra.mxu0 %v4185_v56  ;;  %3257 = vmatpush3.bf16.msra.mxu1 %v4297_v29 }
 0x3ce   :  { %1377 = vmatprep.subr.bf16.mxu0 %v4206_v62  ;;  %3258 = vmatprep.subr.bf16.mxu1 %v5215_v45 }
 0x3d1   :  { %1378 = vmatpush1.bf16.msra.mxu0 %v4212_v2  ;;  %3259 = vmatpush3.bf16.msra.mxu1 %v4303_v30 }
 0x3d2   :  { %1379 = vmatprep.subr.bf16.mxu0 %v4219_v4  ;;  %3260 = vmatprep.subr.bf16.mxu1 %v5215_v45 }
 0x3d5   :  { %1380 = vmatpush1.bf16.msra.mxu0 %v4221_v5  ;;  %3261 = vmatpush3.bf16.msra.mxu1 %v4307_v31 }
 0x3d6   :  { %1381 = vmatprep.subr.bf16.mxu0 %v4238_v10  ;;  %3262 = vmatprep.subr.bf16.mxu1 %v5215_v45 }
 0x3d9   :  { %1382 = vmatpush1.bf16.msra.mxu0 %v4244_v13  ;;  %3263 = vmatpush3.bf16.msra.mxu1 %v4311_v32 }
 0x3da   :  { %1383 = vmatprep.subr.bf16.mxu0 %v4251_v15  ;;  %3264 = vmatprep.subr.bf16.mxu1 %v5215_v45 }
 0x3dd   :  { %1384 = vmatpush1.bf16.msra.mxu0 %v4255_v16  ;;  %3265 = vmatpush3.bf16.msra.mxu1 %v4315_v33 }
 0x3de   :  { %1473 = vmatprep.subr.bf16.mxu0 %v4575_v55  ;;  %3270 = vmatprep.subr.bf16.mxu1 %v5215_v45 }
 0x493   :  { %v1299_v56 = vpop.f32.mrb[28].mxu0  ;;  %v1340_v62 = vpop.f32.mrb[44].mxu1 }
 0x494   :  { %v1346_v2 = vadd.f32 %v1299_v56, %v4372_v8  ;;  %v1301_v4 = vpop.f32.mrb[29].mxu0  ;;  %v3248_v5 = vpop.f32.mrb[45].mxu1  ;;  %v1360_v7 = vadd.f32 %v4437_v36, %v1340_v62 }
 0x495   :  { %v1347_v10 = vadd.f32 %v1301_v4, %v4376_v12  ;;  %v1303_v13 = vpop.f32.mrb[30].mxu0  ;;  %v1343_v15 = vpop.f32.mrb[46].mxu1 }
 0x496   :  { %v2894_v43 = vmul.f32 -1.442695, %v1346_v2  ;;  %v1304_v44 = vpop.f32.mrb[31].mxu0  ;;  %v3249_v50 = vpop.f32.mrb[47].mxu1 }
 0x497   :  { %v2895_v53 = vmul.f32 -1.442695, %v1347_v10 }
 0x498   :  { %3677 = vpow2.f32 %v2894_v43 }
 0x499   :  { %3679 = vpow2.f32 %v2895_v53 }
 0x4a2   :  { %v3678_v51 = vpop.eup %3677 }
 0x4a3   :  { %v1354_v6 = vadd.f32 1.0, %v3678_v51  ;;  %v3680_v22 = vpop.eup %3679 }
 0x4a4   :  { %v1355_v11 = vadd.f32 1.0, %v3680_v22 }
 0x4a5   :  { %3681 = vrcp.f32 %v1354_v6 }
 0x4a6   :  { %3683 = vrcp.f32 %v1355_v11 }
 0x4af   :  { %v3682_v8 = vpop.eup %3681 }
 0x4b0   :  { %v1361_v1 = vmul.f32 %v3682_v8, %v1360_v7  ;;  %v3684_v34 = vpop.eup %3683 }
 0x4b1   :  { %v1364_v38 = vsub.f32 1.0, %v3684_v34  ;;  %v1366_v19 = vmul.f32 %v3684_v34, %v4528_v26  ;;  %v4629_v26 = vld [vmem:[#allocation3 + $0x90] ss:$12 sps:$4 sm:$0xff]  }
 0x4b2   :  { %v1362_v12 = vadd.f32 %v1361_v1, %v4405_v60  ;;  %v4601_v60 = vld [vmem:[#allocation3 + $0x4c] ss:$12 sps:$4 sm:$0xff]  }
 0x4b4   :  { %3685 = vtanh.f32 %v1362_v12 }
 0x4be   :  { %v3686_v23 = vpop.eup %3685 }
 0x4bf   :  { %v1365_v59 = vmul.f32 %v3686_v23, %v1364_v38 }
 0x4c1   :  { %v4584_v61 = vadd.f32 %v1366_v19, %v1365_v59 }
 0x4c3   :  { %v1368_v52 = vpack.c.bf16 %v4584_v61, %v4584_v61 }
 0x4c5   :  { %1402 = vmatmul.mubr.bf16.vlgmr.msra.gmra.mrb[32].mxu0 %v1368_v52  ;;  %3267 = vmatmul.mubr.bf16.vlgmr.msra.gmra.mrb[48].mxu1 %v1368_v52 }
 0x4c6   :  { %1474 = vmatpush1.bf16.msra.mxu0 %v4532_v9  ;;  %3271 = vmatpush3.bf16.msra.mxu1 %v4280_v25 }
 0x4c7   :  { %1475 = vmatprep.subr.bf16.mxu0 %v4536_v20  ;;  %3272 = vmatprep.subr.bf16.mxu1 %v5215_v45 }
 0x4c8   :  { %1505 = vmatprep.mubr.bf16.mxu0 %v5216_v17  ;;  %3286 = vmatprep.mubr.msk.bf16.mxu1 %vm3931_vm0, %v5215_v45 }
 0x4ca   :  { %1476 = vmatpush1.bf16.msra.mxu0 %v4543_v35  ;;  %3273 = vmatpush3.bf16.msra.mxu1 %v4287_v27 }
 0x4cb   :  { %1477 = vmatprep.subr.bf16.mxu0 %v4547_v0  ;;  %3274 = vmatprep.subr.bf16.mxu1 %v5215_v45 }
 0x4ce   :  { %1478 = vmatpush1.bf16.msra.mxu0 %v4551_v41  ;;  %3275 = vmatpush3.bf16.msra.mxu1 %v4292_v28 }
 0x4cf   :  { %1479 = vmatprep.subr.bf16.mxu0 %v4601_v60  ;;  %3276 = vmatprep.subr.bf16.mxu1 %v5215_v45 }
 0x4d2   :  { %1480 = vmatpush1.bf16.msra.mxu0 %v4605_v3  ;;  %3277 = vmatpush3.bf16.msra.mxu1 %v4297_v29 }
 0x4d3   :  { %1481 = vmatprep.subr.bf16.mxu0 %v4609_v47  ;;  %3278 = vmatprep.subr.bf16.mxu1 %v5215_v45 }
 0x4d6   :  { %1482 = vmatpush1.bf16.msra.mxu0 %v4613_v58  ;;  %3279 = vmatpush3.bf16.msra.mxu1 %v4303_v30 }
 0x4d7   :  { %1483 = vmatprep.subr.bf16.mxu0 %v4617_v40  ;;  %3280 = vmatprep.subr.bf16.mxu1 %v5215_v45 }
 0x4da   :  { %1484 = vmatpush1.bf16.msra.mxu0 %v4621_v48  ;;  %3281 = vmatpush3.bf16.msra.mxu1 %v4307_v31 }
 0x4db   :  { %1485 = vmatprep.subr.bf16.mxu0 %v4625_v57  ;;  %3282 = vmatprep.subr.bf16.mxu1 %v5215_v45 }
 0x4de   :  { %1486 = vmatpush1.bf16.msra.mxu0 %v4629_v26  ;;  %3283 = vmatpush3.bf16.msra.mxu1 %v4311_v32 }
 0x4df   :  { %1487 = vmatprep.subr.bf16.mxu0 %v4633_v46  ;;  %3284 = vmatprep.subr.bf16.mxu1 %v5215_v45 }
 0x4e2   :  { %1488 = vmatpush1.bf16.msra.mxu0 %v4255_v16  ;;  %3285 = vmatpush3.bf16.msra.mxu1 %v4315_v33 }
 0x4e3   :  { %1577 = vmatprep.subr.bf16.mxu0 %v4575_v55  ;;  %3290 = vmatprep.subr.bf16.mxu1 %v5215_v45 }
 0x598   :  { %v1403_v56 = vpop.f32.mrb[32].mxu0  ;;  %v1444_v62 = vpop.f32.mrb[48].mxu1 }
 0x599   :  { %v1450_v2 = vadd.f32 %v1403_v56, %v4380_v18  ;;  %v1405_v4 = vpop.f32.mrb[33].mxu0  ;;  %v3268_v5 = vpop.f32.mrb[49].mxu1  ;;  %v1464_v11 = vadd.f32 %v4437_v36, %v1444_v62 }
 0x59a   :  { %v1451_v10 = vadd.f32 %v1405_v4, %v4384_v21  ;;  %v1407_v13 = vpop.f32.mrb[34].mxu0  ;;  %v1447_v15 = vpop.f32.mrb[50].mxu1 }
 0x59b   :  { %v2896_v43 = vmul.f32 -1.442695, %v1450_v2  ;;  %v1408_v44 = vpop.f32.mrb[35].mxu0  ;;  %v3269_v50 = vpop.f32.mrb[51].mxu1 }
 0x59c   :  { %v2897_v16 = vmul.f32 -1.442695, %v1451_v10 }
 0x59d   :  { %3687 = vpow2.f32 %v2896_v43 }
 0x59e   :  { %3689 = vpow2.f32 %v2897_v16 }
 0x5a7   :  { %v3688_v53 = vpop.eup %3687 }
 0x5a8   :  { %v1458_v51 = vadd.f32 1.0, %v3688_v53  ;;  %v3690_v6 = vpop.eup %3689 }
 0x5a9   :  { %v1459_v22 = vadd.f32 1.0, %v3690_v6 }
 0x5aa   :  { %3691 = vrcp.f32 %v1458_v51 }
 0x5ab   :  { %3693 = vrcp.f32 %v1459_v22  ;;  %v3813_v22 = vld [vmem:[#allocation3 + $0x8] ss:$12 sps:$4 sm:$0xff]  }
 0x5b4   :  { %v3692_v18 = vpop.eup %3691 }
 0x5b5   :  { %v1465_v7 = vmul.f32 %v3692_v18, %v1464_v11  ;;  %v3694_v8 = vpop.eup %3693 }
 0x5b6   :  { %v1468_v1 = vsub.f32 1.0, %v3694_v8  ;;  %v1470_v38 = vmul.f32 %v3694_v8, %v4584_v61 }
 0x5b7   :  { %v1466_v21 = vadd.f32 %v1465_v7, %v4411_v42 }
 0x5b9   :  { %3695 = vtanh.f32 %v1466_v21 }
 0x5c3   :  { %v3696_v12 = vpop.eup %3695 }
 0x5c4   :  { %v1469_v34 = vmul.f32 %v3696_v12, %v1468_v1 }
 0x5c6   :  { %v4646_v23 = vadd.f32 %v1470_v38, %v1469_v34 }
 0x5c8   :  { %v1472_v59 = vpack.c.bf16 %v4646_v23, %v4646_v23 }
 0x5ca   :  { %1506 = vmatmul.mubr.bf16.vlgmr.msra.gmra.mrb[36].mxu0 %v1472_v59  ;;  %3287 = vmatmul.mubr.bf16.vlgmr.msra.gmra.mrb[52].mxu1 %v1472_v59 }
 0x5cb   :  { %1578 = vmatpush1.bf16.msra.mxu0 %v4532_v9  ;;  %3291 = vmatpush3.bf16.msra.mxu1 %v4280_v25  ;;  %v4681_v25 = vld [vmem:[#allocation3 + $0xa8] ss:$12 sps:$4 sm:$0xff]  }
 0x5cc   :  { %1579 = vmatprep.subr.bf16.mxu0 %v4536_v20  ;;  %3292 = vmatprep.subr.bf16.mxu1 %v5215_v45 }
 0x5cd   :  { %1609 = vmatprep.mubr.bf16.mxu0 %v5216_v17  ;;  %3306 = vmatprep.mubr.msk.bf16.mxu1 %vm3931_vm0, %v5215_v45 }
 0x5cf   :  { %1580 = vmatpush1.bf16.msra.mxu0 %v4543_v35  ;;  %3293 = vmatpush3.bf16.msra.mxu1 %v4287_v27 }
 0x5d0   :  { %1581 = vmatprep.subr.bf16.mxu0 %v4547_v0  ;;  %3294 = vmatprep.subr.bf16.mxu1 %v5215_v45 }
 0x5d3   :  { %1582 = vmatpush1.bf16.msra.mxu0 %v4551_v41  ;;  %3295 = vmatpush3.bf16.msra.mxu1 %v4292_v28 }
 0x5d4   :  { %1583 = vmatprep.subr.bf16.mxu0 %v4601_v60  ;;  %3296 = vmatprep.subr.bf16.mxu1 %v5215_v45 }
 0x5d7   :  { %1584 = vmatpush1.bf16.msra.mxu0 %v4605_v3  ;;  %3297 = vmatpush3.bf16.msra.mxu1 %v4297_v29 }
 0x5d8   :  { %1585 = vmatprep.subr.bf16.mxu0 %v4609_v47  ;;  %3298 = vmatprep.subr.bf16.mxu1 %v5215_v45 }
 0x5db   :  { %1586 = vmatpush1.bf16.msra.mxu0 %v4613_v58  ;;  %3299 = vmatpush3.bf16.msra.mxu1 %v4303_v30 }
 0x5dc   :  { %1587 = vmatprep.subr.bf16.mxu0 %v4617_v40  ;;  %3300 = vmatprep.subr.bf16.mxu1 %v5215_v45 }
 0x5df   :  { %1588 = vmatpush1.bf16.msra.mxu0 %v4621_v48  ;;  %3301 = vmatpush3.bf16.msra.mxu1 %v4307_v31 }
 0x5e0   :  { %1589 = vmatprep.subr.bf16.mxu0 %v4625_v57  ;;  %3302 = vmatprep.subr.bf16.mxu1 %v5215_v45 }
 0x5e3   :  { %1590 = vmatpush1.bf16.msra.mxu0 %v4629_v26  ;;  %3303 = vmatpush3.bf16.msra.mxu1 %v4311_v32 }
 0x5e4   :  { %1591 = vmatprep.subr.bf16.mxu0 %v4633_v46  ;;  %3304 = vmatprep.subr.bf16.mxu1 %v5215_v45 }
 0x5e7   :  { %1592 = vmatpush1.bf16.msra.mxu0 %v4681_v25  ;;  %3305 = vmatpush3.bf16.msra.mxu1 %v4315_v33 }
 0x5e8   :  { %1681 = vmatprep.subr.bf16.mxu0 %v4575_v55  ;;  %3310 = vmatprep.subr.bf16.mxu1 %v5215_v45 }
 0x69d   :  { %v1507_v27 = vpop.f32.mrb[36].mxu0  ;;  %v1548_v28 = vpop.f32.mrb[52].mxu1 }
 0x69e   :  { %v1554_v31 = vadd.f32 %v1507_v27, %v4388_v24  ;;  %v1509_v42 = vpop.f32.mrb[37].mxu0  ;;  %v3288_v32 = vpop.f32.mrb[53].mxu1  ;;  %v1568_v13 = vadd.f32 %v4437_v36, %v1548_v28  ;;  %v4738_v28 = vld [vmem:[#allocation7] ss:$12 sps:$4 sm:$0xff]  }
 0x69f   :  { %v1555_v19 = vadd.f32 %v1509_v42, %v4392_v54  ;;  %v1511_v61 = vpop.f32.mrb[38].mxu0  ;;  %v1551_v52 = vpop.f32.mrb[54].mxu1  ;;  %v4745_v42 = vld [vmem:[#allocation7 + $0x1c] ss:$12 sps:$4 sm:$0xff]   ;;  %v4748_v32 = vld [vmem:[#allocation7 + $0x18] ss:$12 sps:$4 sm:$0xff]  }
 0x6a0   :  { %v2898_v56 = vmul.f32 -1.442695, %v1554_v31  ;;  %v1512_v62 = vpop.f32.mrb[39].mxu0  ;;  %v3289_v2 = vpop.f32.mrb[55].mxu1  ;;  %v4740_v31 = vld [vmem:[#allocation7 + $0x8] ss:$12 sps:$4 sm:$0xff]  }
 0x6a1   :  { %v2899_v4 = vmul.f32 -1.442695, %v1555_v19  ;;  %v4750_v19 = vld [vmem:[#allocation7 + $0x20] ss:$12 sps:$4 sm:$0xff]   ;;  %v4758_v52 = vld [vmem:[#allocation7 + $0x30] ss:$12 sps:$4 sm:$0xff]  }
 0x6a2   :  { %3697 = vpow2.f32 %v2898_v56  ;;  %v4755_v61 = vld [vmem:[#allocation7 + $0x34] ss:$12 sps:$4 sm:$0xff]   ;;  %v4760_v56 = vld [vmem:[#allocation7 + $0x38] ss:$12 sps:$4 sm:$0xff]  }
 0x6a3   :  { %3699 = vpow2.f32 %v2899_v4  ;;  %v4765_v62 = vld [vmem:[#allocation7 + $0x4c] ss:$12 sps:$4 sm:$0xff]   ;;  %v4768_v2 = vld [vmem:[#allocation7 + $0x48] ss:$12 sps:$4 sm:$0xff]   ;;  %v4770_v4 = vld [vmem:[#allocation7 + $0x50] ss:$12 sps:$4 sm:$0xff]  }
 0x6ac   :  { %v3698_v33 = vpop.eup %3697 }
 0x6ad   :  { %v1562_v55 = vadd.f32 1.0, %v3698_v33  ;;  %v3700_v5 = vpop.eup %3699  ;;  %v4775_v33 = vld [vmem:[#allocation7 + $0x64] ss:$12 sps:$4 sm:$0xff]  }
 0x6ae   :  { %v1563_v10 = vadd.f32 1.0, %v3700_v5  ;;  %v4780_v5 = vld [vmem:[#allocation7 + $0x68] ss:$12 sps:$4 sm:$0xff]  }
 0x6af   :  { %3701 = vrcp.f32 %v1562_v55  ;;  %v4778_v55 = vld [vmem:[#allocation7 + $0x60] ss:$12 sps:$4 sm:$0xff]  }
 0x6b0   :  { %3703 = vrcp.f32 %v1563_v10  ;;  %v4782_v10 = vld [vmem:[#allocation7 + $0x7c] ss:$12 sps:$4 sm:$0xff]  }
 0x6b9   :  { %v3702_v24 = vpop.eup %3701 }
 0x6ba   :  { %v1569_v15 = vmul.f32 %v3702_v24, %v1568_v13  ;;  %v3704_v43 = vpop.eup %3703  ;;  %v4787_v13 = vld [vmem:[#allocation7 + $0x78] ss:$12 sps:$4 sm:$0xff]   ;;  %v4789_v24 = vld [vmem:[#allocation7 + $0x80] ss:$12 sps:$4 sm:$0xff]  }
 0x6bb   :  { %v1572_v44 = vsub.f32 1.0, %v3704_v43  ;;  %v1574_v53 = vmul.f32 %v3704_v43, %v4646_v23  ;;  %v4799_v43 = vld [vmem:[#allocation7 + $0x98] ss:$12 sps:$4 sm:$0xff]  }
 0x6bc   :  { %v1570_v54 = vadd.f32 %v1569_v15, %v4415_v49  ;;  %v3814_v49 = vld [vmem:[#allocation3 + $0x20] ss:$12 sps:$4 sm:$0xff]  }
 0x6bd   :  { %v4793_v15 = vld [vmem:[#allocation7 + $0x94] ss:$12 sps:$4 sm:$0xff]  }
 0x6be   :  { %3705 = vtanh.f32 %v1570_v54  ;;  %v4797_v54 = vld [vmem:[#allocation7 + $0x90] ss:$12 sps:$4 sm:$0xff]  }
 0x6c8   :  { %v3706_v50 = vpop.eup %3705 }
 0x6c9   :  { %v1573_v16 = vmul.f32 %v3706_v50, %v1572_v44  ;;  %v4803_v44 = vld [vmem:[#allocation7 + $0xac] ss:$12 sps:$4 sm:$0xff]   ;;  %v4807_v50 = vld [vmem:[#allocation7 + $0xa8] ss:$12 sps:$4 sm:$0xff]  }
 0x6cb   :  { %v4692_v51 = vadd.f32 %v1574_v53, %v1573_v16  ;;  %v4809_v16 = vld [vmem:[#allocation7 + $0xb0] ss:$12 sps:$4 sm:$0xff]  }
 0x6cd   :  { %v1576_v6 = vpack.c.bf16 %v4692_v51, %v4692_v51 }
 0x6cf   :  { %1610 = vmatmul.mubr.bf16.vlgmr.msra.gmra.mrb[40].mxu0 %v1576_v6  ;;  %3307 = vmatmul.mubr.bf16.vlgmr.msra.gmra.mrb[56].mxu1 %v1576_v6 }
 0x6d0   :  { %1682 = vmatpush1.bf16.msra.mxu0 %v4532_v9  ;;  %3311 = vmatpush3.bf16.msra.mxu1 %v3813_v22  ;;  %v3815_v9 = vld [vmem:[#allocation3 + $0x38] ss:$12 sps:$4 sm:$0xff]  }
 0x6d1   :  { %1683 = vmatprep.subr.bf16.mxu0 %v4536_v20  ;;  %3312 = vmatprep.subr.bf16.mxu1 %v5215_v45  ;;  %v3816_v20 = vld [vmem:[#allocation3 + $0x80] ss:$12 sps:$4 sm:$0xff]  }
 0x6d2   :  { %1713 = vmatprep.mubr.bf16.mxu0 %v5216_v17  ;;  %3326 = vmatprep.mubr.msk.bf16.mxu1 %vm3931_vm0, %v5215_v45 }
 0x6d4   :  { %1684 = vmatpush1.bf16.msra.mxu0 %v4543_v35  ;;  %3313 = vmatpush3.bf16.msra.mxu1 %v3814_v49 }
 0x6d5   :  { %1685 = vmatprep.subr.bf16.mxu0 %v4547_v0  ;;  %3314 = vmatprep.subr.bf16.mxu1 %v5215_v45 }
 0x6d8   :  { %1686 = vmatpush1.bf16.msra.mxu0 %v4551_v41  ;;  %3315 = vmatpush3.bf16.msra.mxu1 %v3815_v9  ;;  %v5217_v9 = vld [vmem:[#allocation26_spill] sm:$0xff] }
 0x6d9   :  { %1687 = vmatprep.subr.bf16.mxu0 %v4601_v60  ;;  %3316 = vmatprep.subr.bf16.mxu1 %v5215_v45 }
 0x6dc   :  { %1688 = vmatpush1.bf16.msra.mxu0 %v4605_v3  ;;  %3317 = vmatpush3.bf16.msra.mxu1 %v4297_v29  ;;  %v3817_v29 = vld [vmem:[#allocation3 + $0x98] ss:$12 sps:$4 sm:$0xff]  }
 0x6dd   :  { %1689 = vmatprep.subr.bf16.mxu0 %v4609_v47  ;;  %3318 = vmatprep.subr.bf16.mxu1 %v5215_v45 }
 0x6e0   :  { %1690 = vmatpush1.bf16.msra.mxu0 %v4613_v58  ;;  %3319 = vmatpush3.bf16.msra.mxu1 %v4303_v30  ;;  %v3818_v30 = vld [vmem:[#allocation3 + $0xb0] ss:$12 sps:$4 sm:$0xff]  }
 0x6e1   :  { %1691 = vmatprep.subr.bf16.mxu0 %v4617_v40  ;;  %3320 = vmatprep.subr.bf16.mxu1 %v5215_v45 }
 0x6e4   :  { %1692 = vmatpush1.bf16.msra.mxu0 %v4621_v48  ;;  %3321 = vmatpush3.bf16.msra.mxu1 %v3816_v20 }
 0x6e5   :  { %1693 = vmatprep.subr.bf16.mxu0 %v4625_v57  ;;  %3322 = vmatprep.subr.bf16.mxu1 %v5215_v45 }
 0x6e8   :  { %1694 = vmatpush1.bf16.msra.mxu0 %v4629_v26  ;;  %3323 = vmatpush3.bf16.msra.mxu1 %v3817_v29 }
 0x6e9   :  { %1695 = vmatprep.subr.bf16.mxu0 %v4633_v46  ;;  %3324 = vmatprep.subr.bf16.mxu1 %v5215_v45 }
 0x6ec   :  { %1696 = vmatpush1.bf16.msra.mxu0 %v4681_v25  ;;  %3325 = vmatpush3.bf16.msra.mxu1 %v3818_v30 }
 0x6ed   :  { %3330 = vmatprep.subr.bf16.mxu1 %v5215_v45 }
 0x7a2   :  { %v1611_v35 = vpop.f32.mrb[40].mxu0  ;;  %v1652_v0 = vpop.f32.mrb[56].mxu1 }
 0x7a3   :  { %v1658_v41 = vadd.f32 %v1611_v35, %v4394_v63  ;;  %v1613_v60 = vpop.f32.mrb[41].mxu0  ;;  %v3308_v3 = vpop.f32.mrb[57].mxu1  ;;  %v1672_v8 = vadd.f32 %v4437_v36, %v1652_v0 }
 0x7a4   :  { %v1659_v47 = vadd.f32 %v1613_v60, %v4397_v14  ;;  %v1615_v58 = vpop.f32.mrb[42].mxu0  ;;  %v1655_v40 = vpop.f32.mrb[58].mxu1 }
 0x7a5   :  { %v2900_v48 = vmul.f32 -1.442695, %v1658_v41  ;;  %v1616_v57 = vpop.f32.mrb[43].mxu0  ;;  %v3309_v26 = vpop.f32.mrb[59].mxu1 }
 0x7a6   :  { %v2901_v46 = vmul.f32 -1.442695, %v1659_v47  ;;  %v5218_v26 = vld [vmem:[#allocation27_spill] sm:$0xff] }
 0x7a7   :  { %3707 = vpow2.f32 %v2900_v48 }
 0x7a8   :  { %3709 = vpow2.f32 %v2901_v46 }
 0x7b1   :  { %v3708_v11 = vpop.eup %3707 }
 0x7b2   :  { %v1666_v18 = vadd.f32 1.0, %v3708_v11  ;;  %v3710_v7 = vpop.eup %3709 }
 0x7b3   :  { %v1667_v21 = vadd.f32 1.0, %v3710_v7 }
 0x7b4   :  { %3711 = vrcp.f32 %v1666_v18 }
 0x7b5   :  { %3713 = vrcp.f32 %v1667_v21 }
 0x7be   :  { %v3712_v63 = vpop.eup %3711 }
 0x7bf   :  { %v1673_v1 = vmul.f32 %v3712_v63, %v1672_v8  ;;  %v3714_v12 = vpop.eup %3713 }
 0x7c0   :  { %v1676_v34 = vsub.f32 1.0, %v3714_v12  ;;  %v1678_v59 = vmul.f32 %v3714_v12, %v4692_v51 }
 0x7c1   :  { %v1674_v14 = vadd.f32 %v1673_v1, %v4409_v37  ;;  %v4736_v37 = vld [vmem:[#allocation7 + $0x4] ss:$12 sps:$4 sm:$0xff]  }
 0x7c2   :  { %1913 = vmatprep.subr.bf16.mxu0 %v4736_v37 }
 0x7c3   :  { %3715 = vtanh.f32 %v1674_v14  ;;  %v5219_v14 = vld [vmem:[#allocation13_spill] sm:$0xff] }
 0x7c4   :  { %v5220_v12 = vsub.s32 0, %v5219_v14 }
 0x7cd   :  { %v3716_v38 = vpop.eup %3715 }
 0x7ce   :  { %v1677_v23 = vmul.f32 %v3716_v38, %v1676_v34  ;;  %v5221_v38 = vsub.s32 1, %v5219_v14 }
 0x7d0   :  { %v4729_v25 = vadd.f32 %v1678_v59, %v1677_v23  ;;  %v5222_v59 = vld [vmem:[#allocation14_spill] sm:$0xff] }
 0x7d2   :  { %v1680_v27 = vpack.c.bf16 %v4729_v25, %v4729_v25 }
 0x7d4   :  { %1714 = vmatmul.mubr.bf16.vlgmr.msra.gmra.mrb[44].mxu0 %v1680_v27  ;;  %3327 = vmatmul.mubr.bf16.vlgmr.msra.gmra.mrb[60].mxu1 %v1680_v27  ;;  %v5223_v27 = vld [vmem:[#allocation15_spill] sm:$0xff] }
 0x7d5   :  { %1945 = vmatprep.mubr.bf16.mxu0 %v5216_v17  ;;  %3346 = vmatprep.mubr.msk.bf16.mxu1 %vm3931_vm0, %v5215_v45 }
 0x7d6   :  { %1914 = vmatpush1.bf16.msra.mxu0 %v4738_v28  ;;  %3331 = vmatpush3.bf16.msra.mxu1 %v4740_v31 }
 0x7d7   :  { %3332 = vmatprep.subr.bf16.mxu1 %v5215_v45  ;;  %1915 = vmatprep.subr.bf16.mxu0 %v4745_v42 }
 0x7da   :  { %1916 = vmatpush1.bf16.msra.mxu0 %v4748_v32  ;;  %3333 = vmatpush3.bf16.msra.mxu1 %v4750_v19 }
 0x7db   :  { %3334 = vmatprep.subr.bf16.mxu1 %v5215_v45  ;;  %1917 = vmatprep.subr.bf16.mxu0 %v4755_v61 }
 0x7de   :  { %1918 = vmatpush1.bf16.msra.mxu0 %v4758_v52  ;;  %3335 = vmatpush3.bf16.msra.mxu1 %v4760_v56 }
 0x7df   :  { %3336 = vmatprep.subr.bf16.mxu1 %v5215_v45  ;;  %1919 = vmatprep.subr.bf16.mxu0 %v4765_v62 }
 0x7e2   :  { %1920 = vmatpush1.bf16.msra.mxu0 %v4768_v2  ;;  %3337 = vmatpush3.bf16.msra.mxu1 %v4770_v4 }
 0x7e3   :  { %3338 = vmatprep.subr.bf16.mxu1 %v5215_v45  ;;  %1921 = vmatprep.subr.bf16.mxu0 %v4775_v33 }
 0x7e6   :  { %1922 = vmatpush1.bf16.msra.mxu0 %v4778_v55  ;;  %3339 = vmatpush3.bf16.msra.mxu1 %v4780_v5 }
 0x7e7   :  { %1923 = vmatprep.subr.bf16.mxu0 %v4782_v10  ;;  %3340 = vmatprep.subr.bf16.mxu1 %v5215_v45 }
 0x7ea   :  { %1924 = vmatpush1.bf16.msra.mxu0 %v4787_v13  ;;  %3341 = vmatpush3.bf16.msra.mxu1 %v4789_v24 }
 0x7eb   :  { %1925 = vmatprep.subr.bf16.mxu0 %v4793_v15  ;;  %3342 = vmatprep.subr.bf16.mxu1 %v5215_v45 }
 0x7ee   :  { %1926 = vmatpush1.bf16.msra.mxu0 %v4797_v54  ;;  %3343 = vmatpush3.bf16.msra.mxu1 %v4799_v43 }
 0x7ef   :  { %1927 = vmatprep.subr.bf16.mxu0 %v4803_v44  ;;  %3344 = vmatprep.subr.bf16.mxu1 %v5215_v45 }
 0x7f2   :  { %1928 = vmatpush1.bf16.msra.mxu0 %v4807_v50  ;;  %3345 = vmatpush3.bf16.msra.mxu1 %v4809_v16 }
 0x7f3   :  { %2018 = vmatprep.subr.bf16.mxu0 %v4736_v37  ;;  %3350 = vmatprep.subr.bf16.mxu1 %v5215_v45 }
 0x8a7   :  { %v1715_v53 = vpop.f32.mrb[44].mxu0  ;;  %v1756_v51 = vpop.f32.mrb[60].mxu1 }
 0x8a8   :  { %v1762_v6 = vadd.f32 %v1715_v53, %v4399_v39  ;;  %v1717_v22 = vpop.f32.mrb[45].mxu0  ;;  %v3328_v49 = vpop.f32.mrb[61].mxu1  ;;  %v1776_v48 = vadd.f32 %v4437_v36, %v1756_v51  ;;  %v3819_v36 = vld [vmem:[%s5180_s8] sm:$0x7] }
 0x8a9   :  { %v1763_v20 = vadd.f32 %v1717_v22, %v5217_v9  ;;  %v1719_v29 = vpop.f32.mrb[46].mxu0  ;;  %v1759_v30 = vpop.f32.mrb[62].mxu1  ;;  %v4866_v34 = vrot.slane %v3819_v36, %v5220_v12  ;;  %v4870_v23 = vrot.slane %v3819_v36, %v5221_v38  ;;  %v5226_v38 = vld [vmem:[#allocation17_spill] sm:$0xff] }
 0x8aa   :  { %v2902_v35 = vmul.f32 -1.442695, %v1762_v6  ;;  %v1720_v0 = vpop.f32.mrb[47].mxu0  ;;  %v3329_v41 = vpop.f32.mrb[63].mxu1 }
 0x8ab   :  { %v2903_v60 = vmul.f32 -1.442695, %v1763_v20  ;;  %v649_v53 = vadd.f32 %v5223_v27, %v4870_v23 }
 0x8ac   :  { %3717 = vpow2.f32 %v2902_v35 }
 0x8ad   :  { %3719 = vpow2.f32 %v2903_v60 }
 0x8b6   :  { %v3718_v3 = vpop.eup %3717 }
 0x8b7   :  { %v1770_v47 = vadd.f32 1.0, %v3718_v3  ;;  %v3720_v58 = vpop.eup %3719 }
 0x8b8   :  { %v1771_v40 = vadd.f32 1.0, %v3720_v58 }
 0x8b9   :  { %3721 = vrcp.f32 %v1770_v47 }
 0x8ba   :  { %3723 = vrcp.f32 %v1771_v40  ;;  %v4879_v40 = vld [vmem:[%s5181_s9] ss:$0 sm:$0xff] }
 0x8c3   :  { %v3722_v39 = vpop.eup %3721 }
 0x8c4   :  { %v1777_v57 = vmul.f32 %v3722_v39, %v1776_v48  ;;  %v3724_v11 = vpop.eup %3723 }
 0x8c5   :  { %v1780_v18 = vsub.f32 1.0, %v3724_v11  ;;  %v1782_v8 = vmul.f32 %v3724_v11, %v4729_v25  ;;  %v647_v25 = vadd.f32 %v5222_v59, %v4866_v34  ;;  %v653_v59 = vadd.f32 %v5226_v38, %v4870_v23 }
 0x8c6   :  { %v1778_v46 = vadd.f32 %v1777_v57, %v5218_v26 }
 0x8c8   :  { %3725 = vtanh.f32 %v1778_v46  ;;  %v5224_v46 = vld [vmem:[#allocation29_spill] sm:$0xff] }
 0x8d2   :  { %v3726_v7 = vpop.eup %3725 }
 0x8d3   :  { %v1781_v21 = vmul.f32 %v3726_v7, %v1780_v18 }
 0x8d5   :  { %v4822_v63 = vadd.f32 %v1782_v8, %v1781_v21 }
 0x8d7   :  { %v1784_v1 = vpack.c.bf16 %v4822_v63, %v4822_v63 }
 0x8d9   :  { %1946 = vmatmul.mubr.bf16.vlgmr.msra.gmra.mrb[48].mxu0 %v1784_v1  ;;  %3347 = vmatmul.mubr.bf16.vlgmr.msra.gmra.mrb[64].mxu1 %v1784_v1 }
 0x8da   :  { %2019 = vmatpush1.bf16.msra.mxu0 %v4738_v28  ;;  %3351 = vmatpush3.bf16.msra.mxu1 %v4740_v31 }
 0x8db   :  { %2020 = vmatprep.subr.bf16.mxu0 %v4745_v42  ;;  %3352 = vmatprep.subr.bf16.mxu1 %v5215_v45 }
 0x8dc   :  { %2050 = vmatprep.mubr.bf16.mxu0 %v5216_v17  ;;  %3366 = vmatprep.mubr.msk.bf16.mxu1 %vm3931_vm0, %v5215_v45 }
 0x8de   :  { %2021 = vmatpush1.bf16.msra.mxu0 %v4748_v32  ;;  %3353 = vmatpush3.bf16.msra.mxu1 %v4750_v19 }
 0x8df   :  { %2022 = vmatprep.subr.bf16.mxu0 %v4755_v61  ;;  %3354 = vmatprep.subr.bf16.mxu1 %v5215_v45 }
 0x8e2   :  { %2023 = vmatpush1.bf16.msra.mxu0 %v4758_v52  ;;  %3355 = vmatpush3.bf16.msra.mxu1 %v4760_v56 }
 0x8e3   :  { %2024 = vmatprep.subr.bf16.mxu0 %v4765_v62  ;;  %3356 = vmatprep.subr.bf16.mxu1 %v5215_v45 }
 0x8e6   :  { %2025 = vmatpush1.bf16.msra.mxu0 %v4768_v2  ;;  %3357 = vmatpush3.bf16.msra.mxu1 %v4770_v4 }
 0x8e7   :  { %2026 = vmatprep.subr.bf16.mxu0 %v4775_v33  ;;  %3358 = vmatprep.subr.bf16.mxu1 %v5215_v45 }
 0x8ea   :  { %2027 = vmatpush1.bf16.msra.mxu0 %v4778_v55  ;;  %3359 = vmatpush3.bf16.msra.mxu1 %v4780_v5 }
 0x8eb   :  { %2028 = vmatprep.subr.bf16.mxu0 %v4782_v10  ;;  %3360 = vmatprep.subr.bf16.mxu1 %v5215_v45 }
 0x8ee   :  { %2029 = vmatpush1.bf16.msra.mxu0 %v4787_v13  ;;  %3361 = vmatpush3.bf16.msra.mxu1 %v4789_v24 }
 0x8ef   :  { %2030 = vmatprep.subr.bf16.mxu0 %v4793_v15  ;;  %3362 = vmatprep.subr.bf16.mxu1 %v5215_v45 }
 0x8f2   :  { %2031 = vmatpush1.bf16.msra.mxu0 %v4797_v54  ;;  %3363 = vmatpush3.bf16.msra.mxu1 %v4799_v43 }
 0x8f3   :  { %2032 = vmatprep.subr.bf16.mxu0 %v4803_v44  ;;  %3364 = vmatprep.subr.bf16.mxu1 %v5215_v45 }
 0x8f6   :  { %2033 = vmatpush1.bf16.msra.mxu0 %v4807_v50  ;;  %3365 = vmatpush3.bf16.msra.mxu1 %v4809_v16 }
 0x8f7   :  { %2123 = vmatprep.subr.bf16.mxu0 %v4736_v37  ;;  %3370 = vmatprep.subr.bf16.mxu1 %v5215_v45 }
 0x9ac   :  { %v1947_v51 = vpop.f32.mrb[48].mxu0  ;;  %v1988_v6 = vpop.f32.mrb[64].mxu1 }
 0x9ad   :  { %v1994_v22 = vadd.f32 %v1947_v51, %v647_v25  ;;  %v1949_v49 = vpop.f32.mrb[49].mxu0  ;;  %v3348_v9 = vpop.f32.mrb[65].mxu1  ;;  %v2008_v39 = vadd.f32 %v4879_v40, %v1988_v6 }
 0x9ae   :  { %v1995_v20 = vadd.f32 %v1949_v49, %v649_v53  ;;  %v1951_v29 = vpop.f32.mrb[50].mxu0  ;;  %v1991_v30 = vpop.f32.mrb[66].mxu1 }
 0x9af   :  { %v2928_v35 = vmul.f32 -1.442695, %v1994_v22  ;;  %v1952_v0 = vpop.f32.mrb[51].mxu0  ;;  %v3349_v41 = vpop.f32.mrb[67].mxu1 }
 0x9b0   :  { %v2929_v60 = vmul.f32 -1.442695, %v1995_v20 }
 0x9b1   :  { %3727 = vpow2.f32 %v2928_v35 }
 0x9b2   :  { %3729 = vpow2.f32 %v2929_v60 }
 0x9bb   :  { %v3728_v3 = vpop.eup %3727 }
 0x9bc   :  { %v2002_v47 = vadd.f32 1.0, %v3728_v3  ;;  %v3730_v58 = vpop.eup %3729 }
 0x9bd   :  { %v2003_v48 = vadd.f32 1.0, %v3730_v58 }
 0x9be   :  { %3731 = vrcp.f32 %v2002_v47 }
 0x9bf   :  { %3733 = vrcp.f32 %v2003_v48 }
 0x9c8   :  { %v3732_v57 = vpop.eup %3731 }
 0x9c9   :  { %v2009_v26 = vmul.f32 %v3732_v57, %v2008_v39  ;;  %v3734_v18 = vpop.eup %3733  ;;  %v5227_v39 = vld [vmem:[#allocation31_spill] sm:$0xff] }
 0x9ca   :  { %v2012_v7 = vsub.f32 1.0, %v3734_v18  ;;  %v2014_v1 = vmul.f32 %v3734_v18, %v4822_v63  ;;  %v5225_v63 = vld [vmem:[#allocation16_spill] sm:$0xff] }
 0x9cb   :  { %v2010_v11 = vadd.f32 %v2009_v26, %v5224_v46  ;;  %v651_v12 = vadd.f32 %v5225_v63, %v4866_v34  ;;  %v5229_v63 = vld [vmem:[#allocation19_spill] sm:$0xff] }
 0x9cd   :  { %3735 = vtanh.f32 %v2010_v11 }
 0x9d7   :  { %v3736_v21 = vpop.eup %3735 }
 0x9d8   :  { %v2013_v8 = vmul.f32 %v3736_v21, %v2012_v7 }
 0x9da   :  { %v4884_v36 = vadd.f32 %v2014_v1, %v2013_v8  ;;  %v5228_v1 = vld [vmem:[#allocation18_spill] sm:$0xff] }
 0x9dc   :  { %v2017_v14 = vpack.c.bf16 %v4884_v36, %v4884_v36 }
 0x9de   :  { %2051 = vmatmul.mubr.bf16.vlgmr.msra.gmra.mrb[52].mxu0 %v2017_v14  ;;  %3367 = vmatmul.mubr.bf16.vlgmr.msra.gmra.mrb[68].mxu1 %v2017_v14  ;;  %v657_v14 = vadd.f32 %v5228_v1, %v4866_v34 }
 0x9df   :  { %2124 = vmatpush1.bf16.msra.mxu0 %v4738_v28  ;;  %3371 = vmatpush3.bf16.msra.mxu1 %v4740_v31 }
 0x9e0   :  { %2125 = vmatprep.subr.bf16.mxu0 %v4745_v42  ;;  %3372 = vmatprep.subr.bf16.mxu1 %v5215_v45 }
 0x9e1   :  { %2155 = vmatprep.mubr.bf16.mxu0 %v5216_v17  ;;  %3386 = vmatprep.mubr.msk.bf16.mxu1 %vm3931_vm0, %v5215_v45 }
 0x9e3   :  { %2126 = vmatpush1.bf16.msra.mxu0 %v4748_v32  ;;  %3373 = vmatpush3.bf16.msra.mxu1 %v4750_v19 }
 0x9e4   :  { %2127 = vmatprep.subr.bf16.mxu0 %v4755_v61  ;;  %3374 = vmatprep.subr.bf16.mxu1 %v5215_v45 }
 0x9e7   :  { %2128 = vmatpush1.bf16.msra.mxu0 %v4758_v52  ;;  %3375 = vmatpush3.bf16.msra.mxu1 %v4760_v56 }
 0x9e8   :  { %2129 = vmatprep.subr.bf16.mxu0 %v4765_v62  ;;  %3376 = vmatprep.subr.bf16.mxu1 %v5215_v45 }
 0x9eb   :  { %2130 = vmatpush1.bf16.msra.mxu0 %v4768_v2  ;;  %3377 = vmatpush3.bf16.msra.mxu1 %v4770_v4 }
 0x9ec   :  { %2131 = vmatprep.subr.bf16.mxu0 %v4775_v33  ;;  %3378 = vmatprep.subr.bf16.mxu1 %v5215_v45 }
 0x9ef   :  { %2132 = vmatpush1.bf16.msra.mxu0 %v4778_v55  ;;  %3379 = vmatpush3.bf16.msra.mxu1 %v4780_v5 }
 0x9f0   :  { %2133 = vmatprep.subr.bf16.mxu0 %v4782_v10  ;;  %3380 = vmatprep.subr.bf16.mxu1 %v5215_v45 }
 0x9f3   :  { %2134 = vmatpush1.bf16.msra.mxu0 %v4787_v13  ;;  %3381 = vmatpush3.bf16.msra.mxu1 %v4789_v24 }
 0x9f4   :  { %2135 = vmatprep.subr.bf16.mxu0 %v4793_v15  ;;  %3382 = vmatprep.subr.bf16.mxu1 %v5215_v45 }
 0x9f7   :  { %2136 = vmatpush1.bf16.msra.mxu0 %v4797_v54  ;;  %3383 = vmatpush3.bf16.msra.mxu1 %v4799_v43 }
 0x9f8   :  { %2137 = vmatprep.subr.bf16.mxu0 %v4803_v44  ;;  %3384 = vmatprep.subr.bf16.mxu1 %v5215_v45 }
 0x9fb   :  { %2138 = vmatpush1.bf16.msra.mxu0 %v4807_v50  ;;  %3385 = vmatpush3.bf16.msra.mxu1 %v4809_v16 }
 0x9fc   :  { %2228 = vmatprep.subr.bf16.mxu0 %v4736_v37  ;;  %3390 = vmatprep.subr.bf16.mxu1 %v5215_v45 }
 0xab1   :  { %v2052_v25 = vpop.f32.mrb[52].mxu0  ;;  %v2093_v27 = vpop.f32.mrb[68].mxu1 }
 0xab2   :  { %v2099_v53 = vadd.f32 %v2052_v25, %v651_v12  ;;  %v2054_v51 = vpop.f32.mrb[53].mxu0  ;;  %v3368_v6 = vpop.f32.mrb[69].mxu1  ;;  %v2113_v47 = vadd.f32 %v4879_v40, %v2093_v27  ;;  %v659_v12 = vadd.f32 %v5229_v63, %v4870_v23 }
 0xab3   :  { %v2100_v22 = vadd.f32 %v2054_v51, %v653_v59  ;;  %v2056_v49 = vpop.f32.mrb[54].mxu0  ;;  %v2096_v9 = vpop.f32.mrb[70].mxu1 }
 0xab4   :  { %v2930_v20 = vmul.f32 -1.442695, %v2099_v53  ;;  %v2057_v29 = vpop.f32.mrb[55].mxu0  ;;  %v3369_v30 = vpop.f32.mrb[71].mxu1 }
 0xab5   :  { %v2931_v35 = vmul.f32 -1.442695, %v2100_v22 }
 0xab6   :  { %3737 = vpow2.f32 %v2930_v20 }
 0xab7   :  { %3739 = vpow2.f32 %v2931_v35 }
 0xac0   :  { %v3738_v0 = vpop.eup %3737 }
 0xac1   :  { %v2107_v41 = vadd.f32 1.0, %v3738_v0  ;;  %v3740_v60 = vpop.eup %3739 }
 0xac2   :  { %v2108_v3 = vadd.f32 1.0, %v3740_v60 }
 0xac3   :  { %3741 = vrcp.f32 %v2107_v41 }
 0xac4   :  { %3743 = vrcp.f32 %v2108_v3 }
 0xacd   :  { %v3742_v58 = vpop.eup %3741 }
 0xace   :  { %v2114_v48 = vmul.f32 %v3742_v58, %v2113_v47  ;;  %v3744_v26 = vpop.eup %3743  ;;  %v5230_v58 = vld [vmem:[#allocation28_spill] sm:$0xff] }
 0xacf   :  { %v2117_v46 = vsub.f32 1.0, %v3744_v26  ;;  %v2119_v7 = vmul.f32 %v3744_v26, %v4884_v36 }
 0xad0   :  { %v2115_v57 = vadd.f32 %v2114_v48, %v5227_v39 }
 0xad2   :  { %3745 = vtanh.f32 %v2115_v57 }
 0xadc   :  { %v3746_v11 = vpop.eup %3745 }
 0xadd   :  { %v2118_v18 = vmul.f32 %v3746_v11, %v2117_v46 }
 0xadf   :  { %v4930_v21 = vadd.f32 %v2119_v7, %v2118_v18 }
 0xae1   :  { %v2122_v8 = vpack.c.bf16 %v4930_v21, %v4930_v21 }
 0xae3   :  { %2156 = vmatmul.mubr.bf16.vlgmr.msra.gmra.mrb[56].mxu0 %v2122_v8  ;;  %3387 = vmatmul.mubr.bf16.vlgmr.msra.gmra.mrb[72].mxu1 %v2122_v8  ;;  %v5231_v8 = vld [vmem:[#allocation20_spill] sm:$0xff] }
 0xae4   :  { %2229 = vmatpush1.bf16.msra.mxu0 %v4738_v28  ;;  %3391 = vmatpush3.bf16.msra.mxu1 %v4740_v31  ;;  %v661_v1 = vadd.f32 %v5231_v8, %v4866_v34  ;;  %v5234_v8 = vld [vmem:[#allocation22_spill] sm:$0xff] }
 0xae5   :  { %2230 = vmatprep.subr.bf16.mxu0 %v4745_v42  ;;  %3392 = vmatprep.subr.bf16.mxu1 %v5215_v45 }
 0xae6   :  { %2260 = vmatprep.mubr.bf16.mxu0 %v5216_v17  ;;  %3406 = vmatprep.mubr.msk.bf16.mxu1 %vm3931_vm0, %v5215_v45 }
 0xae8   :  { %2231 = vmatpush1.bf16.msra.mxu0 %v4748_v32  ;;  %3393 = vmatpush3.bf16.msra.mxu1 %v4750_v19 }
 0xae9   :  { %2232 = vmatprep.subr.bf16.mxu0 %v4755_v61  ;;  %3394 = vmatprep.subr.bf16.mxu1 %v5215_v45 }
 0xaec   :  { %2233 = vmatpush1.bf16.msra.mxu0 %v4758_v52  ;;  %3395 = vmatpush3.bf16.msra.mxu1 %v4760_v56 }
 0xaed   :  { %2234 = vmatprep.subr.bf16.mxu0 %v4765_v62  ;;  %3396 = vmatprep.subr.bf16.mxu1 %v5215_v45 }
 0xaf0   :  { %2235 = vmatpush1.bf16.msra.mxu0 %v4768_v2  ;;  %3397 = vmatpush3.bf16.msra.mxu1 %v4770_v4 }
 0xaf1   :  { %2236 = vmatprep.subr.bf16.mxu0 %v4775_v33  ;;  %3398 = vmatprep.subr.bf16.mxu1 %v5215_v45 }
 0xaf4   :  { %2237 = vmatpush1.bf16.msra.mxu0 %v4778_v55  ;;  %3399 = vmatpush3.bf16.msra.mxu1 %v4780_v5 }
 0xaf5   :  { %2238 = vmatprep.subr.bf16.mxu0 %v4782_v10  ;;  %3400 = vmatprep.subr.bf16.mxu1 %v5215_v45 }
 0xaf8   :  { %2239 = vmatpush1.bf16.msra.mxu0 %v4787_v13  ;;  %3401 = vmatpush3.bf16.msra.mxu1 %v4789_v24 }
 0xaf9   :  { %2240 = vmatprep.subr.bf16.mxu0 %v4793_v15  ;;  %3402 = vmatprep.subr.bf16.mxu1 %v5215_v45 }
 0xafc   :  { %2241 = vmatpush1.bf16.msra.mxu0 %v4797_v54  ;;  %3403 = vmatpush3.bf16.msra.mxu1 %v4799_v43 }
 0xafd   :  { %2242 = vmatprep.subr.bf16.mxu0 %v4803_v44  ;;  %3404 = vmatprep.subr.bf16.mxu1 %v5215_v45 }
 0xb00   :  { %2243 = vmatpush1.bf16.msra.mxu0 %v4807_v50  ;;  %3405 = vmatpush3.bf16.msra.mxu1 %v4809_v16 }
 0xb01   :  { %2333 = vmatprep.subr.bf16.mxu0 %v4736_v37  ;;  %3410 = vmatprep.subr.bf16.mxu1 %v5215_v45 }
 0xbb6   :  { %v2157_v38 = vpop.f32.mrb[56].mxu0  ;;  %v2198_v59 = vpop.f32.mrb[72].mxu1 }
 0xbb7   :  { %v2204_v25 = vadd.f32 %v2157_v38, %v657_v14  ;;  %v2159_v27 = vpop.f32.mrb[57].mxu0  ;;  %v3388_v53 = vpop.f32.mrb[73].mxu1  ;;  %v2218_v60 = vadd.f32 %v4879_v40, %v2198_v59  ;;  %v5232_v14 = vld [vmem:[#allocation21_spill] sm:$0xff] }
 0xbb8   :  { %v2205_v51 = vadd.f32 %v2159_v27, %v659_v12  ;;  %v2161_v6 = vpop.f32.mrb[58].mxu0  ;;  %v2201_v22 = vpop.f32.mrb[74].mxu1  ;;  %v663_v63 = vadd.f32 %v5232_v14, %v4870_v23  ;;  %v5235_v14 = vld [vmem:[#allocation23_spill] sm:$0xff] }
 0xbb9   :  { %v2932_v49 = vmul.f32 -1.442695, %v2204_v25  ;;  %v2162_v9 = vpop.f32.mrb[59].mxu0  ;;  %v3389_v20 = vpop.f32.mrb[75].mxu1 }
 0xbba   :  { %v2933_v29 = vmul.f32 -1.442695, %v2205_v51 }
 0xbbb   :  { %3747 = vpow2.f32 %v2932_v49 }
 0xbbc   :  { %3749 = vpow2.f32 %v2933_v29 }
 0xbc5   :  { %v3748_v30 = vpop.eup %3747 }
 0xbc6   :  { %v2212_v35 = vadd.f32 1.0, %v3748_v30  ;;  %v3750_v0 = vpop.eup %3749 }
 0xbc7   :  { %v2213_v41 = vadd.f32 1.0, %v3750_v0 }
 0xbc8   :  { %3751 = vrcp.f32 %v2212_v35 }
 0xbc9   :  { %3753 = vrcp.f32 %v2213_v41 }
 0xbd2   :  { %v3752_v3 = vpop.eup %3751 }
 0xbd3   :  { %v2219_v47 = vmul.f32 %v3752_v3, %v2218_v60  ;;  %v3754_v39 = vpop.eup %3753 }
 0xbd4   :  { %v2222_v57 = vsub.f32 1.0, %v3754_v39  ;;  %v2224_v11 = vmul.f32 %v3754_v39, %v4930_v21 }
 0xbd5   :  { %v2220_v48 = vadd.f32 %v2219_v47, %v5230_v58  ;;  %v5233_v47 = vld [vmem:[#allocation30_spill] sm:$0xff] }
 0xbd7   :  { %3755 = vtanh.f32 %v2220_v48 }
 0xbe1   :  { %v3756_v26 = vpop.eup %3755 }
 0xbe2   :  { %v2223_v46 = vmul.f32 %v3756_v26, %v2222_v57 }
 0xbe4   :  { %v4976_v18 = vadd.f32 %v2224_v11, %v2223_v46 }
 0xbe6   :  { %v2227_v7 = vpack.c.bf16 %v4976_v18, %v4976_v18 }
 0xbe8   :  { %2261 = vmatmul.mubr.bf16.vlgmr.msra.gmra.mrb[60].mxu0 %v2227_v7  ;;  %3407 = vmatmul.mubr.bf16.vlgmr.msra.gmra.mrb[76].mxu1 %v2227_v7 }
 0xbe9   :  { %2334 = vmatpush1.bf16.msra.mxu0 %v4738_v28  ;;  %3411 = vmatpush3.bf16.msra.mxu1 %v4740_v31 }
 0xbea   :  { %2335 = vmatprep.subr.bf16.mxu0 %v4745_v42  ;;  %3412 = vmatprep.subr.bf16.mxu1 %v5215_v45 }
 0xbeb   :  { %2365 = vmatprep.mubr.bf16.mxu0 %v5216_v17  ;;  %3426 = vmatprep.mubr.msk.bf16.mxu1 %vm3931_vm0, %v5215_v45 }
 0xbed   :  { %2336 = vmatpush1.bf16.msra.mxu0 %v4748_v32  ;;  %3413 = vmatpush3.bf16.msra.mxu1 %v4750_v19 }
 0xbee   :  { %2337 = vmatprep.subr.bf16.mxu0 %v4755_v61  ;;  %3414 = vmatprep.subr.bf16.mxu1 %v5215_v45 }
 0xbf1   :  { %2338 = vmatpush1.bf16.msra.mxu0 %v4758_v52  ;;  %3415 = vmatpush3.bf16.msra.mxu1 %v4760_v56 }
 0xbf2   :  { %2339 = vmatprep.subr.bf16.mxu0 %v4765_v62  ;;  %3416 = vmatprep.subr.bf16.mxu1 %v5215_v45 }
 0xbf5   :  { %2340 = vmatpush1.bf16.msra.mxu0 %v4768_v2  ;;  %3417 = vmatpush3.bf16.msra.mxu1 %v4770_v4 }
 0xbf6   :  { %2341 = vmatprep.subr.bf16.mxu0 %v4775_v33  ;;  %3418 = vmatprep.subr.bf16.mxu1 %v5215_v45 }
 0xbf9   :  { %2342 = vmatpush1.bf16.msra.mxu0 %v4778_v55  ;;  %3419 = vmatpush3.bf16.msra.mxu1 %v4780_v5 }
 0xbfa   :  { %2343 = vmatprep.subr.bf16.mxu0 %v4782_v10  ;;  %3420 = vmatprep.subr.bf16.mxu1 %v5215_v45 }
 0xbfd   :  { %2344 = vmatpush1.bf16.msra.mxu0 %v4787_v13  ;;  %3421 = vmatpush3.bf16.msra.mxu1 %v4789_v24 }
 0xbfe   :  { %2345 = vmatprep.subr.bf16.mxu0 %v4793_v15  ;;  %3422 = vmatprep.subr.bf16.mxu1 %v5215_v45 }
 0xc01   :  { %2346 = vmatpush1.bf16.msra.mxu0 %v4797_v54  ;;  %3423 = vmatpush3.bf16.msra.mxu1 %v4799_v43 }
 0xc02   :  { %2347 = vmatprep.subr.bf16.mxu0 %v4803_v44  ;;  %3424 = vmatprep.subr.bf16.mxu1 %v5215_v45 }
 0xc05   :  { %2348 = vmatpush1.bf16.msra.mxu0 %v4807_v50  ;;  %3425 = vmatpush3.bf16.msra.mxu1 %v4809_v16 }
 0xc06   :  { %2438 = vmatprep.subr.bf16.mxu0 %v4736_v37  ;;  %3430 = vmatprep.subr.bf16.mxu1 %v5215_v45 }
 0xcbb   :  { %v2262_v12 = vpop.f32.mrb[60].mxu0  ;;  %v2303_v38 = vpop.f32.mrb[76].mxu1 }
 0xcbc   :  { %v2309_v59 = vadd.f32 %v2262_v12, %v661_v1  ;;  %v2264_v25 = vpop.f32.mrb[61].mxu0  ;;  %v3408_v27 = vpop.f32.mrb[77].mxu1  ;;  %v2323_v41 = vadd.f32 %v4879_v40, %v2303_v38  ;;  %v667_v1 = vadd.f32 %v5234_v8, %v4866_v34 }
 0xcbd   :  { %v2310_v53 = vadd.f32 %v2264_v25, %v663_v63  ;;  %v2266_v51 = vpop.f32.mrb[62].mxu0  ;;  %v2306_v6 = vpop.f32.mrb[78].mxu1  ;;  %v669_v63 = vadd.f32 %v5235_v14, %v4870_v23 }
 0xcbe   :  { %v2934_v22 = vmul.f32 -1.442695, %v2309_v59  ;;  %v2267_v49 = vpop.f32.mrb[63].mxu0  ;;  %v3409_v9 = vpop.f32.mrb[79].mxu1 }
 0xcbf   :  { %v2935_v20 = vmul.f32 -1.442695, %v2310_v53 }
 0xcc0   :  { %3757 = vpow2.f32 %v2934_v22 }
 0xcc1   :  { %3759 = vpow2.f32 %v2935_v20 }
 0xcca   :  { %v3758_v29 = vpop.eup %3757 }
 0xccb   :  { %v2317_v30 = vadd.f32 1.0, %v3758_v29  ;;  %v3760_v35 = vpop.eup %3759 }
 0xccc   :  { %v2318_v0 = vadd.f32 1.0, %v3760_v35 }
 0xccd   :  { %3761 = vrcp.f32 %v2317_v30 }
 0xcce   :  { %3763 = vrcp.f32 %v2318_v0 }
 0xcd7   :  { %v3762_v60 = vpop.eup %3761 }
 0xcd8   :  { %v2324_v3 = vmul.f32 %v3762_v60, %v2323_v41  ;;  %v3764_v48 = vpop.eup %3763 }
 0xcd9   :  { %v2327_v39 = vsub.f32 1.0, %v3764_v48  ;;  %v2329_v46 = vmul.f32 %v3764_v48, %v4976_v18 }
 0xcda   :  { %v2325_v58 = vadd.f32 %v2324_v3, %v5233_v47  ;;  %v5236_v3 = vld [vmem:[#allocation33_spill] sm:$0xff] }
 0xcdc   :  { %3765 = vtanh.f32 %v2325_v58 }
 0xce6   :  { %v3766_v57 = vpop.eup %3765 }
 0xce7   :  { %v2328_v26 = vmul.f32 %v3766_v57, %v2327_v39 }
 0xce9   :  { %v5022_v11 = vadd.f32 %v2329_v46, %v2328_v26 }
 0xceb   :  { %v2332_v7 = vpack.c.bf16 %v5022_v11, %v5022_v11 }
 0xced   :  { %2366 = vmatmul.mubr.bf16.vlgmr.msra.gmra.mrb[64].mxu0 %v2332_v7  ;;  %3427 = vmatmul.mubr.bf16.vlgmr.msra.gmra.mrb[80].mxu1 %v2332_v7 }
 0xcee   :  { %2439 = vmatpush1.bf16.msra.mxu0 %v4738_v28  ;;  %3431 = vmatpush3.bf16.msra.mxu1 %v4740_v31 }
 0xcef   :  { %2440 = vmatprep.subr.bf16.mxu0 %v4745_v42  ;;  %3432 = vmatprep.subr.bf16.mxu1 %v5215_v45 }
 0xcf0   :  { %2470 = vmatprep.mubr.bf16.mxu0 %v5216_v17  ;;  %3446 = vmatprep.mubr.msk.bf16.mxu1 %vm3931_vm0, %v5215_v45 }
 0xcf2   :  { %2441 = vmatpush1.bf16.msra.mxu0 %v4748_v32  ;;  %3433 = vmatpush3.bf16.msra.mxu1 %v4750_v19 }
 0xcf3   :  { %2442 = vmatprep.subr.bf16.mxu0 %v4755_v61  ;;  %3434 = vmatprep.subr.bf16.mxu1 %v5215_v45 }
 0xcf6   :  { %2443 = vmatpush1.bf16.msra.mxu0 %v4758_v52  ;;  %3435 = vmatpush3.bf16.msra.mxu1 %v4760_v56 }
 0xcf7   :  { %2444 = vmatprep.subr.bf16.mxu0 %v4765_v62  ;;  %3436 = vmatprep.subr.bf16.mxu1 %v5215_v45 }
 0xcfa   :  { %2445 = vmatpush1.bf16.msra.mxu0 %v4768_v2  ;;  %3437 = vmatpush3.bf16.msra.mxu1 %v4770_v4 }
 0xcfb   :  { %2446 = vmatprep.subr.bf16.mxu0 %v4775_v33  ;;  %3438 = vmatprep.subr.bf16.mxu1 %v5215_v45 }
 0xcfe   :  { %2447 = vmatpush1.bf16.msra.mxu0 %v4778_v55  ;;  %3439 = vmatpush3.bf16.msra.mxu1 %v4780_v5 }
 0xcff   :  { %2448 = vmatprep.subr.bf16.mxu0 %v4782_v10  ;;  %3440 = vmatprep.subr.bf16.mxu1 %v5215_v45 }
 0xd02   :  { %2449 = vmatpush1.bf16.msra.mxu0 %v4787_v13  ;;  %3441 = vmatpush3.bf16.msra.mxu1 %v4789_v24 }
 0xd03   :  { %2450 = vmatprep.subr.bf16.mxu0 %v4793_v15  ;;  %3442 = vmatprep.subr.bf16.mxu1 %v5215_v45 }
 0xd06   :  { %2451 = vmatpush1.bf16.msra.mxu0 %v4797_v54  ;;  %3443 = vmatpush3.bf16.msra.mxu1 %v4799_v43 }
 0xd07   :  { %2452 = vmatprep.subr.bf16.mxu0 %v4803_v44  ;;  %3444 = vmatprep.subr.bf16.mxu1 %v5215_v45 }
 0xd0a   :  { %2453 = vmatpush1.bf16.msra.mxu0 %v4807_v50  ;;  %3445 = vmatpush3.bf16.msra.mxu1 %v4809_v16 }
 0xd0b   :  { %2543 = vmatprep.subr.bf16.mxu0 %v4736_v37  ;;  %3450 = vmatprep.subr.bf16.mxu1 %v5215_v45 }
 0xdc0   :  { %v2367_v12 = vpop.f32.mrb[64].mxu0  ;;  %v2408_v38 = vpop.f32.mrb[80].mxu1 }
 0xdc1   :  { %v2414_v59 = vadd.f32 %v2367_v12, %v667_v1  ;;  %v2369_v25 = vpop.f32.mrb[65].mxu0  ;;  %v3428_v27 = vpop.f32.mrb[81].mxu1  ;;  %v2428_v0 = vadd.f32 %v4879_v40, %v2408_v38 }
 0xdc2   :  { %v2415_v53 = vadd.f32 %v2369_v25, %v669_v63  ;;  %v2371_v51 = vpop.f32.mrb[66].mxu0  ;;  %v2411_v6 = vpop.f32.mrb[82].mxu1  ;;  %v3640_v27 = vld [vmem:[#allocation8 + $0x8] sm:$0xff]  }
 0xdc3   :  { %v2936_v22 = vmul.f32 -1.442695, %v2414_v59  ;;  %v2372_v49 = vpop.f32.mrb[67].mxu0  ;;  %v3429_v9 = vpop.f32.mrb[83].mxu1  ;;  %v3641_v51 = vld [vmem:[#allocation8 + $0x10] sm:$0xff]   ;;  %v3642_v6 = vld [vmem:[#allocation8 + $0x18] sm:$0xff]  }
 0xdc4   :  { %v2937_v37 = vmul.f32 -1.442695, %v2415_v53  ;;  %v2654_v53 = vpack.c.bf16 %v4930_v21, %v4884_v36  ;;  %v3644_v49 = vld [vmem:[#allocation8 + $0x28] sm:$0xff]   ;;  %v3645_v9 = vld [vmem:[#allocation8 + $0x30] sm:$0xff]   ;;  %v3646_v36 = vld [vmem:[#allocation8 + $0x38] sm:$0xff]   ;;  %v2655_v21 = vpack.c.bf16 %v5022_v11, %v4976_v18 }
 0xdc5   :  { %3767 = vpow2.f32 %v2936_v22  ;;  %v3643_v22 = vld [vmem:[#allocation8 + $0x20] sm:$0xff]  }
 0xdc6   :  { %3769 = vpow2.f32 %v2937_v37 }
 0xdcf   :  { %v3768_v20 = vpop.eup %3767 }
 0xdd0   :  { %v2422_v29 = vadd.f32 1.0, %v3768_v20  ;;  %v3770_v30 = vpop.eup %3769 }
 0xdd1   :  { %v2423_v35 = vadd.f32 1.0, %v3770_v30 }
 0xdd2   :  { %3771 = vrcp.f32 %v2422_v29 }
 0xdd3   :  { %3773 = vrcp.f32 %v2423_v35 }
 0xddc   :  { %v3772_v41 = vpop.eup %3771 }
 0xddd   :  { %v2429_v60 = vmul.f32 %v3772_v41, %v2428_v0  ;;  %v3774_v58 = vpop.eup %3773 }
 0xdde   :  { %v2432_v48 = vsub.f32 1.0, %v3774_v58  ;;  %v2434_v26 = vmul.f32 %v3774_v58, %v5022_v11 }
 0xddf   :  { %v2430_v47 = vadd.f32 %v2429_v60, %v5236_v3 }
 0xde1   :  { %3775 = vtanh.f32 %v2430_v47 }
 0xdeb   :  { %v3776_v39 = vpop.eup %3775 }
 0xdec   :  { %v2433_v57 = vmul.f32 %v3776_v39, %v2432_v48 }
 0xdee   :  { %v5068_v46 = vadd.f32 %v2434_v26, %v2433_v57 }
 0xdf0   :  { %v2437_v7 = vpack.c.bf16 %v5068_v46, %v5068_v46 }
 0xdf2   :  { %2471 = vmatmul.mubr.bf16.vlgmr.msra.gmra.mrb[68].mxu0 %v2437_v7  ;;  %3447 = vmatmul.mubr.bf16.vlgmr.msra.gmra.mrb[84].mxu1 %v2437_v7 }
 0xdf3   :  { %2544 = vmatpush1.bf16.msra.mxu0 %v4738_v28  ;;  %3451 = vmatpush3.bf16.msra.mxu1 %v4740_v31  ;;  %v5237_v28 = vld [vmem:[#allocation24_spill] sm:$0xff] }
 0xdf4   :  { %2545 = vmatprep.subr.bf16.mxu0 %v4745_v42  ;;  %3452 = vmatprep.subr.bf16.mxu1 %v5215_v45  ;;  %v671_v31 = vadd.f32 %v5237_v28, %v4866_v34  ;;  %v5238_v42 = vld [vmem:[#allocation25_spill] sm:$0xff]  ;;  %v5240_v28 = vld [vmem:[#allocation32_spill] sm:$0xff] }
 0xdf5   :  { %2575 = vmatprep.mubr.bf16.mxu0 %v5216_v17  ;;  %3466 = vmatprep.mubr.msk.bf16.mxu1 %vm3931_vm0, %v5215_v45  ;;  %v3639_v17 = vld [vmem:[#allocation8] sm:$0xff]  }
 0xdf7   :  { %2546 = vmatpush1.bf16.msra.mxu0 %v4748_v32  ;;  %3453 = vmatpush3.bf16.msra.mxu1 %v4750_v19  ;;  %v673_v32 = vadd.f32 %v5238_v42, %v4870_v23 }
 0xdf8   :  { %2547 = vmatprep.subr.bf16.mxu0 %v4755_v61  ;;  %3454 = vmatprep.subr.bf16.mxu1 %v5215_v45 }
 0xdfb   :  { %2548 = vmatpush1.bf16.msra.mxu0 %v4758_v52  ;;  %3455 = vmatpush3.bf16.msra.mxu1 %v4760_v56 }
 0xdfc   :  { %2549 = vmatprep.subr.bf16.mxu0 %v4765_v62  ;;  %3456 = vmatprep.subr.bf16.mxu1 %v5215_v45 }
 0xdff   :  { %2550 = vmatpush1.bf16.msra.mxu0 %v4768_v2  ;;  %3457 = vmatpush3.bf16.msra.mxu1 %v4770_v4 }
 0xe00   :  { %2551 = vmatprep.subr.bf16.mxu0 %v4775_v33  ;;  %3458 = vmatprep.subr.bf16.mxu1 %v5215_v45 }
 0xe03   :  { %2552 = vmatpush1.bf16.msra.mxu0 %v4778_v55  ;;  %3459 = vmatpush3.bf16.msra.mxu1 %v4780_v5 }
 0xe04   :  { %2553 = vmatprep.subr.bf16.mxu0 %v4782_v10  ;;  %3460 = vmatprep.subr.bf16.mxu1 %v5215_v45 }
 0xe07   :  { %2554 = vmatpush1.bf16.msra.mxu0 %v4787_v13  ;;  %3461 = vmatpush3.bf16.msra.mxu1 %v4789_v24 }
 0xe08   :  { %2555 = vmatprep.subr.bf16.mxu0 %v4793_v15  ;;  %3462 = vmatprep.subr.bf16.mxu1 %v5215_v45 }
 0xe0b   :  { %2556 = vmatpush1.bf16.msra.mxu0 %v4797_v54  ;;  %3463 = vmatpush3.bf16.msra.mxu1 %v4799_v43 }
 0xe0c   :  { %2557 = vmatprep.subr.bf16.mxu0 %v4803_v44  ;;  %3464 = vmatprep.subr.bf16.mxu1 %v5215_v45 }
 0xe0f   :  { %2558 = vmatpush1.bf16.msra.mxu0 %v4807_v50  ;;  %3465 = vmatpush3.bf16.msra.mxu1 %v4809_v16  ;;  %v5239_v16 = vld [vmem:[#allocation34_spill] sm:$0xff] }
 0xe10   :  { %3470 = vmatprep.subr.bf16.mxu0 %v3639_v17 }
 0xec5   :  { %v2472_v19 = vpop.f32.mrb[68].mxu0  ;;  %v2513_v61 = vpop.f32.mrb[84].mxu1 }
 0xec6   :  { %v2519_v52 = vadd.f32 %v2472_v19, %v671_v31  ;;  %v2474_v56 = vpop.f32.mrb[69].mxu0  ;;  %v3448_v62 = vpop.f32.mrb[85].mxu1  ;;  %v2533_v43 = vadd.f32 %v4879_v40, %v2513_v61 }
 0xec7   :  { %v2520_v2 = vadd.f32 %v2474_v56, %v673_v32  ;;  %v2476_v4 = vpop.f32.mrb[70].mxu0  ;;  %v2516_v45 = vpop.f32.mrb[86].mxu1 }
 0xec8   :  { %v2938_v33 = vmul.f32 -1.442695, %v2519_v52  ;;  %v2477_v55 = vpop.f32.mrb[71].mxu0  ;;  %v3449_v5 = vpop.f32.mrb[87].mxu1  ;;  %v3820_v52 = vld [vmem:[%s5173_s1 + $0x10] sm:$0xff] }
 0xec9   :  { %v2939_v10 = vmul.f32 -1.442695, %v2520_v2  ;;  %v3821_v2 = vld [vmem:[%s5173_s1] sm:$0xff] }
 0xeca   :  { %3777 = vpow2.f32 %v2938_v33 }
 0xecb   :  { %3779 = vpow2.f32 %v2939_v10 }
 0xed4   :  { %v3778_v13 = vpop.eup %3777 }
 0xed5   :  { %v2527_v24 = vadd.f32 1.0, %v3778_v13  ;;  %v3780_v15 = vpop.eup %3779 }
 0xed6   :  { %v2528_v54 = vadd.f32 1.0, %v3780_v15 }
 0xed7   :  { %3781 = vrcp.f32 %v2527_v24 }
 0xed8   :  { %3783 = vrcp.f32 %v2528_v54 }
 0xee1   :  { %v3782_v44 = vpop.eup %3781 }
 0xee2   :  { %v2534_v50 = vmul.f32 %v3782_v44, %v2533_v43  ;;  %v3784_v1 = vpop.eup %3783 }
 0xee3   :  { %v2537_v14 = vsub.f32 1.0, %v3784_v1  ;;  %v2539_v38 = vmul.f32 %v3784_v1, %v5068_v46 }
 0xee4   :  { %v2535_v8 = vadd.f32 %v2534_v50, %v5239_v16 }
 0xee6   :  { %3785 = vtanh.f32 %v2535_v8 }
 0xef0   :  { %v3786_v63 = vpop.eup %3785 }
 0xef1   :  { %v2538_v12 = vmul.f32 %v3786_v63, %v2537_v14 }
 0xef3   :  { %v5112_v59 = vadd.f32 %v2539_v38, %v2538_v12 }
 0xef5   :  { %v2542_v25 = vpack.c.bf16 %v5112_v59, %v5112_v59  ;;  %v2656_v37 = vpack.c.bf16 %v5112_v59, %v5068_v46 }
 0xef7   :  { %2576 = vmatmul.mubr.bf16.vlgmr.msra.gmra.mrb[12].mxu0 %v2542_v25  ;;  %3467 = vmatmul.mubr.bf16.vlgmr.msra.gmra.mrb[88].mxu1 %v2542_v25 }
 0xef8   :  { %3471 = vmatpush3.bf16.msra.mxu0 %v3639_v17  ;;  %3486 = vmatprep.mubr.bf16.mxu0 %v2654_v53  ;;  %v2942_v17 = vld [vmem:[%s5183_s11] ss:$0 sm:$0xff] }
 0xef9   :  { %3472 = vmatprep.subr.bf16.mxu0 %v3640_v27 }
 0xefc   :  { %3473 = vmatpush3.bf16.msra.mxu0 %v3640_v27 }
 0xefd   :  { %3474 = vmatprep.subr.bf16.mxu0 %v3641_v51 }
 0xf00   :  { %3475 = vmatpush3.bf16.msra.mxu0 %v3641_v51 }
 0xf01   :  { %3476 = vmatprep.subr.bf16.mxu0 %v3642_v6 }
 0xf04   :  { %3477 = vmatpush3.bf16.msra.mxu0 %v3642_v6 }
 0xf05   :  { %3478 = vmatprep.subr.bf16.mxu0 %v3643_v22 }
 0xf08   :  { %3479 = vmatpush3.bf16.msra.mxu0 %v3643_v22 }
 0xf09   :  { %3480 = vmatprep.subr.bf16.mxu0 %v3644_v49 }
 0xf0c   :  { %3481 = vmatpush3.bf16.msra.mxu0 %v3644_v49 }
 0xf0d   :  { %3482 = vmatprep.subr.bf16.mxu0 %v3645_v9 }
 0xf10   :  { %3483 = vmatpush3.bf16.msra.mxu0 %v3645_v9 }
 0xf11   :  { %3484 = vmatprep.subr.bf16.mxu0 %v3646_v36 }
 0xf14   :  { %3485 = vmatpush3.bf16.msra.mxu0 %v3646_v36 }
 0xf17   :  { %3487 = vmatmul.mubr.bf16.vlgmr.msra.gmra.mrb[72].mxu0 %v2655_v21 }
 0xf18   :  { %3490 = vmatprep.mubr.bf16.mxu0 %v2656_v37 }
 0xfca   :  { %v2577_v20 = vpop.f32.mrb[12].mxu0  ;;  %v2618_v29 = vpop.f32.mrb[88].mxu1 }
 0xfcb   :  { %v3494_v30 = vadd.f32 %v2577_v20, %v4866_v34  ;;  %v2579_v35 = vpop.f32.mrb[13].mxu0  ;;  %v3468_v0 = vpop.f32.mrb[89].mxu1  ;;  %v2638_v46 = vadd.f32 %v4879_v40, %v2618_v29 }
 0xfcc   :  { %v2581_v41 = vpop.f32.mrb[14].mxu0  ;;  %v2621_v60 = vpop.f32.mrb[90].mxu1  ;;  %v3495_v48 = vadd.f32 %v2579_v35, %v4870_v23 }
 0xfcd   :  { %v2940_v3 = vmul.f32 -1.442695, %v3494_v30  ;;  %v2582_v47 = vpop.f32.mrb[15].mxu0  ;;  %v3469_v58 = vpop.f32.mrb[91].mxu1 }
 0xfce   :  { %v2941_v18 = vmul.f32 -1.442695, %v3495_v48 }
 0xfcf   :  { %3787 = vpow2.f32 %v2940_v3 }
 0xfd0   :  { %3789 = vpow2.f32 %v2941_v18 }
 0xfd9   :  { %v3788_v11 = vpop.eup %3787 }
 0xfda   :  { %v2632_v39 = vadd.f32 1.0, %v3788_v11  ;;  %v3790_v57 = vpop.eup %3789 }
 0xfdb   :  { %v2633_v26 = vadd.f32 1.0, %v3790_v57 }
 0xfdc   :  { %3791 = vrcp.f32 %v2632_v39 }
 0xfdd   :  { %3793 = vrcp.f32 %v2633_v26 }
 0xfe6   :  { %v3792_v34 = vpop.eup %3791 }
 0xfe7   :  { %v2639_v7 = vmul.f32 %v3792_v34, %v2638_v46  ;;  %v3794_v13 = vpop.eup %3793 }
 0xfe8   :  { %v2642_v24 = vsub.f32 1.0, %v3794_v13  ;;  %v2644_v43 = vmul.f32 %v3794_v13, %v5112_v59 }
 0xfe9   :  { %v2640_v31 = vadd.f32 %v2639_v7, %v5240_v28 }
 0xfea   :  { %v3488_v23 = vpop.f32.mrb[72].mxu0 }
 0xfeb   :  { %3795 = vtanh.f32 %v2640_v31  ;;  %v2772_v42 = vadd.f32 %v3488_v23, %v2942_v17  ;;  %v2763_v32 = vpop.f32.mrb[73].mxu0 }
 0xfec   :  { %v2764_v19 = vadd.f32 %v2942_v17, %v2763_v32  ;;  %v3489_v61 = vpop.f32.mrb[74].mxu0 }
 0xfed   :  { %v2795_v40 = vadd.f32 %v3820_v52, %v2772_v42  ;;  %v2775_v56 = vadd.f32 %v3489_v61, %v2942_v17  ;;  %v2766_v62 = vpop.f32.mrb[75].mxu0 }
 0xfee   :  { %v2793_v4 = vadd.f32 %v3821_v2, %v2764_v19  ;;  %v2767_v45 = vadd.f32 %v2942_v17, %v2766_v62 }
 0xfef   :  { %2802 = vst [vmem:[%s5184_s12 + $0x10] sm:$0xff] %v2795_v40 }
 0xff5   :  { %v3796_v15 = vpop.eup %3795 }
 0xff6   :  { %v3822_v33 = vld [vmem:[%s5173_s1 + $0x18] sm:$0xff]  ;;  %v2643_v54 = vmul.f32 %v3796_v15, %v2642_v24 }
 0xff7   :  { %v2796_v55 = vadd.f32 %v3822_v33, %v2775_v56  ;;  %2800 = vst [vmem:[%s5184_s12] sm:$0xff] %v2793_v4 }
 0xff8   :  { %v2645_v44 = vadd.f32 %v2644_v43, %v2643_v54 }
 0xffa   :  { %v2657_v50 = vpack.c.bf16 %v2645_v44, %v2645_v44 }
 0xffc   :  { %3491 = vmatmul.mubr.bf16.gmra.mrb[76].mxu0 %v2657_v50 }
 0xffe   :  { %v3823_v5 = vld [vmem:[%s5173_s1 + $0x8] sm:$0xff] }
 0xfff   :  { %v2794_v10 = vadd.f32 %v3823_v5, %v2767_v45  ;;  %2803 = vst [vmem:[%s5184_s12 + $0x18] sm:$0xff] %v2796_v55 }
0x1001   :  { %2801 = vst [vmem:[%s5184_s12 + $0x8] sm:$0xff] %v2794_v10 }
0x1008   :  { %v3824_v12 = vld [vmem:[%s5173_s1 + $0x30] sm:$0xff]  ;;  %v3825_v27 = vld [vmem:[%s5173_s1 + $0x20] sm:$0xff] }
0x10cf   :  { %v3492_v16 = vpop.f32.mrb[76].mxu0 }
0x10d0   :  { %v2788_v8 = vadd.f32 %v3492_v16, %v2942_v17  ;;  %v2779_v1 = vpop.f32.mrb[77].mxu0 }
0x10d1   :  { %v2780_v14 = vadd.f32 %v2942_v17, %v2779_v1  ;;  %v3493_v63 = vpop.f32.mrb[78].mxu0 }
0x10d2   :  { %v2799_v38 = vadd.f32 %v3824_v12, %v2788_v8  ;;  %v2782_v25 = vpop.f32.mrb[79].mxu0 }
0x10d3   :  { %v2797_v53 = vadd.f32 %v3825_v27, %v2780_v14  ;;  %v2783_v59 = vadd.f32 %v2942_v17, %v2782_v25 }
0x10d4   :  { %2806 = vst [vmem:[%s5184_s12 + $0x30] sm:$0xff] %v2799_v38 }
0x10d5   :  { %2804 = vst [vmem:[%s5184_s12 + $0x20] sm:$0xff] %v2797_v53 }
0x10dc   :  { %v3826_v51 = vld [vmem:[%s5173_s1 + $0x28] sm:$0xff] }
0x10dd   :  { %v2798_v6 = vadd.f32 %v3826_v51, %v2783_v59 }
0x10df   :  { %2805 = vst [vmem:[%s5184_s12 + $0x28] sm:$0xff] %v2798_v6 }
0x10e0   :  { %2811 = vsyncpa [#allocation4], 1 }
0x10e1   :  { %2812 = vsyncpa [#allocation6], 1 }
0x10e2   :  { %2813 = vsyncpa [#allocation9], 1 }

</bundles_post_ra>
